<compile_context>
chip_gen: v6e
topology: v6e:2x2x1
jax: 0.10.0
libtpu: 0.0.40
codegen_flags: <defaults>
</compile_context>

<pallas_src>
import functools
import math

import jax
import jax.numpy as jnp
import numpy as np
from jax import lax
from jax.experimental import pallas as pl
from jax.experimental.pallas import tpu as pltpu

_EPS = 1e-5  # PyTorch GroupNorm default eps


# ------------------------------ kernel helpers ------------------------------

def _gn_silu(y, gamma, beta):
    """GroupNorm(num_groups=1) over the whole (C, N) sample slab + SiLU.

    Single-pass statistics (sum and sum-of-squares); gamma/beta are (C, 1) so
    the per-channel affine broadcasts along the lane-dense N axis.
    """
    cnt = float(y.shape[0] * y.shape[1])
    s1 = jnp.sum(y)
    s2 = jnp.sum(y * y)
    mean = s1 / cnt
    var = jnp.maximum(s2 / cnt - mean * mean, 0.0)
    inv = lax.rsqrt(var + _EPS)
    yn = (y - mean) * inv * gamma + beta
    return yn * (1.0 / (1.0 + jnp.exp(-yn)))        # SiLU; exp lands on the EUP


def _resblock_kernel(x_ref, mask_ref, w1_ref, w2_ref, wres_ref, vec_ref,
                     out_ref, p_ref, *, D, H, W):
    """One fused ResBlock for one batch element (channels-first, flat spatial).

    x_ref   : (1, Cin, N)    N = D*H*W on lanes (lane-dense)
    mask_ref: (8, N)         rows 0..5 = [d>=1, d<=D-2, h>=1, h<=H-2, w>=1, w<=W-2]
    w1_ref  : (Cmid, 27*Cin)   conv1 taps folded into the contraction dim
    w2_ref  : (Cout, 27*Cmid)  conv2 taps folded into the contraction dim
    wres_ref: (Cout, Cin)      1x1x1 residual conv
    vec_ref : (Cout, 8)      cols = [b1, g1w, g1b, b2, g2w, g2b, bres, 0]
    out_ref : (1, Cout, N)
    p_ref   : VMEM scratch (27*max(Cin,Cmid), N), shared im2col buffer for
              both convs (every used row is fully rewritten — no zeroing).
    """
    Cin = x_ref.shape[1]
    Cmid = w1_ref.shape[0]
    N = D * H * W
    HW = H * W

    x = x_ref[0]                                     # (Cin, N), lane-dense

    # Per-axis validity masks, shared by both convs (computed once per step).
    ones = jnp.ones((1, N), jnp.float32)
    md = {-1: mask_ref[0:1, :], 0: ones, 1: mask_ref[1:2, :]}
    mh = {-1: mask_ref[2:3, :], 0: ones, 1: mask_ref[3:4, :]}
    mw = {-1: mask_ref[4:5, :], 0: ones, 1: mask_ref[5:6, :]}
    taps = []                                        # [(flat offset, (1,N) mask)]
    for dd in (-1, 0, 1):
        for dh in (-1, 0, 1):
            for dw in (-1, 0, 1):
                off = dd * HW + dh * W + dw
                m = None if off == 0 else md[dd] * mh[dh] * mw[dw]
                taps.append((off, m))

    def build_patches(v, C):
        # Writes the (27*C, N) im2col matrix of `v` into p_ref[:27*C].  Row
        # block k holds `v` shifted by the k-th tap offset along the flat
        # spatial axis (pltpu.roll = XLU work); out-of-volume contributions
        # are zeroed by the mask, which also kills the roll's wrap-around.
        for k, (off, m) in enumerate(taps):
            if off == 0:
                slab = v                              # center tap: no shift/mask
            else:
                slab = pltpu.roll(v, (-off) % N, axis=1) * m
            p_ref[k * C:(k + 1) * C, :] = slab

    # ---- conv1: single big matmul, K = 27*Cin ----
    build_patches(x, Cin)
    y1 = jnp.dot(w1_ref[...], p_ref[0:27 * Cin, :],
                 preferred_element_type=jnp.float32)
    y1 = _gn_silu(y1 + vec_ref[:, 0:1], vec_ref[:, 1:2], vec_ref[:, 2:3])

    # ---- conv2: single big matmul, K = 27*Cmid (scratch rows reused) ----
    build_patches(y1, Cmid)
    y2 = jnp.dot(w2_ref[...], p_ref[0:27 * Cmid, :],
                 preferred_element_type=jnp.float32)
    y2 = _gn_silu(y2 + vec_ref[:, 3:4], vec_ref[:, 4:5], vec_ref[:, 5:6])

    # ---- 1x1x1 residual conv + add (lane-dense output store) ----
    res = jnp.dot(wres_ref[...], x, preferred_element_type=jnp.float32)
    out_ref[0] = (y2 + res + vec_ref[:, 6:7]).astype(out_ref.dtype)


# ------------------------------ pallas wrapper -------------------------------

def _boundary_masks(D, H, W):
    """(8, N) f32 boundary-validity masks for tap offsets of -1/+1 per axis."""
    n = np.arange(D * H * W)
    d = n // (H * W)
    h = (n // W) % H
    w = n % W
    rows = np.stack([
        d >= 1, d <= D - 2,
        h >= 1, h <= H - 2,
        w >= 1, w <= W - 2,
        np.ones_like(d, dtype=bool), np.ones_like(d, dtype=bool),  # pad to 8 rows
    ]).astype(np.float32)
    return jnp.asarray(rows)


def resblock_apply(x, masks, p, D, H, W):
    """x: (B, Cin, N) f32 channels-first flat layout. Returns (B, Cout, N)."""
    B, Cin, N = x.shape
    Cmid = p["w1"].shape[0]
    Cout = p["w2"].shape[0]
    Cmax = max(Cin, Cmid)

    kernel = functools.partial(_resblock_kernel, D=D, H=H, W=W)
    grid_spec = pltpu.PrefetchScalarGridSpec(
        num_scalar_prefetch=0,
        grid=(B,),
        in_specs=[
            pl.BlockSpec((1, Cin, N), lambda b: (b, 0, 0)),
            pl.BlockSpec(masks.shape, lambda b: (0, 0)),
            pl.BlockSpec(p["w1"].shape, lambda b: (0, 0)),
            pl.BlockSpec(p["w2"].shape, lambda b: (0, 0)),
            pl.BlockSpec(p["wres"].shape, lambda b: (0, 0)),
            pl.BlockSpec(p["vecs"].shape, lambda b: (0, 0)),
        ],
        out_specs=pl.BlockSpec((1, Cout, N), lambda b: (b, 0, 0)),
        scratch_shapes=[
            pltpu.VMEM((27 * Cmax, N), jnp.float32),   # shared im2col buffer
        ],
    )
    return pl.pallas_call(
        kernel,
        out_shape=jax.ShapeDtypeStruct((B, Cout, N), jnp.float32),
        grid_spec=grid_spec,
        compiler_params=pltpu.CompilerParams(
            dimension_semantics=("parallel",)),
    )(x, masks, p["w1"], p["w2"], p["wres"], p["vecs"])


def stage_block_forward(x, layer_params, channels_first=True):
    """StageBlock.forward. x is NCDHW when channels_first=True (PyTorch convention)."""
    if not channels_first:
        x = jnp.transpose(x, (0, 4, 1, 2, 3))          # NDHWC -> NCDHW
    B, C, D, H, W = x.shape
    masks = _boundary_masks(D, H, W)                   # shared by all ResBlocks
    xf = x.reshape(B, C, D * H * W)                    # lane-dense flat layout
    for p in layer_params:                             # nn.Sequential of ResBlocks
        xf = resblock_apply(xf, masks, p, D, H, W)
    out = xf.reshape(B, xf.shape[1], D, H, W)
    if not channels_first:
        out = jnp.transpose(out, (0, 2, 3, 4, 1))      # NCDHW -> NDHWC
    return out


# ------------------------- deterministic parameters -------------------------

def init_resblock_params(key, in_ch, out_ch):
    ks = jax.random.split(key, 5)

    def conv_w(k, o, i, ksz):
        # PyTorch Conv3d weight (O, I, kD, kH, kW) repacked to (O, ksz^3 * I);
        # column index = (kd*ksz*ksz + kh*ksz + kw)*I + i, matching the
        # kernel's im2col row order (taps outer, channels inner).
        fan_in = i * ksz ** 3
        w = jax.random.normal(k, (o, i, ksz, ksz, ksz), jnp.float32) / math.sqrt(fan_in)
        return jnp.transpose(w, (0, 2, 3, 4, 1)).reshape(o, ksz ** 3 * i)

    b1 = 0.1 * jax.random.normal(ks[1], (out_ch,), jnp.float32)
    b2 = 0.1 * jax.random.normal(ks[3], (out_ch,), jnp.float32)
    ones = jnp.ones((out_ch,), jnp.float32)
    zeros = jnp.zeros((out_ch,), jnp.float32)
    # Packed per-channel vectors: [b1, g1w, g1b, b2, g2w, g2b, bres, pad]
    vecs = jnp.stack([b1, ones, zeros, b2, ones, zeros, zeros, zeros], axis=1)

    return dict(
        w1=conv_w(ks[0], out_ch, in_ch, 3),       # (out_ch, 27*in_ch)
        w2=conv_w(ks[2], out_ch, out_ch, 3),      # (out_ch, 27*out_ch)
        wres=conv_w(ks[4], out_ch, in_ch, 1),     # (out_ch, in_ch)
        vecs=vecs,                                # (out_ch, 8)
    )


# --------------------------- pure-JAX reference -----------------------------

def _conv3d_ref(x, w_packed, b, ksz):
    O = w_packed.shape[0]
    I = w_packed.shape[1] // ksz ** 3
    w = w_packed.reshape(O, ksz, ksz, ksz, I).transpose(0, 4, 1, 2, 3)  # OIDHW
    pad = (ksz - 1) // 2
    y = lax.conv_general_dilated(
        x, w, window_strides=(1, 1, 1), padding=[(pad, pad)] * 3,
        dimension_numbers=("NCDHW", "OIDHW", "NCDHW"))
    return y + b.reshape(1, O, 1, 1, 1)


def _gn_silu_ref(x, gamma, beta):
    mean = jnp.mean(x, axis=(1, 2, 3, 4), keepdims=True)
    var = jnp.mean(jnp.square(x - mean), axis=(1, 2, 3, 4), keepdims=True)
    y = (x - mean) * lax.rsqrt(var + _EPS)
    y = y * gamma.reshape(1, -1, 1, 1, 1) + beta.reshape(1, -1, 1, 1, 1)
    return y * jax.nn.sigmoid(y)


def _resblock_ref(x, p):
    v = p["vecs"]
    res = jnp.einsum("oi,bidhw->bodhw", p["wres"], x) + v[:, 6].reshape(1, -1, 1, 1, 1)
    y = _gn_silu_ref(_conv3d_ref(x, p["w1"], v[:, 0], 3), v[:, 1], v[:, 2])
    y = _gn_silu_ref(_conv3d_ref(y, p["w2"], v[:, 3], 3), v[:, 4], v[:, 5])
    return y + res


def stage_block_reference(x, layer_params, channels_first=True):
    if not channels_first:
        x = jnp.transpose(x, (0, 4, 1, 2, 3))
    for p in layer_params:
        x = _resblock_ref(x, p)
    if not channels_first:
        x = jnp.transpose(x, (0, 2, 3, 4, 1))
    return x


# ---------------------------------- main -------------------------------------

if __name__ == "__main__":
    num_channels, depth, has_skip_conn = 4, 2, True
    B, D, H, W = 2, 8, 8, 8

    in_chs = [num_channels] * depth
    out_chs = [num_channels] * depth
    if has_skip_conn:
        in_chs[0] = num_channels * 2   # skip-connection concat doubles input channels

    root = jax.random.PRNGKey(0)
    keys = jax.random.split(root, depth + 1)
    layer_params = [init_resblock_params(keys[i], ic, oc)
                    for i, (ic, oc) in enumerate(zip(in_chs, out_chs))]

    # PyTorch-convention input: NCDHW
    x = jax.random.normal(keys[-1], (B, in_chs[0], D, H, W), jnp.float32)

    out = jax.block_until_ready(stage_block_forward(x, layer_params, channels_first=True))
    ref = jax.block_until_ready(stage_block_reference(x, layer_params, channels_first=True))

    assert out.shape == (B, num_channels, D, H, W), out.shape
    np.testing.assert_allclose(np.asarray(out), np.asarray(ref), rtol=1e-3, atol=1e-3)
    print("KERNEL_OK")
</pallas_src>

<mosaic_0001>
module attributes {stable_mosaic.version = 11 : i64} {
  func.func @_resblock_kernel(%arg0: i32, %arg1: memref<1x8x512xf32, #tpu.memory_space<vmem>>, %arg2: memref<8x512xf32, #tpu.memory_space<vmem>>, %arg3: memref<4x216xf32, #tpu.memory_space<vmem>>, %arg4: memref<4x108xf32, #tpu.memory_space<vmem>>, %arg5: memref<4x8xf32, #tpu.memory_space<vmem>>, %arg6: memref<4x8xf32, #tpu.memory_space<vmem>>, %arg7: memref<1x4x512xf32, #tpu.memory_space<vmem>>, %arg8: memref<216x512xf32, #tpu.memory_space<vmem>>) attributes {dimension_semantics = [#tpu.dimension_semantics<parallel>], iteration_bounds = array<i64: 2>, scalar_prefetch = 0 : i64, scratch_operands = 1 : i64, tpu.core_type = #tpu.core_type<tc>, window_params = [{transform_indices = @transform_0, window_bounds = array<i64: 1, 8, 512>}, {pipeline_mode = #tpu.pipeline_mode<synchronous>, transform_indices = @transform_1, window_bounds = array<i64: 8, 512>}, {pipeline_mode = #tpu.pipeline_mode<synchronous>, transform_indices = @transform_2, window_bounds = array<i64: 4, 216>}, {pipeline_mode = #tpu.pipeline_mode<synchronous>, transform_indices = @transform_3, window_bounds = array<i64: 4, 108>}, {pipeline_mode = #tpu.pipeline_mode<synchronous>, transform_indices = @transform_4, window_bounds = array<i64: 4, 8>}, {pipeline_mode = #tpu.pipeline_mode<synchronous>, transform_indices = @transform_5, window_bounds = array<i64: 4, 8>}, {transform_indices = @transform_6, window_bounds = array<i64: 1, 4, 512>}]} {
    %c0 = arith.constant 0 : index
    %c0_0 = arith.constant 0 : index
    %c0_1 = arith.constant 0 : index
    %0 = vector.load %arg1[%c0, %c0_0, %c0_1] : memref<1x8x512xf32, #tpu.memory_space<vmem>>, vector<1x8x512xf32>
    %1 = vector.shape_cast %0 : vector<1x8x512xf32> to vector<8x512xf32>
    %cst = arith.constant 1.000000e+00 : f32
    %2 = vector.broadcast %cst : f32 to vector<1x512xf32>
    %c0_2 = arith.constant 0 : index
    %c0_3 = arith.constant 0 : index
    %3 = vector.load %arg2[%c0_2, %c0_3] : memref<8x512xf32, #tpu.memory_space<vmem>>, vector<1x512xf32>
    %c1 = arith.constant 1 : index
    %c0_4 = arith.constant 0 : index
    %4 = vector.load %arg2[%c1, %c0_4] : memref<8x512xf32, #tpu.memory_space<vmem>>, vector<1x512xf32>
    %c2 = arith.constant 2 : index
    %c0_5 = arith.constant 0 : index
    %5 = vector.load %arg2[%c2, %c0_5] : memref<8x512xf32, #tpu.memory_space<vmem>>, vector<1x512xf32>
    %c3 = arith.constant 3 : index
    %c0_6 = arith.constant 0 : index
    %6 = vector.load %arg2[%c3, %c0_6] : memref<8x512xf32, #tpu.memory_space<vmem>>, vector<1x512xf32>
    %c4 = arith.constant 4 : index
    %c0_7 = arith.constant 0 : index
    %7 = vector.load %arg2[%c4, %c0_7] : memref<8x512xf32, #tpu.memory_space<vmem>>, vector<1x512xf32>
    %c5 = arith.constant 5 : index
    %c0_8 = arith.constant 0 : index
    %8 = vector.load %arg2[%c5, %c0_8] : memref<8x512xf32, #tpu.memory_space<vmem>>, vector<1x512xf32>
    %9 = arith.mulf %3, %5 : vector<1x512xf32>
    %10 = arith.mulf %9, %7 : vector<1x512xf32>
    %11 = arith.mulf %3, %5 : vector<1x512xf32>
    %12 = arith.mulf %11, %2 : vector<1x512xf32>
    %13 = arith.mulf %3, %5 : vector<1x512xf32>
    %14 = arith.mulf %13, %8 : vector<1x512xf32>
    %15 = arith.mulf %3, %2 : vector<1x512xf32>
    %16 = arith.mulf %15, %7 : vector<1x512xf32>
    %17 = arith.mulf %3, %2 : vector<1x512xf32>
    %18 = arith.mulf %17, %2 : vector<1x512xf32>
    %19 = arith.mulf %3, %2 : vector<1x512xf32>
    %20 = arith.mulf %19, %8 : vector<1x512xf32>
    %21 = arith.mulf %3, %6 : vector<1x512xf32>
    %22 = arith.mulf %21, %7 : vector<1x512xf32>
    %23 = arith.mulf %3, %6 : vector<1x512xf32>
    %24 = arith.mulf %23, %2 : vector<1x512xf32>
    %25 = arith.mulf %3, %6 : vector<1x512xf32>
    %26 = arith.mulf %25, %8 : vector<1x512xf32>
    %27 = arith.mulf %2, %5 : vector<1x512xf32>
    %28 = arith.mulf %27, %7 : vector<1x512xf32>
    %29 = arith.mulf %2, %5 : vector<1x512xf32>
    %30 = arith.mulf %29, %2 : vector<1x512xf32>
    %31 = arith.mulf %2, %5 : vector<1x512xf32>
    %32 = arith.mulf %31, %8 : vector<1x512xf32>
    %33 = arith.mulf %2, %2 : vector<1x512xf32>
    %34 = arith.mulf %33, %7 : vector<1x512xf32>
    %35 = arith.mulf %2, %2 : vector<1x512xf32>
    %36 = arith.mulf %35, %8 : vector<1x512xf32>
    %37 = arith.mulf %2, %6 : vector<1x512xf32>
    %38 = arith.mulf %37, %7 : vector<1x512xf32>
    %39 = arith.mulf %2, %6 : vector<1x512xf32>
    %40 = arith.mulf %39, %2 : vector<1x512xf32>
    %41 = arith.mulf %2, %6 : vector<1x512xf32>
    %42 = arith.mulf %41, %8 : vector<1x512xf32>
    %43 = arith.mulf %4, %5 : vector<1x512xf32>
    %44 = arith.mulf %43, %7 : vector<1x512xf32>
    %45 = arith.mulf %4, %5 : vector<1x512xf32>
    %46 = arith.mulf %45, %2 : vector<1x512xf32>
    %47 = arith.mulf %4, %5 : vector<1x512xf32>
    %48 = arith.mulf %47, %8 : vector<1x512xf32>
    %49 = arith.mulf %4, %2 : vector<1x512xf32>
    %50 = arith.mulf %49, %7 : vector<1x512xf32>
    %51 = arith.mulf %4, %2 : vector<1x512xf32>
    %52 = arith.mulf %51, %2 : vector<1x512xf32>
    %53 = arith.mulf %4, %2 : vector<1x512xf32>
    %54 = arith.mulf %53, %8 : vector<1x512xf32>
    %55 = arith.mulf %4, %6 : vector<1x512xf32>
    %56 = arith.mulf %55, %7 : vector<1x512xf32>
    %57 = arith.mulf %4, %6 : vector<1x512xf32>
    %58 = arith.mulf %57, %2 : vector<1x512xf32>
    %59 = arith.mulf %4, %6 : vector<1x512xf32>
    %60 = arith.mulf %59, %8 : vector<1x512xf32>
    %c73_i32 = arith.constant 73 : i32
    %61 = tpu.dynamic_rotate %1 by %c73_i32 dim 1 : vector<8x512xf32>, i32 -> vector<8x512xf32>
    %62 = vector.broadcast %10 : vector<1x512xf32> to vector<8x512xf32>
    %63 = arith.mulf %61, %62 : vector<8x512xf32>
    %c0_9 = arith.constant 0 : index
    %c0_10 = arith.constant 0 : index
    %64 = vector.load %arg8[%c0_9, %c0_10] : memref<216x512xf32, #tpu.memory_space<vmem>>, vector<8x512xf32>
    tpu.vector_store %arg8[%c0_9, %c0_10], %63 {strides = array<i32>} : memref<216x512xf32, #tpu.memory_space<vmem>>, vector<8x512xf32>,
    %c72_i32 = arith.constant 72 : i32
    %65 = tpu.dynamic_rotate %1 by %c72_i32 dim 1 : vector<8x512xf32>, i32 -> vector<8x512xf32>
    %66 = vector.broadcast %12 : vector<1x512xf32> to vector<8x512xf32>
    %67 = arith.mulf %65, %66 : vector<8x512xf32>
    %c8 = arith.constant 8 : index
    %c0_11 = arith.constant 0 : index
    %68 = vector.load %arg8[%c8, %c0_11] : memref<216x512xf32, #tpu.memory_space<vmem>>, vector<8x512xf32>
    tpu.vector_store %arg8[%c8, %c0_11], %67 {strides = array<i32>} : memref<216x512xf32, #tpu.memory_space<vmem>>, vector<8x512xf32>,
    %c71_i32 = arith.constant 71 : i32
    %69 = tpu.dynamic_rotate %1 by %c71_i32 dim 1 : vector<8x512xf32>, i32 -> vector<8x512xf32>
    %70 = vector.broadcast %14 : vector<1x512xf32> to vector<8x512xf32>
    %71 = arith.mulf %69, %70 : vector<8x512xf32>
    %c16 = arith.constant 16 : index
    %c0_12 = arith.constant 0 : index
    %72 = vector.load %arg8[%c16, %c0_12] : memref<216x512xf32, #tpu.memory_space<vmem>>, vector<8x512xf32>
    tpu.vector_store %arg8[%c16, %c0_12], %71 {strides = array<i32>} : memref<216x512xf32, #tpu.memory_space<vmem>>, vector<8x512xf32>,
    %c65_i32 = arith.constant 65 : i32
    %73 = tpu.dynamic_rotate %1 by %c65_i32 dim 1 : vector<8x512xf32>, i32 -> vector<8x512xf32>
    %74 = vector.broadcast %16 : vector<1x512xf32> to vector<8x512xf32>
    %75 = arith.mulf %73, %74 : vector<8x512xf32>
    %c24 = arith.constant 24 : index
    %c0_13 = arith.constant 0 : index
    %76 = vector.load %arg8[%c24, %c0_13] : memref<216x512xf32, #tpu.memory_space<vmem>>, vector<8x512xf32>
    tpu.vector_store %arg8[%c24, %c0_13], %75 {strides = array<i32>} : memref<216x512xf32, #tpu.memory_space<vmem>>, vector<8x512xf32>,
    %c64_i32 = arith.constant 64 : i32
    %77 = tpu.dynamic_rotate %1 by %c64_i32 dim 1 : vector<8x512xf32>, i32 -> vector<8x512xf32>
    %78 = vector.broadcast %18 : vector<1x512xf32> to vector<8x512xf32>
    %79 = arith.mulf %77, %78 : vector<8x512xf32>
    %c32 = arith.constant 32 : index
    %c0_14 = arith.constant 0 : index
    %80 = vector.load %arg8[%c32, %c0_14] : memref<216x512xf32, #tpu.memory_space<vmem>>, vector<8x512xf32>
    tpu.vector_store %arg8[%c32, %c0_14], %79 {strides = array<i32>} : memref<216x512xf32, #tpu.memory_space<vmem>>, vector<8x512xf32>,
    %c63_i32 = arith.constant 63 : i32
    %81 = tpu.dynamic_rotate %1 by %c63_i32 dim 1 : vector<8x512xf32>, i32 -> vector<8x512xf32>
    %82 = vector.broadcast %20 : vector<1x512xf32> to vector<8x512xf32>
    %83 = arith.mulf %81, %82 : vector<8x512xf32>
    %c40 = arith.constant 40 : index
    %c0_15 = arith.constant 0 : index
    %84 = vector.load %arg8[%c40, %c0_15] : memref<216x512xf32, #tpu.memory_space<vmem>>, vector<8x512xf32>
    tpu.vector_store %arg8[%c40, %c0_15], %83 {strides = array<i32>} : memref<216x512xf32, #tpu.memory_space<vmem>>, vector<8x512xf32>,
    %c57_i32 = arith.constant 57 : i32
    %85 = tpu.dynamic_rotate %1 by %c57_i32 dim 1 : vector<8x512xf32>, i32 -> vector<8x512xf32>
    %86 = vector.broadcast %22 : vector<1x512xf32> to vector<8x512xf32>
    %87 = arith.mulf %85, %86 : vector<8x512xf32>
    %c48 = arith.constant 48 : index
    %c0_16 = arith.constant 0 : index
    %88 = vector.load %arg8[%c48, %c0_16] : memref<216x512xf32, #tpu.memory_space<vmem>>, vector<8x512xf32>
    tpu.vector_store %arg8[%c48, %c0_16], %87 {strides = array<i32>} : memref<216x512xf32, #tpu.memory_space<vmem>>, vector<8x512xf32>,
    %c56_i32 = arith.constant 56 : i32
    %89 = tpu.dynamic_rotate %1 by %c56_i32 dim 1 : vector<8x512xf32>, i32 -> vector<8x512xf32>
    %90 = vector.broadcast %24 : vector<1x512xf32> to vector<8x512xf32>
    %91 = arith.mulf %89, %90 : vector<8x512xf32>
    %c56 = arith.constant 56 : index
    %c0_17 = arith.constant 0 : index
    %92 = vector.load %arg8[%c56, %c0_17] : memref<216x512xf32, #tpu.memory_space<vmem>>, vector<8x512xf32>
    tpu.vector_store %arg8[%c56, %c0_17], %91 {strides = array<i32>} : memref<216x512xf32, #tpu.memory_space<vmem>>, vector<8x512xf32>,
    %c55_i32 = arith.constant 55 : i32
    %93 = tpu.dynamic_rotate %1 by %c55_i32 dim 1 : vector<8x512xf32>, i32 -> vector<8x512xf32>
    %94 = vector.broadcast %26 : vector<1x512xf32> to vector<8x512xf32>
    %95 = arith.mulf %93, %94 : vector<8x512xf32>
    %c64 = arith.constant 64 : index
    %c0_18 = arith.constant 0 : index
    %96 = vector.load %arg8[%c64, %c0_18] : memref<216x512xf32, #tpu.memory_space<vmem>>, vector<8x512xf32>
    tpu.vector_store %arg8[%c64, %c0_18], %95 {strides = array<i32>} : memref<216x512xf32, #tpu.memory_space<vmem>>, vector<8x512xf32>,
    %c9_i32 = arith.constant 9 : i32
    %97 = tpu.dynamic_rotate %1 by %c9_i32 dim 1 : vector<8x512xf32>, i32 -> vector<8x512xf32>
    %98 = vector.broadcast %28 : vector<1x512xf32> to vector<8x512xf32>
    %99 = arith.mulf %97, %98 : vector<8x512xf32>
    %c72 = arith.constant 72 : index
    %c0_19 = arith.constant 0 : index
    %100 = vector.load %arg8[%c72, %c0_19] : memref<216x512xf32, #tpu.memory_space<vmem>>, vector<8x512xf32>
    tpu.vector_store %arg8[%c72, %c0_19], %99 {strides = array<i32>} : memref<216x512xf32, #tpu.memory_space<vmem>>, vector<8x512xf32>,
    %c8_i32 = arith.constant 8 : i32
    %101 = tpu.dynamic_rotate %1 by %c8_i32 dim 1 : vector<8x512xf32>, i32 -> vector<8x512xf32>
    %102 = vector.broadcast %30 : vector<1x512xf32> to vector<8x512xf32>
    %103 = arith.mulf %101, %102 : vector<8x512xf32>
    %c80 = arith.constant 80 : index
    %c0_20 = arith.constant 0 : index
    %104 = vector.load %arg8[%c80, %c0_20] : memref<216x512xf32, #tpu.memory_space<vmem>>, vector<8x512xf32>
    tpu.vector_store %arg8[%c80, %c0_20], %103 {strides = array<i32>} : memref<216x512xf32, #tpu.memory_space<vmem>>, vector<8x512xf32>,
    %c7_i32 = arith.constant 7 : i32
    %105 = tpu.dynamic_rotate %1 by %c7_i32 dim 1 : vector<8x512xf32>, i32 -> vector<8x512xf32>
    %106 = vector.broadcast %32 : vector<1x512xf32> to vector<8x512xf32>
    %107 = arith.mulf %105, %106 : vector<8x512xf32>
    %c88 = arith.constant 88 : index
    %c0_21 = arith.constant 0 : index
    %108 = vector.load %arg8[%c88, %c0_21] : memref<216x512xf32, #tpu.memory_space<vmem>>, vector<8x512xf32>
    tpu.vector_store %arg8[%c88, %c0_21], %107 {strides = array<i32>} : memref<216x512xf32, #tpu.memory_space<vmem>>, vector<8x512xf32>,
    %c1_i32 = arith.constant 1 : i32
    %109 = tpu.dynamic_rotate %1 by %c1_i32 dim 1 : vector<8x512xf32>, i32 -> vector<8x512xf32>
    %110 = vector.broadcast %34 : vector<1x512xf32> to vector<8x512xf32>
    %111 = arith.mulf %109, %110 : vector<8x512xf32>
    %c96 = arith.constant 96 : index
    %c0_22 = arith.constant 0 : index
    %112 = vector.load %arg8[%c96, %c0_22] : memref<216x512xf32, #tpu.memory_space<vmem>>, vector<8x512xf32>
    tpu.vector_store %arg8[%c96, %c0_22], %111 {strides = array<i32>} : memref<216x512xf32, #tpu.memory_space<vmem>>, vector<8x512xf32>,
    %c104 = arith.constant 104 : index
    %c0_23 = arith.constant 0 : index
    %113 = vector.load %arg8[%c104, %c0_23] : memref<216x512xf32, #tpu.memory_space<vmem>>, vector<8x512xf32>
    tpu.vector_store %arg8[%c104, %c0_23], %1 {strides = array<i32>} : memref<216x512xf32, #tpu.memory_space<vmem>>, vector<8x512xf32>,
    %c511_i32 = arith.constant 511 : i32
    %114 = tpu.dynamic_rotate %1 by %c511_i32 dim 1 : vector<8x512xf32>, i32 -> vector<8x512xf32>
    %115 = vector.broadcast %36 : vector<1x512xf32> to vector<8x512xf32>
    %116 = arith.mulf %114, %115 : vector<8x512xf32>
    %c112 = arith.constant 112 : index
    %c0_24 = arith.constant 0 : index
    %117 = vector.load %arg8[%c112, %c0_24] : memref<216x512xf32, #tpu.memory_space<vmem>>, vector<8x512xf32>
    tpu.vector_store %arg8[%c112, %c0_24], %116 {strides = array<i32>} : memref<216x512xf32, #tpu.memory_space<vmem>>, vector<8x512xf32>,
    %c505_i32 = arith.constant 505 : i32
    %118 = tpu.dynamic_rotate %1 by %c505_i32 dim 1 : vector<8x512xf32>, i32 -> vector<8x512xf32>
    %119 = vector.broadcast %38 : vector<1x512xf32> to vector<8x512xf32>
    %120 = arith.mulf %118, %119 : vector<8x512xf32>
    %c120 = arith.constant 120 : index
    %c0_25 = arith.constant 0 : index
    %121 = vector.load %arg8[%c120, %c0_25] : memref<216x512xf32, #tpu.memory_space<vmem>>, vector<8x512xf32>
    tpu.vector_store %arg8[%c120, %c0_25], %120 {strides = array<i32>} : memref<216x512xf32, #tpu.memory_space<vmem>>, vector<8x512xf32>,
    %c504_i32 = arith.constant 504 : i32
    %122 = tpu.dynamic_rotate %1 by %c504_i32 dim 1 : vector<8x512xf32>, i32 -> vector<8x512xf32>
    %123 = vector.broadcast %40 : vector<1x512xf32> to vector<8x512xf32>
    %124 = arith.mulf %122, %123 : vector<8x512xf32>
    %c128 = arith.constant 128 : index
    %c0_26 = arith.constant 0 : index
    %125 = vector.load %arg8[%c128, %c0_26] : memref<216x512xf32, #tpu.memory_space<vmem>>, vector<8x512xf32>
    tpu.vector_store %arg8[%c128, %c0_26], %124 {strides = array<i32>} : memref<216x512xf32, #tpu.memory_space<vmem>>, vector<8x512xf32>,
    %c503_i32 = arith.constant 503 : i32
    %126 = tpu.dynamic_rotate %1 by %c503_i32 dim 1 : vector<8x512xf32>, i32 -> vector<8x512xf32>
    %127 = vector.broadcast %42 : vector<1x512xf32> to vector<8x512xf32>
    %128 = arith.mulf %126, %127 : vector<8x512xf32>
    %c136 = arith.constant 136 : index
    %c0_27 = arith.constant 0 : index
    %129 = vector.load %arg8[%c136, %c0_27] : memref<216x512xf32, #tpu.memory_space<vmem>>, vector<8x512xf32>
    tpu.vector_store %arg8[%c136, %c0_27], %128 {strides = array<i32>} : memref<216x512xf32, #tpu.memory_space<vmem>>, vector<8x512xf32>,
    %c457_i32 = arith.constant 457 : i32
    %130 = tpu.dynamic_rotate %1 by %c457_i32 dim 1 : vector<8x512xf32>, i32 -> vector<8x512xf32>
    %131 = vector.broadcast %44 : vector<1x512xf32> to vector<8x512xf32>
    %132 = arith.mulf %130, %131 : vector<8x512xf32>
    %c144 = arith.constant 144 : index
    %c0_28 = arith.constant 0 : index
    %133 = vector.load %arg8[%c144, %c0_28] : memref<216x512xf32, #tpu.memory_space<vmem>>, vector<8x512xf32>
    tpu.vector_store %arg8[%c144, %c0_28], %132 {strides = array<i32>} : memref<216x512xf32, #tpu.memory_space<vmem>>, vector<8x512xf32>,
    %c456_i32 = arith.constant 456 : i32
    %134 = tpu.dynamic_rotate %1 by %c456_i32 dim 1 : vector<8x512xf32>, i32 -> vector<8x512xf32>
    %135 = vector.broadcast %46 : vector<1x512xf32> to vector<8x512xf32>
    %136 = arith.mulf %134, %135 : vector<8x512xf32>
    %c152 = arith.constant 152 : index
    %c0_29 = arith.constant 0 : index
    %137 = vector.load %arg8[%c152, %c0_29] : memref<216x512xf32, #tpu.memory_space<vmem>>, vector<8x512xf32>
    tpu.vector_store %arg8[%c152, %c0_29], %136 {strides = array<i32>} : memref<216x512xf32, #tpu.memory_space<vmem>>, vector<8x512xf32>,
    %c455_i32 = arith.constant 455 : i32
    %138 = tpu.dynamic_rotate %1 by %c455_i32 dim 1 : vector<8x512xf32>, i32 -> vector<8x512xf32>
    %139 = vector.broadcast %48 : vector<1x512xf32> to vector<8x512xf32>
    %140 = arith.mulf %138, %139 : vector<8x512xf32>
    %c160 = arith.constant 160 : index
    %c0_30 = arith.constant 0 : index
    %141 = vector.load %arg8[%c160, %c0_30] : memref<216x512xf32, #tpu.memory_space<vmem>>, vector<8x512xf32>
    tpu.vector_store %arg8[%c160, %c0_30], %140 {strides = array<i32>} : memref<216x512xf32, #tpu.memory_space<vmem>>, vector<8x512xf32>,
    %c449_i32 = arith.constant 449 : i32
    %142 = tpu.dynamic_rotate %1 by %c449_i32 dim 1 : vector<8x512xf32>, i32 -> vector<8x512xf32>
    %143 = vector.broadcast %50 : vector<1x512xf32> to vector<8x512xf32>
    %144 = arith.mulf %142, %143 : vector<8x512xf32>
    %c168 = arith.constant 168 : index
    %c0_31 = arith.constant 0 : index
    %145 = vector.load %arg8[%c168, %c0_31] : memref<216x512xf32, #tpu.memory_space<vmem>>, vector<8x512xf32>
    tpu.vector_store %arg8[%c168, %c0_31], %144 {strides = array<i32>} : memref<216x512xf32, #tpu.memory_space<vmem>>, vector<8x512xf32>,
    %c448_i32 = arith.constant 448 : i32
    %146 = tpu.dynamic_rotate %1 by %c448_i32 dim 1 : vector<8x512xf32>, i32 -> vector<8x512xf32>
    %147 = vector.broadcast %52 : vector<1x512xf32> to vector<8x512xf32>
    %148 = arith.mulf %146, %147 : vector<8x512xf32>
    %c176 = arith.constant 176 : index
    %c0_32 = arith.constant 0 : index
    %149 = vector.load %arg8[%c176, %c0_32] : memref<216x512xf32, #tpu.memory_space<vmem>>, vector<8x512xf32>
    tpu.vector_store %arg8[%c176, %c0_32], %148 {strides = array<i32>} : memref<216x512xf32, #tpu.memory_space<vmem>>, vector<8x512xf32>,
    %c447_i32 = arith.constant 447 : i32
    %150 = tpu.dynamic_rotate %1 by %c447_i32 dim 1 : vector<8x512xf32>, i32 -> vector<8x512xf32>
    %151 = vector.broadcast %54 : vector<1x512xf32> to vector<8x512xf32>
    %152 = arith.mulf %150, %151 : vector<8x512xf32>
    %c184 = arith.constant 184 : index
    %c0_33 = arith.constant 0 : index
    %153 = vector.load %arg8[%c184, %c0_33] : memref<216x512xf32, #tpu.memory_space<vmem>>, vector<8x512xf32>
    tpu.vector_store %arg8[%c184, %c0_33], %152 {strides = array<i32>} : memref<216x512xf32, #tpu.memory_space<vmem>>, vector<8x512xf32>,
    %c441_i32 = arith.constant 441 : i32
    %154 = tpu.dynamic_rotate %1 by %c441_i32 dim 1 : vector<8x512xf32>, i32 -> vector<8x512xf32>
    %155 = vector.broadcast %56 : vector<1x512xf32> to vector<8x512xf32>
    %156 = arith.mulf %154, %155 : vector<8x512xf32>
    %c192 = arith.constant 192 : index
    %c0_34 = arith.constant 0 : index
    %157 = vector.load %arg8[%c192, %c0_34] : memref<216x512xf32, #tpu.memory_space<vmem>>, vector<8x512xf32>
    tpu.vector_store %arg8[%c192, %c0_34], %156 {strides = array<i32>} : memref<216x512xf32, #tpu.memory_space<vmem>>, vector<8x512xf32>,
    %c440_i32 = arith.constant 440 : i32
    %158 = tpu.dynamic_rotate %1 by %c440_i32 dim 1 : vector<8x512xf32>, i32 -> vector<8x512xf32>
    %159 = vector.broadcast %58 : vector<1x512xf32> to vector<8x512xf32>
    %160 = arith.mulf %158, %159 : vector<8x512xf32>
    %c200 = arith.constant 200 : index
    %c0_35 = arith.constant 0 : index
    %161 = vector.load %arg8[%c200, %c0_35] : memref<216x512xf32, #tpu.memory_space<vmem>>, vector<8x512xf32>
    tpu.vector_store %arg8[%c200, %c0_35], %160 {strides = array<i32>} : memref<216x512xf32, #tpu.memory_space<vmem>>, vector<8x512xf32>,
    %c439_i32 = arith.constant 439 : i32
    %162 = tpu.dynamic_rotate %1 by %c439_i32 dim 1 : vector<8x512xf32>, i32 -> vector<8x512xf32>
    %163 = vector.broadcast %60 : vector<1x512xf32> to vector<8x512xf32>
    %164 = arith.mulf %162, %163 : vector<8x512xf32>
    %c208 = arith.constant 208 : index
    %c0_36 = arith.constant 0 : index
    %165 = vector.load %arg8[%c208, %c0_36] : memref<216x512xf32, #tpu.memory_space<vmem>>, vector<8x512xf32>
    tpu.vector_store %arg8[%c208, %c0_36], %164 {strides = array<i32>} : memref<216x512xf32, #tpu.memory_space<vmem>>, vector<8x512xf32>,
    %c0_37 = arith.constant 0 : index
    %c0_38 = arith.constant 0 : index
    %166 = vector.load %arg3[%c0_37, %c0_38] : memref<4x216xf32, #tpu.memory_space<vmem>>, vector<4x216xf32>
    %c0_39 = arith.constant 0 : index
    %c0_40 = arith.constant 0 : index
    %167 = vector.load %arg8[%c0_39, %c0_40] : memref<216x512xf32, #tpu.memory_space<vmem>>, vector<216x512xf32>
    %cst_41 = arith.constant dense<0.000000e+00> : vector<4x512xf32>
    %168 = tpu.matmul %166, %167, %cst_41 {dimension_numbers = #tpu.dot_dimension_numbers<[1], [0], [0], [1], [0, 0, 1, 1], [], []>} : vector<4x216xf32>, vector<216x512xf32>, vector<4x512xf32> -> vector<4x512xf32>
    %c0_42 = arith.constant 0 : index
    %c0_43 = arith.constant 0 : index
    %169 = vector.load %arg6[%c0_42, %c0_43] : memref<4x8xf32, #tpu.memory_space<vmem>>, vector<4x1xf32>
    %170 = vector.broadcast %169 : vector<4x1xf32> to vector<4x512xf32>
    %171 = arith.addf %168, %170 : vector<4x512xf32>
    %c0_44 = arith.constant 0 : index
    %c1_45 = arith.constant 1 : index
    %172 = vector.load %arg6[%c0_44, %c1_45] : memref<4x8xf32, #tpu.memory_space<vmem>>, vector<4x1xf32>
    %c0_46 = arith.constant 0 : index
    %c2_47 = arith.constant 2 : index
    %173 = vector.load %arg6[%c0_46, %c2_47] : memref<4x8xf32, #tpu.memory_space<vmem>>, vector<4x1xf32>
    %174 = vector.shape_cast %171 : vector<4x512xf32> to vector<1x4x512xf32>
    %cst_48 = arith.constant dense<0.000000e+00> : vector<1xf32>
    %175 = vector.multi_reduction <add>, %174, %cst_48 [1, 2] : vector<1x4x512xf32> to vector<1xf32>
    %176 = vector.shape_cast %175 : vector<1xf32> to vector<1x1x1xf32>
    %177 = vector.extract %176[0, 0, 0] : f32 from vector<1x1x1xf32>
    %178 = arith.mulf %171, %171 : vector<4x512xf32>
    %179 = vector.shape_cast %178 : vector<4x512xf32> to vector<1x4x512xf32>
    %cst_49 = arith.constant dense<0.000000e+00> : vector<1xf32>
    %180 = vector.multi_reduction <add>, %179, %cst_49 [1, 2] : vector<1x4x512xf32> to vector<1xf32>
    %181 = vector.shape_cast %180 : vector<1xf32> to vector<1x1x1xf32>
    %182 = vector.extract %181[0, 0, 0] : f32 from vector<1x1x1xf32>
    %cst_50 = arith.constant 2.048000e+03 : f32
    %183 = arith.divf %177, %cst_50 : f32
    %cst_51 = arith.constant 2.048000e+03 : f32
    %184 = arith.divf %182, %cst_51 : f32
    %185 = arith.mulf %183, %183 : f32
    %186 = arith.subf %184, %185 : f32
    %cst_52 = arith.constant 0.000000e+00 : f32
    %187 = arith.maximumf %186, %cst_52 : f32
    %cst_53 = arith.constant 9.99999974E-6 : f32
    %188 = arith.addf %187, %cst_53 : f32
    %189 = math.rsqrt %188 : f32
    %190 = vector.broadcast %183 : f32 to vector<4x512xf32>
    %191 = arith.subf %171, %190 : vector<4x512xf32>
    %192 = vector.broadcast %189 : f32 to vector<4x512xf32>
    %193 = arith.mulf %191, %192 : vector<4x512xf32>
    %194 = vector.broadcast %172 : vector<4x1xf32> to vector<4x512xf32>
    %195 = arith.mulf %193, %194 : vector<4x512xf32>
    %196 = vector.broadcast %173 : vector<4x1xf32> to vector<4x512xf32>
    %197 = arith.addf %195, %196 : vector<4x512xf32>
    %cst_54 = arith.constant 0.000000e+00 : f32
    %198 = vector.broadcast %cst_54 : f32 to vector<4x512xf32>
    %199 = arith.subf %198, %197 : vector<4x512xf32>
    %200 = math.exp %199 : vector<4x512xf32>
    %cst_55 = arith.constant 1.000000e+00 : f32
    %201 = vector.broadcast %cst_55 : f32 to vector<4x512xf32>
    %202 = arith.addf %201, %200 : vector<4x512xf32>
    %cst_56 = arith.constant 1.000000e+00 : f32
    %203 = vector.broadcast %cst_56 : f32 to vector<4x512xf32>
    %204 = arith.divf %203, %202 : vector<4x512xf32>
    %205 = arith.mulf %197, %204 : vector<4x512xf32>
    %c73_i32_57 = arith.constant 73 : i32
    %206 = tpu.dynamic_rotate %205 by %c73_i32_57 dim 1 : vector<4x512xf32>, i32 -> vector<4x512xf32>
    %207 = vector.broadcast %10 : vector<1x512xf32> to vector<4x512xf32>
    %208 = arith.mulf %206, %207 : vector<4x512xf32>
    %c0_58 = arith.constant 0 : index
    %c0_59 = arith.constant 0 : index
    %209 = vector.load %arg8[%c0_58, %c0_59] : memref<216x512xf32, #tpu.memory_space<vmem>>, vector<4x512xf32>
    tpu.vector_store %arg8[%c0_58, %c0_59], %208 {strides = array<i32>} : memref<216x512xf32, #tpu.memory_space<vmem>>, vector<4x512xf32>,
    %c72_i32_60 = arith.constant 72 : i32
    %210 = tpu.dynamic_rotate %205 by %c72_i32_60 dim 1 : vector<4x512xf32>, i32 -> vector<4x512xf32>
    %211 = vector.broadcast %12 : vector<1x512xf32> to vector<4x512xf32>
    %212 = arith.mulf %210, %211 : vector<4x512xf32>
    %c4_61 = arith.constant 4 : index
    %c0_62 = arith.constant 0 : index
    %213 = vector.load %arg8[%c4_61, %c0_62] : memref<216x512xf32, #tpu.memory_space<vmem>>, vector<4x512xf32>
    tpu.vector_store %arg8[%c4_61, %c0_62], %212 {strides = array<i32>} : memref<216x512xf32, #tpu.memory_space<vmem>>, vector<4x512xf32>,
    %c71_i32_63 = arith.constant 71 : i32
    %214 = tpu.dynamic_rotate %205 by %c71_i32_63 dim 1 : vector<4x512xf32>, i32 -> vector<4x512xf32>
    %215 = vector.broadcast %14 : vector<1x512xf32> to vector<4x512xf32>
    %216 = arith.mulf %214, %215 : vector<4x512xf32>
    %c8_64 = arith.constant 8 : index
    %c0_65 = arith.constant 0 : index
    %217 = vector.load %arg8[%c8_64, %c0_65] : memref<216x512xf32, #tpu.memory_space<vmem>>, vector<4x512xf32>
    tpu.vector_store %arg8[%c8_64, %c0_65], %216 {strides = array<i32>} : memref<216x512xf32, #tpu.memory_space<vmem>>, vector<4x512xf32>,
    %c65_i32_66 = arith.constant 65 : i32
    %218 = tpu.dynamic_rotate %205 by %c65_i32_66 dim 1 : vector<4x512xf32>, i32 -> vector<4x512xf32>
    %219 = vector.broadcast %16 : vector<1x512xf32> to vector<4x512xf32>
    %220 = arith.mulf %218, %219 : vector<4x512xf32>
    %c12 = arith.constant 12 : index
    %c0_67 = arith.constant 0 : index
    %221 = vector.load %arg8[%c12, %c0_67] : memref<216x512xf32, #tpu.memory_space<vmem>>, vector<4x512xf32>
    tpu.vector_store %arg8[%c12, %c0_67], %220 {strides = array<i32>} : memref<216x512xf32, #tpu.memory_space<vmem>>, vector<4x512xf32>,
    %c64_i32_68 = arith.constant 64 : i32
    %222 = tpu.dynamic_rotate %205 by %c64_i32_68 dim 1 : vector<4x512xf32>, i32 -> vector<4x512xf32>
    %223 = vector.broadcast %18 : vector<1x512xf32> to vector<4x512xf32>
    %224 = arith.mulf %222, %223 : vector<4x512xf32>
    %c16_69 = arith.constant 16 : index
    %c0_70 = arith.constant 0 : index
    %225 = vector.load %arg8[%c16_69, %c0_70] : memref<216x512xf32, #tpu.memory_space<vmem>>, vector<4x512xf32>
    tpu.vector_store %arg8[%c16_69, %c0_70], %224 {strides = array<i32>} : memref<216x512xf32, #tpu.memory_space<vmem>>, vector<4x512xf32>,
    %c63_i32_71 = arith.constant 63 : i32
    %226 = tpu.dynamic_rotate %205 by %c63_i32_71 dim 1 : vector<4x512xf32>, i32 -> vector<4x512xf32>
    %227 = vector.broadcast %20 : vector<1x512xf32> to vector<4x512xf32>
    %228 = arith.mulf %226, %227 : vector<4x512xf32>
    %c20 = arith.constant 20 : index
    %c0_72 = arith.constant 0 : index
    %229 = vector.load %arg8[%c20, %c0_72] : memref<216x512xf32, #tpu.memory_space<vmem>>, vector<4x512xf32>
    tpu.vector_store %arg8[%c20, %c0_72], %228 {strides = array<i32>} : memref<216x512xf32, #tpu.memory_space<vmem>>, vector<4x512xf32>,
    %c57_i32_73 = arith.constant 57 : i32
    %230 = tpu.dynamic_rotate %205 by %c57_i32_73 dim 1 : vector<4x512xf32>, i32 -> vector<4x512xf32>
    %231 = vector.broadcast %22 : vector<1x512xf32> to vector<4x512xf32>
    %232 = arith.mulf %230, %231 : vector<4x512xf32>
    %c24_74 = arith.constant 24 : index
    %c0_75 = arith.constant 0 : index
    %233 = vector.load %arg8[%c24_74, %c0_75] : memref<216x512xf32, #tpu.memory_space<vmem>>, vector<4x512xf32>
    tpu.vector_store %arg8[%c24_74, %c0_75], %232 {strides = array<i32>} : memref<216x512xf32, #tpu.memory_space<vmem>>, vector<4x512xf32>,
    %c56_i32_76 = arith.constant 56 : i32
    %234 = tpu.dynamic_rotate %205 by %c56_i32_76 dim 1 : vector<4x512xf32>, i32 -> vector<4x512xf32>
    %235 = vector.broadcast %24 : vector<1x512xf32> to vector<4x512xf32>
    %236 = arith.mulf %234, %235 : vector<4x512xf32>
    %c28 = arith.constant 28 : index
    %c0_77 = arith.constant 0 : index
    %237 = vector.load %arg8[%c28, %c0_77] : memref<216x512xf32, #tpu.memory_space<vmem>>, vector<4x512xf32>
    tpu.vector_store %arg8[%c28, %c0_77], %236 {strides = array<i32>} : memref<216x512xf32, #tpu.memory_space<vmem>>, vector<4x512xf32>,
    %c55_i32_78 = arith.constant 55 : i32
    %238 = tpu.dynamic_rotate %205 by %c55_i32_78 dim 1 : vector<4x512xf32>, i32 -> vector<4x512xf32>
    %239 = vector.broadcast %26 : vector<1x512xf32> to vector<4x512xf32>
    %240 = arith.mulf %238, %239 : vector<4x512xf32>
    %c32_79 = arith.constant 32 : index
    %c0_80 = arith.constant 0 : index
    %241 = vector.load %arg8[%c32_79, %c0_80] : memref<216x512xf32, #tpu.memory_space<vmem>>, vector<4x512xf32>
    tpu.vector_store %arg8[%c32_79, %c0_80], %240 {strides = array<i32>} : memref<216x512xf32, #tpu.memory_space<vmem>>, vector<4x512xf32>,
    %c9_i32_81 = arith.constant 9 : i32
    %242 = tpu.dynamic_rotate %205 by %c9_i32_81 dim 1 : vector<4x512xf32>, i32 -> vector<4x512xf32>
    %243 = vector.broadcast %28 : vector<1x512xf32> to vector<4x512xf32>
    %244 = arith.mulf %242, %243 : vector<4x512xf32>
    %c36 = arith.constant 36 : index
    %c0_82 = arith.constant 0 : index
    %245 = vector.load %arg8[%c36, %c0_82] : memref<216x512xf32, #tpu.memory_space<vmem>>, vector<4x512xf32>
    tpu.vector_store %arg8[%c36, %c0_82], %244 {strides = array<i32>} : memref<216x512xf32, #tpu.memory_space<vmem>>, vector<4x512xf32>,
    %c8_i32_83 = arith.constant 8 : i32
    %246 = tpu.dynamic_rotate %205 by %c8_i32_83 dim 1 : vector<4x512xf32>, i32 -> vector<4x512xf32>
    %247 = vector.broadcast %30 : vector<1x512xf32> to vector<4x512xf32>
    %248 = arith.mulf %246, %247 : vector<4x512xf32>
    %c40_84 = arith.constant 40 : index
    %c0_85 = arith.constant 0 : index
    %249 = vector.load %arg8[%c40_84, %c0_85] : memref<216x512xf32, #tpu.memory_space<vmem>>, vector<4x512xf32>
    tpu.vector_store %arg8[%c40_84, %c0_85], %248 {strides = array<i32>} : memref<216x512xf32, #tpu.memory_space<vmem>>, vector<4x512xf32>,
    %c7_i32_86 = arith.constant 7 : i32
    %250 = tpu.dynamic_rotate %205 by %c7_i32_86 dim 1 : vector<4x512xf32>, i32 -> vector<4x512xf32>
    %251 = vector.broadcast %32 : vector<1x512xf32> to vector<4x512xf32>
    %252 = arith.mulf %250, %251 : vector<4x512xf32>
    %c44 = arith.constant 44 : index
    %c0_87 = arith.constant 0 : index
    %253 = vector.load %arg8[%c44, %c0_87] : memref<216x512xf32, #tpu.memory_space<vmem>>, vector<4x512xf32>
    tpu.vector_store %arg8[%c44, %c0_87], %252 {strides = array<i32>} : memref<216x512xf32, #tpu.memory_space<vmem>>, vector<4x512xf32>,
    %c1_i32_88 = arith.constant 1 : i32
    %254 = tpu.dynamic_rotate %205 by %c1_i32_88 dim 1 : vector<4x512xf32>, i32 -> vector<4x512xf32>
    %255 = vector.broadcast %34 : vector<1x512xf32> to vector<4x512xf32>
    %256 = arith.mulf %254, %255 : vector<4x512xf32>
    %c48_89 = arith.constant 48 : index
    %c0_90 = arith.constant 0 : index
    %257 = vector.load %arg8[%c48_89, %c0_90] : memref<216x512xf32, #tpu.memory_space<vmem>>, vector<4x512xf32>
    tpu.vector_store %arg8[%c48_89, %c0_90], %256 {strides = array<i32>} : memref<216x512xf32, #tpu.memory_space<vmem>>, vector<4x512xf32>,
    %c52 = arith.constant 52 : index
    %c0_91 = arith.constant 0 : index
    %258 = vector.load %arg8[%c52, %c0_91] : memref<216x512xf32, #tpu.memory_space<vmem>>, vector<4x512xf32>
    tpu.vector_store %arg8[%c52, %c0_91], %205 {strides = array<i32>} : memref<216x512xf32, #tpu.memory_space<vmem>>, vector<4x512xf32>,
    %c511_i32_92 = arith.constant 511 : i32
    %259 = tpu.dynamic_rotate %205 by %c511_i32_92 dim 1 : vector<4x512xf32>, i32 -> vector<4x512xf32>
    %260 = vector.broadcast %36 : vector<1x512xf32> to vector<4x512xf32>
    %261 = arith.mulf %259, %260 : vector<4x512xf32>
    %c56_93 = arith.constant 56 : index
    %c0_94 = arith.constant 0 : index
    %262 = vector.load %arg8[%c56_93, %c0_94] : memref<216x512xf32, #tpu.memory_space<vmem>>, vector<4x512xf32>
    tpu.vector_store %arg8[%c56_93, %c0_94], %261 {strides = array<i32>} : memref<216x512xf32, #tpu.memory_space<vmem>>, vector<4x512xf32>,
    %c505_i32_95 = arith.constant 505 : i32
    %263 = tpu.dynamic_rotate %205 by %c505_i32_95 dim 1 : vector<4x512xf32>, i32 -> vector<4x512xf32>
    %264 = vector.broadcast %38 : vector<1x512xf32> to vector<4x512xf32>
    %265 = arith.mulf %263, %264 : vector<4x512xf32>
    %c60 = arith.constant 60 : index
    %c0_96 = arith.constant 0 : index
    %266 = vector.load %arg8[%c60, %c0_96] : memref<216x512xf32, #tpu.memory_space<vmem>>, vector<4x512xf32>
    tpu.vector_store %arg8[%c60, %c0_96], %265 {strides = array<i32>} : memref<216x512xf32, #tpu.memory_space<vmem>>, vector<4x512xf32>,
    %c504_i32_97 = arith.constant 504 : i32
    %267 = tpu.dynamic_rotate %205 by %c504_i32_97 dim 1 : vector<4x512xf32>, i32 -> vector<4x512xf32>
    %268 = vector.broadcast %40 : vector<1x512xf32> to vector<4x512xf32>
    %269 = arith.mulf %267, %268 : vector<4x512xf32>
    %c64_98 = arith.constant 64 : index
    %c0_99 = arith.constant 0 : index
    %270 = vector.load %arg8[%c64_98, %c0_99] : memref<216x512xf32, #tpu.memory_space<vmem>>, vector<4x512xf32>
    tpu.vector_store %arg8[%c64_98, %c0_99], %269 {strides = array<i32>} : memref<216x512xf32, #tpu.memory_space<vmem>>, vector<4x512xf32>,
    %c503_i32_100 = arith.constant 503 : i32
    %271 = tpu.dynamic_rotate %205 by %c503_i32_100 dim 1 : vector<4x512xf32>, i32 -> vector<4x512xf32>
    %272 = vector.broadcast %42 : vector<1x512xf32> to vector<4x512xf32>
    %273 = arith.mulf %271, %272 : vector<4x512xf32>
    %c68 = arith.constant 68 : index
    %c0_101 = arith.constant 0 : index
    %274 = vector.load %arg8[%c68, %c0_101] : memref<216x512xf32, #tpu.memory_space<vmem>>, vector<4x512xf32>
    tpu.vector_store %arg8[%c68, %c0_101], %273 {strides = array<i32>} : memref<216x512xf32, #tpu.memory_space<vmem>>, vector<4x512xf32>,
    %c457_i32_102 = arith.constant 457 : i32
    %275 = tpu.dynamic_rotate %205 by %c457_i32_102 dim 1 : vector<4x512xf32>, i32 -> vector<4x512xf32>
    %276 = vector.broadcast %44 : vector<1x512xf32> to vector<4x512xf32>
    %277 = arith.mulf %275, %276 : vector<4x512xf32>
    %c72_103 = arith.constant 72 : index
    %c0_104 = arith.constant 0 : index
    %278 = vector.load %arg8[%c72_103, %c0_104] : memref<216x512xf32, #tpu.memory_space<vmem>>, vector<4x512xf32>
    tpu.vector_store %arg8[%c72_103, %c0_104], %277 {strides = array<i32>} : memref<216x512xf32, #tpu.memory_space<vmem>>, vector<4x512xf32>,
    %c456_i32_105 = arith.constant 456 : i32
    %279 = tpu.dynamic_rotate %205 by %c456_i32_105 dim 1 : vector<4x512xf32>, i32 -> vector<4x512xf32>
    %280 = vector.broadcast %46 : vector<1x512xf32> to vector<4x512xf32>
    %281 = arith.mulf %279, %280 : vector<4x512xf32>
    %c76 = arith.constant 76 : index
    %c0_106 = arith.constant 0 : index
    %282 = vector.load %arg8[%c76, %c0_106] : memref<216x512xf32, #tpu.memory_space<vmem>>, vector<4x512xf32>
    tpu.vector_store %arg8[%c76, %c0_106], %281 {strides = array<i32>} : memref<216x512xf32, #tpu.memory_space<vmem>>, vector<4x512xf32>,
    %c455_i32_107 = arith.constant 455 : i32
    %283 = tpu.dynamic_rotate %205 by %c455_i32_107 dim 1 : vector<4x512xf32>, i32 -> vector<4x512xf32>
    %284 = vector.broadcast %48 : vector<1x512xf32> to vector<4x512xf32>
    %285 = arith.mulf %283, %284 : vector<4x512xf32>
    %c80_108 = arith.constant 80 : index
    %c0_109 = arith.constant 0 : index
    %286 = vector.load %arg8[%c80_108, %c0_109] : memref<216x512xf32, #tpu.memory_space<vmem>>, vector<4x512xf32>
    tpu.vector_store %arg8[%c80_108, %c0_109], %285 {strides = array<i32>} : memref<216x512xf32, #tpu.memory_space<vmem>>, vector<4x512xf32>,
    %c449_i32_110 = arith.constant 449 : i32
    %287 = tpu.dynamic_rotate %205 by %c449_i32_110 dim 1 : vector<4x512xf32>, i32 -> vector<4x512xf32>
    %288 = vector.broadcast %50 : vector<1x512xf32> to vector<4x512xf32>
    %289 = arith.mulf %287, %288 : vector<4x512xf32>
    %c84 = arith.constant 84 : index
    %c0_111 = arith.constant 0 : index
    %290 = vector.load %arg8[%c84, %c0_111] : memref<216x512xf32, #tpu.memory_space<vmem>>, vector<4x512xf32>
    tpu.vector_store %arg8[%c84, %c0_111], %289 {strides = array<i32>} : memref<216x512xf32, #tpu.memory_space<vmem>>, vector<4x512xf32>,
    %c448_i32_112 = arith.constant 448 : i32
    %291 = tpu.dynamic_rotate %205 by %c448_i32_112 dim 1 : vector<4x512xf32>, i32 -> vector<4x512xf32>
    %292 = vector.broadcast %52 : vector<1x512xf32> to vector<4x512xf32>
    %293 = arith.mulf %291, %292 : vector<4x512xf32>
    %c88_113 = arith.constant 88 : index
    %c0_114 = arith.constant 0 : index
    %294 = vector.load %arg8[%c88_113, %c0_114] : memref<216x512xf32, #tpu.memory_space<vmem>>, vector<4x512xf32>
    tpu.vector_store %arg8[%c88_113, %c0_114], %293 {strides = array<i32>} : memref<216x512xf32, #tpu.memory_space<vmem>>, vector<4x512xf32>,
    %c447_i32_115 = arith.constant 447 : i32
    %295 = tpu.dynamic_rotate %205 by %c447_i32_115 dim 1 : vector<4x512xf32>, i32 -> vector<4x512xf32>
    %296 = vector.broadcast %54 : vector<1x512xf32> to vector<4x512xf32>
    %297 = arith.mulf %295, %296 : vector<4x512xf32>
    %c92 = arith.constant 92 : index
    %c0_116 = arith.constant 0 : index
    %298 = vector.load %arg8[%c92, %c0_116] : memref<216x512xf32, #tpu.memory_space<vmem>>, vector<4x512xf32>
    tpu.vector_store %arg8[%c92, %c0_116], %297 {strides = array<i32>} : memref<216x512xf32, #tpu.memory_space<vmem>>, vector<4x512xf32>,
    %c441_i32_117 = arith.constant 441 : i32
    %299 = tpu.dynamic_rotate %205 by %c441_i32_117 dim 1 : vector<4x512xf32>, i32 -> vector<4x512xf32>
    %300 = vector.broadcast %56 : vector<1x512xf32> to vector<4x512xf32>
    %301 = arith.mulf %299, %300 : vector<4x512xf32>
    %c96_118 = arith.constant 96 : index
    %c0_119 = arith.constant 0 : index
    %302 = vector.load %arg8[%c96_118, %c0_119] : memref<216x512xf32, #tpu.memory_space<vmem>>, vector<4x512xf32>
    tpu.vector_store %arg8[%c96_118, %c0_119], %301 {strides = array<i32>} : memref<216x512xf32, #tpu.memory_space<vmem>>, vector<4x512xf32>,
    %c440_i32_120 = arith.constant 440 : i32
    %303 = tpu.dynamic_rotate %205 by %c440_i32_120 dim 1 : vector<4x512xf32>, i32 -> vector<4x512xf32>
    %304 = vector.broadcast %58 : vector<1x512xf32> to vector<4x512xf32>
    %305 = arith.mulf %303, %304 : vector<4x512xf32>
    %c100 = arith.constant 100 : index
    %c0_121 = arith.constant 0 : index
    %306 = vector.load %arg8[%c100, %c0_121] : memref<216x512xf32, #tpu.memory_space<vmem>>, vector<4x512xf32>
    tpu.vector_store %arg8[%c100, %c0_121], %305 {strides = array<i32>} : memref<216x512xf32, #tpu.memory_space<vmem>>, vector<4x512xf32>,
    %c439_i32_122 = arith.constant 439 : i32
    %307 = tpu.dynamic_rotate %205 by %c439_i32_122 dim 1 : vector<4x512xf32>, i32 -> vector<4x512xf32>
    %308 = vector.broadcast %60 : vector<1x512xf32> to vector<4x512xf32>
    %309 = arith.mulf %307, %308 : vector<4x512xf32>
    %c104_123 = arith.constant 104 : index
    %c0_124 = arith.constant 0 : index
    %310 = vector.load %arg8[%c104_123, %c0_124] : memref<216x512xf32, #tpu.memory_space<vmem>>, vector<4x512xf32>
    tpu.vector_store %arg8[%c104_123, %c0_124], %309 {strides = array<i32>} : memref<216x512xf32, #tpu.memory_space<vmem>>, vector<4x512xf32>,
    %c0_125 = arith.constant 0 : index
    %c0_126 = arith.constant 0 : index
    %311 = vector.load %arg4[%c0_125, %c0_126] : memref<4x108xf32, #tpu.memory_space<vmem>>, vector<4x108xf32>
    %c0_127 = arith.constant 0 : index
    %c0_128 = arith.constant 0 : index
    %312 = vector.load %arg8[%c0_127, %c0_128] : memref<216x512xf32, #tpu.memory_space<vmem>>, vector<108x512xf32>
    %cst_129 = arith.constant dense<0.000000e+00> : vector<4x512xf32>
    %313 = tpu.matmul %311, %312, %cst_129 {dimension_numbers = #tpu.dot_dimension_numbers<[1], [0], [0], [1], [0, 0, 1, 1], [], []>} : vector<4x108xf32>, vector<108x512xf32>, vector<4x512xf32> -> vector<4x512xf32>
    %c0_130 = arith.constant 0 : index
    %c3_131 = arith.constant 3 : index
    %314 = vector.load %arg6[%c0_130, %c3_131] : memref<4x8xf32, #tpu.memory_space<vmem>>, vector<4x1xf32>
    %315 = vector.broadcast %314 : vector<4x1xf32> to vector<4x512xf32>
    %316 = arith.addf %313, %315 : vector<4x512xf32>
    %c0_132 = arith.constant 0 : index
    %c4_133 = arith.constant 4 : index
    %317 = vector.load %arg6[%c0_132, %c4_133] : memref<4x8xf32, #tpu.memory_space<vmem>>, vector<4x1xf32>
    %c0_134 = arith.constant 0 : index
    %c5_135 = arith.constant 5 : index
    %318 = vector.load %arg6[%c0_134, %c5_135] : memref<4x8xf32, #tpu.memory_space<vmem>>, vector<4x1xf32>
    %319 = vector.shape_cast %316 : vector<4x512xf32> to vector<1x4x512xf32>
    %cst_136 = arith.constant dense<0.000000e+00> : vector<1xf32>
    %320 = vector.multi_reduction <add>, %319, %cst_136 [1, 2] : vector<1x4x512xf32> to vector<1xf32>
    %321 = vector.shape_cast %320 : vector<1xf32> to vector<1x1x1xf32>
    %322 = vector.extract %321[0, 0, 0] : f32 from vector<1x1x1xf32>
    %323 = arith.mulf %316, %316 : vector<4x512xf32>
    %324 = vector.shape_cast %323 : vector<4x512xf32> to vector<1x4x512xf32>
    %cst_137 = arith.constant dense<0.000000e+00> : vector<1xf32>
    %325 = vector.multi_reduction <add>, %324, %cst_137 [1, 2] : vector<1x4x512xf32> to vector<1xf32>
    %326 = vector.shape_cast %325 : vector<1xf32> to vector<1x1x1xf32>
    %327 = vector.extract %326[0, 0, 0] : f32 from vector<1x1x1xf32>
    %cst_138 = arith.constant 2.048000e+03 : f32
    %328 = arith.divf %322, %cst_138 : f32
    %cst_139 = arith.constant 2.048000e+03 : f32
    %329 = arith.divf %327, %cst_139 : f32
    %330 = arith.mulf %328, %328 : f32
    %331 = arith.subf %329, %330 : f32
    %cst_140 = arith.constant 0.000000e+00 : f32
    %332 = arith.maximumf %331, %cst_140 : f32
    %cst_141 = arith.constant 9.99999974E-6 : f32
    %333 = arith.addf %332, %cst_141 : f32
    %334 = math.rsqrt %333 : f32
    %335 = vector.broadcast %328 : f32 to vector<4x512xf32>
    %336 = arith.subf %316, %335 : vector<4x512xf32>
    %337 = vector.broadcast %334 : f32 to vector<4x512xf32>
    %338 = arith.mulf %336, %337 : vector<4x512xf32>
    %339 = vector.broadcast %317 : vector<4x1xf32> to vector<4x512xf32>
    %340 = arith.mulf %338, %339 : vector<4x512xf32>
    %341 = vector.broadcast %318 : vector<4x1xf32> to vector<4x512xf32>
    %342 = arith.addf %340, %341 : vector<4x512xf32>
    %cst_142 = arith.constant 0.000000e+00 : f32
    %343 = vector.broadcast %cst_142 : f32 to vector<4x512xf32>
    %344 = arith.subf %343, %342 : vector<4x512xf32>
    %345 = math.exp %344 : vector<4x512xf32>
    %cst_143 = arith.constant 1.000000e+00 : f32
    %346 = vector.broadcast %cst_143 : f32 to vector<4x512xf32>
    %347 = arith.addf %346, %345 : vector<4x512xf32>
    %cst_144 = arith.constant 1.000000e+00 : f32
    %348 = vector.broadcast %cst_144 : f32 to vector<4x512xf32>
    %349 = arith.divf %348, %347 : vector<4x512xf32>
    %350 = arith.mulf %342, %349 : vector<4x512xf32>
    %c0_145 = arith.constant 0 : index
    %c0_146 = arith.constant 0 : index
    %351 = vector.load %arg5[%c0_145, %c0_146] : memref<4x8xf32, #tpu.memory_space<vmem>>, vector<4x8xf32>
    %cst_147 = arith.constant dense<0.000000e+00> : vector<4x512xf32>
    %352 = tpu.matmul %351, %1, %cst_147 {dimension_numbers = #tpu.dot_dimension_numbers<[1], [0], [0], [1], [0, 0, 1, 1], [], []>} : vector<4x8xf32>, vector<8x512xf32>, vector<4x512xf32> -> vector<4x512xf32>
    %353 = arith.addf %350, %352 : vector<4x512xf32>
    %c0_148 = arith.constant 0 : index
    %c6 = arith.constant 6 : index
    %354 = vector.load %arg6[%c0_148, %c6] : memref<4x8xf32, #tpu.memory_space<vmem>>, vector<4x1xf32>
    %355 = vector.broadcast %354 : vector<4x1xf32> to vector<4x512xf32>
    %356 = arith.addf %353, %355 : vector<4x512xf32>
    %c0_149 = arith.constant 0 : index
    %c0_150 = arith.constant 0 : index
    %c0_151 = arith.constant 0 : index
    %357 = vector.load %arg7[%c0_149, %c0_150, %c0_151] : memref<1x4x512xf32, #tpu.memory_space<vmem>>, vector<1x4x512xf32>
    %358 = vector.shape_cast %357 : vector<1x4x512xf32> to vector<4x512xf32>
    %359 = vector.shape_cast %356 : vector<4x512xf32> to vector<1x4x512xf32>
    tpu.vector_store %arg7[%c0_149, %c0_150, %c0_151], %359 {strides = array<i32>} : memref<1x4x512xf32, #tpu.memory_space<vmem>>, vector<1x4x512xf32>,
    return
  }
  func.func @transform_0(%arg0: i32) -> (i32, i32, i32) {
    %c0_i32 = arith.constant 0 : i32
    %c0_i32_0 = arith.constant 0 : i32
    %c0_i32_1 = arith.constant 0 : i32
    return %arg0, %c0_i32, %c0_i32_0 : i32, i32, i32
  }
  func.func @transform_1(%arg0: i32) -> (i32, i32) {
    %c0_i32 = arith.constant 0 : i32
    %c0_i32_0 = arith.constant 0 : i32
    %c0_i32_1 = arith.constant 0 : i32
    return %c0_i32, %c0_i32_0 : i32, i32
  }
  func.func @transform_2(%arg0: i32) -> (i32, i32) {
    %c0_i32 = arith.constant 0 : i32
    %c0_i32_0 = arith.constant 0 : i32
    %c0_i32_1 = arith.constant 0 : i32
    return %c0_i32, %c0_i32_0 : i32, i32
  }
  func.func @transform_3(%arg0: i32) -> (i32, i32) {
    %c0_i32 = arith.constant 0 : i32
    %c0_i32_0 = arith.constant 0 : i32
    %c0_i32_1 = arith.constant 0 : i32
    return %c0_i32, %c0_i32_0 : i32, i32
  }
  func.func @transform_4(%arg0: i32) -> (i32, i32) {
    %c0_i32 = arith.constant 0 : i32
    %c0_i32_0 = arith.constant 0 : i32
    %c0_i32_1 = arith.constant 0 : i32
    return %c0_i32, %c0_i32_0 : i32, i32
  }
  func.func @transform_5(%arg0: i32) -> (i32, i32) {
    %c0_i32 = arith.constant 0 : i32
    %c0_i32_0 = arith.constant 0 : i32
    %c0_i32_1 = arith.constant 0 : i32
    return %c0_i32, %c0_i32_0 : i32, i32
  }
  func.func @transform_6(%arg0: i32) -> (i32, i32, i32) {
    %c0_i32 = arith.constant 0 : i32
    %c0_i32_0 = arith.constant 0 : i32
    %c0_i32_1 = arith.constant 0 : i32
    return %arg0, %c0_i32, %c0_i32_0 : i32, i32, i32
  }
}

</mosaic_0001>

<bundles_post_ra>
// kernel: tpu_custom_call.1
= control target key start
LH: loop header
LB: loop body
LE: loop exit
PB: predicated region body
PF: predicated region fallthrough
CT: control target
= control target key end

     0   :  { %s5195_s0 = inlined_call_operand.hbm [shape: f32[2,8,512], index: 0, kind: input, shape index: {}]   ;;  %s5196_s1 = inlined_call_operand.hbm [shape: f32[8,512], index: 1, kind: input, shape index: {}]   ;;  %s5197_s2 = inlined_call_operand.hbm [shape: f32[4,216], index: 2, kind: input, shape index: {}]   ;;  %s5198_s3 = inlined_call_operand.vmem [shape: f32[4,108], index: 3, kind: input, shape index: {}]   ;;  %s5199_s4 = inlined_call_operand.hbm [shape: f32[4,8], index: 4, kind: input, shape index: {}]   ;;  %s5200_s5 = inlined_call_operand.vmem [shape: f32[4,8], index: 5, kind: input, shape index: {}]   ;;  %s5201_s6 = inlined_call_operand.hbm [shape: f32[2,4,512], index: 6, kind: output, shape index: {}]  }
   0x1   :  { %5322 = sst [smem:[#allocation106_spill]] %s5196_s1 }
   0x2   :  { %11 = vsyncpa [#allocation4], 0 }
   0x3   :  { %13 = vsyncpa [#allocation4 + $0x1], 0 }
   0x4   :  { %14 = vsyncpa [#allocation7], 0 }
   0x5   :  { %15 = vsyncpa [#allocation10], 0 }
   0x6   :  { %16 = vsyncpa [#allocation5], 0 }
   0x7   :  { %18 = vsyncpa [#allocation5 + $0x1], 0  ;;  %s3309_s21 = smov 0   ;;  %s3311_s22 = smov 0  }
   0x8   :  { %s3313_s23 = smov 0   ;;  %s3315_s24 = smov 0  }
   0x9 LB: > { %s3330_s25 = sadd.s32 4294967295, %s3241_s24   ;;  %s2869_s26 = sadd.s32 4294967294, %s3241_s24   ;;  %s3241_s24 = sphi %s3315_s24, %s5543_s24   ;;  %s3237_s23 = sphi %s3313_s23, %s5542_s23   ;;  %s3233_s22 = sphi %s3311_s22, %s5541_s22   ;;  %s3229_s21 = sphi %s3309_s21, %s5540_s21  }
   0xa   : > { %p44_p0 = scmp.ne.s32.totalorder %s3233_s22, %s3229_s21  ;;  %p5202_p1 = scmp.eq.s32.totalorder %s3330_s25, 0 }
   0xb   : > { %p179_p3 = scmp.eq.s32.totalorder %s2869_s26, 1  ;;  %p2870_p5 = scmp.ge.s32.totalorder %s3241_s24, 1 }
   0xc   : > { %p3339_p4 = por %p5202_p1, %p44_p0  ;;  %p186_p7 = scmp.lt.s32.totalorder %s3241_s24, 3 }
   0xd   : > { %p3344_p6 = por %p179_p3, %p44_p0  ;;  %s3243_s30 = smov [#allocation6]  }
   0xe   : > { %s5323_s27 = scalar_select %p3339_p4, 1, 0 }
   0xf   : > { %s5324_s28 = scalar_select %p3344_p6, 1, 0 }
  0x10   : > { %p3349_p8 = pnand %p2870_p5, %p186_p7  ;;  %s199_s7 = sshll.u32 %s3243_s30, 4  ;;  %s200_s7 = int_to_ptr.vmem [resolvable:$true] %s199_s7 }
  0x11   : > { %s3244_s8 = smov [#allocation8]   ;;  %s3245_s11 = smov [#allocation9]  }
  0x12   : > { %s5325_s29 = scalar_select %p3349_p8, 1, 0 }
  0x13   : > { %p2929_p10 = pneg %p3349_p8  ;;  %s210_s9 = sshll.u32 %s3244_s8, 4  ;;  %s211_s9 = int_to_ptr.vmem [resolvable:$true] %s210_s9 }
  0x14   : > { %s224_s12 = sshll.u32 %s3245_s11, 4  ;;  %s3074_s13 = scalar_lea.vmem %s200_s7, 512  ;;  %s3362_s12 = int_to_ptr.vmem [resolvable:$true] %s224_s12 }
  0x15   : > { %p3358_p11 = pnand %p2929_p10, %p5202_p1  ;;  %p3075_p13 = scmp.ne.s32.totalorder %s200_s7, %s3074_s13 }
  0x16   : > { %p3082_p5 = scmp.lt.s32.totalorder %s200_s7, %s200_s7  ;;  %p3083_p7 = scmp.lt.s32.totalorder %s3074_s13, %s3074_s13 }
  0x17   : > { %p3065_p12 = pneg %p3358_p11 }
  0x18   : > { %p3084_p10 = por %p3083_p7, %p3082_p5 }
  0x19   : > { %p3077_p0 = pnand %p3075_p13, %p3065_p12 }
  0x1b   : > { %p3078_p3 = pneg %p3077_p0 }
  0x1d   : > { %p3085_p9 = pnand %p3084_p10, %p3078_p3 }
  0x1f   : > { %3088 = shalt.err (!%p3085_p9)
}
  0x20   : > { %s5327_s1 = sld [smem:[#allocation106_spill]]  ;;  %s3100_s16 = scalar_lea.vmem %s211_s9, 128 }
  0x21   : > { %p3101_p1 = scmp.ne.s32.totalorder %s211_s9, %s3100_s16  ;;  %p3108_p13 = scmp.lt.s32.totalorder %s211_s9, %s211_s9 }
  0x22   : > { %p3109_p0 = scmp.lt.s32.totalorder %s3100_s16, %s3100_s16 }
  0x23   : > { %p3103_p2 = pnand %p3101_p1, %p3065_p12 }
  0x24   : > { %p3110_p4 = por %p3109_p0, %p3108_p13 }
  0x25   : > { %p3104_p6 = pneg %p3103_p2 }
  0x26   : > { %2932 = dma.hbm_to_vmem [thread:$0]  (!%p3358_p11), %s5327_s1, 512, %s200_s7, [#allocation7]  }
  0x27   : > { %p3111_p8 = pnand %p3110_p4, %p3104_p6 }
  0x29   : > { %3114 = shalt.err (!%p3111_p8)
}
  0x2a   : > { %2935 = dma.hbm_to_vmem [thread:$0]  (!%p3358_p11), %s5197_s2, 128, %s211_s9, [#allocation7]  }
  0x2b   : > { %s3126_s19 = scalar_lea.vmem %s3362_s12, 64  ;;  %p3134_p3 = scmp.lt.s32.totalorder %s3362_s12, %s3362_s12 }
  0x2c   : > { %p3127_p9 = scmp.ne.s32.totalorder %s3362_s12, %s3126_s19  ;;  %p3135_p4 = scmp.lt.s32.totalorder %s3126_s19, %s3126_s19 }
  0x2e   : > { %p3129_p1 = pnand %p3127_p9, %p3065_p12  ;;  %p3136_p6 = por %p3135_p4, %p3134_p3 }
  0x30   : > { %p3130_p2 = pneg %p3129_p1 }
  0x32   : > { %p3137_p8 = pnand %p3136_p6, %p3130_p2 }
  0x34   : > { %3140 = shalt.err (!%p3137_p8)
}
  0x35   : > { %2938 = dma.hbm_to_vmem [thread:$0]  (!%p3358_p11), %s5199_s4, 64, %s3362_s12, [#allocation10]  }
  0x36   : > { %s3396_s30 = sadd.s32 1, %s3241_s24   ;;  %s31_s8 = sadd.s32 1, %s3237_s23 }
  0x37   : > { %s28_s7 = ssub.s32 %s3241_s24, %s3396_s30  ;;  %p38_p5 = scmp.ne.s32.totalorder %s3237_s23, %s3233_s22 }
  0x38   : > { %p29_p12 = scmp.eq.s32.totalorder %s28_s7, 0  ;;  %p39_p7 = scmp.eq.s32.totalorder %s3241_s24, 0 }
  0x39   : > { %p2950_p10 = scmp.lt.s32.totalorder %s3241_s24, 2  ;;  %p5328_p0 = scmp.eq.s32.totalorder %s3330_s25, 1 }
  0x3a   : > { %s3406_s9 = scalar_select %p29_p12, %s3237_s23, %s31_s8  }
  0x3b   : > { %p40_p13 = por %p39_p7, %p38_p5  ;;  %p3410_p9 = por %p5328_p0, %p38_p5 }
  0x3c   : > { %s238_s11 = sand.u32 1, %s3237_s23   ;;  %s2899_s13 = sshll.u32 %s3241_s24, 9 }
  0x3d   : > { %s5329_s10 = scalar_select %p3410_p9, 1, 0 }
  0x3e   : > { %s2875_s12 = sshll.u32 %s238_s11, 5  ;;  %s3419_s16 = scalar_lea.hbm %s5195_s0, %s2899_s13 }
  0x3f   : > { %s242_s17 = scalar_lea.vmem [#allocation3], %s2875_s12  ;;  %p3421_p11 = pnand %p2950_p10, %p40_p13 }
  0x40   : > { %s250_s18 = sshll.u32 %s242_s17, 4  ;;  %s239_s20 = scalar_lea.sflag [#allocation4], %s238_s11  ;;  %s251_s18 = int_to_ptr.vmem [resolvable:$true] %s250_s18 }
  0x41   : > { %s3141_s26 = scalar_lea.hbm %s3419_s16, 512  ;;  %p3143_p2 = pneg %p3421_p11 }
  0x42   : > { %p3142_p1 = scmp.ne.s32.totalorder %s3419_s16, %s3141_s26  ;;  %s3146_s13 = scalar_lea.hbm %s5195_s0, 1024 }
  0x43   : > { %p3147_p6 = scmp.lt.s32.totalorder %s3419_s16, %s5195_s0  ;;  %p3148_p8 = scmp.lt.s32.totalorder %s3146_s13, %s3141_s26 }
  0x44   : > { %p3144_p3 = pnand %p3143_p2, %p3142_p1 }
  0x45   : > { %p3149_p12 = por %p3148_p8, %p3147_p6 }
  0x46   : > { %p3145_p4 = pneg %p3144_p3 }
  0x48   : > { %p3150_p5 = pnand %p3149_p12, %p3145_p4 }
  0x4a   : > { %3153 = shalt.err (!%p3150_p5)
}
  0x4b   : > { %s3154_s15 = scalar_lea.vmem %s251_s18, 512  ;;  %s3246_s11 = smov [#allocation3]  }
  0x4c   : > { %p3155_p7 = scmp.ne.s32.totalorder %s251_s18, %s3154_s15  ;;  %s3159_s17 = sshll.u32 %s3246_s11, 4  ;;  %s3160_s17 = int_to_ptr.vmem [resolvable:$false] %s3159_s17 }
  0x4d   : > { %s3161_s1 = scalar_lea.vmem %s3160_s17, 1024  ;;  %p3162_p0 = scmp.lt.s32.totalorder %s251_s18, %s3160_s17 }
  0x4e   : > { %p3157_p10 = pnand %p3155_p7, %p3143_p2  ;;  %p3163_p1 = scmp.lt.s32.totalorder %s3161_s1, %s3154_s15 }
  0x50   : > { %p3158_p13 = pneg %p3157_p10  ;;  %p3164_p3 = por %p3163_p1, %p3162_p0 }
  0x52   : > { %p3165_p9 = pnand %p3164_p3, %p3158_p13 }
  0x54   : > { %3168 = shalt.err (!%p3165_p9)
}
  0x55   : > { %2942 = dma.hbm_to_vmem [thread:$0]  (!%p3421_p11), %s3419_s16, 512, %s251_s18, %s239_s20  }
  0x56   : > { %p5331_p4 = scmp.ne.s32.totalorder %s5325_s29, 0 }
  0x58   : > { %259 = sbr.rel (%p5331_p4) target bundleno = 1711 (0x6af), region = 44 }
  0x5d   : > { %s3442_s26 = sand.u32 1, %s3233_s22   ;;  %p5332_p2 = scmp.ne.s32.totalorder %s5323_s27, 0 }
  0x5e   : > { %s2879_s7 = sshll.u32 %s3442_s26, 5  ;;  %s262_s8 = scalar_lea.sflag [#allocation4], %s3442_s26 }
  0x5f   : > { %s265_s13 = scalar_lea.vmem [#allocation3], %s2879_s7 }
  0x60   : > { %3212 = dma.done.wait (%p5332_p2), %s262_s8, 512  }
  0x61   : > { %3214 = vsyncadd (%p5332_p2), %s262_s8, 4294966784  ;;  %p5333_p9 = scmp.eq.s32.totalorder %s3330_s25, 0 }
  0x63   : > { %3216 = dma.done.wait (%p5333_p9), [#allocation7], 640   ;;  %p5334_p11 = pmov %p5333_p9 }
  0x64   : > { %p5335_p6 = pmov %p5333_p9 }
  0x65   : > { %3218 = vsyncadd (%p5334_p11), [#allocation7], 4294966656 }
  0x66   : > { %3220 = dma.done.wait (%p5335_p6), [#allocation10], 64   ;;  %p5336_p8 = pmov %p5335_p6 }
  0x67   : > { %v3458_v0 = vld [vmem:[%s265_s13 + $0x8] sm:$0xff]  ;;  %v3460_v1 = vld [vmem:[%s265_s13] sm:$0xff]  ;;  %v3462_v2 = vld [vmem:[%s265_s13 + $0x10] sm:$0xff]  ;;  %s5310_s1 = smov 121   ;;  %s5306_s27 = smov 127   ;;  %v349_v4 = vlaneseq  ;;  %vm1439_vm2 = vcmask 719872  }
  0x68   : > { %3222 = vsyncadd (%p5336_p8), [#allocation10], 4294967232  ;;  %5337 = vst [vmem:[#allocation16_spill] sm:$0xff] %v3458_v0  ;;  %937 = vrot.lane.b32.xlu0 %v3458_v0, %s5310_s1  ;;  %935 = vrot.lane.b32.xlu1 %v3460_v1, %s5310_s1  ;;  %v3471_v3 = vld [vmem:[%s265_s13 + $0x18] sm:$0xff]  ;;  %s5210_s29 = smov 1   ;;  %s5212_s16 = smov 7  }
  0x69   : > { %5338 = vst [vmem:[#allocation17_spill] sm:$0xff] %v3460_v1  ;;  %5339 = vst [vmem:[#allocation18_spill] sm:$0xff] %v3462_v2  ;;  %s5206_s18 = smov 8   ;;  %s5208_s19 = smov 9   ;;  %v358_v5 = vshrl.u32 %v349_v4, 7  ;;  %v3588_v9 = vand.u32 127, %v349_v4 }
  0x6a   : > { %890 = vst [vmem:[#allocation2 + $0x208] sm:$0xff] %v3458_v0  ;;  %889 = vst [vmem:[#allocation2 + $0x2e8] sm:$0xff] %v3460_v1  ;;  %s3253_s20 = smov 55   ;;  %s3254_s14 = smov 56   ;;  %v1322_v35 = vld [vmem:[#allocation8] sm:$0xff]  ;;  %v3264_v61 = vmov 0  }
  0x6b   : > { %891 = vst [vmem:[#allocation2 + $0x2f8] sm:$0xff] %v3462_v2  ;;  %5340 = vst [vmem:[#allocation19_spill] sm:$0xff] %v3471_v3  ;;  %s3255_s12 = smov 57   ;;  %s3256_s15 = smov 63   ;;  %v3590_v10 = vsub.s32 0, %v358_v5  ;;  %v3596_v11 = vsub.s32 1, %v358_v5  ;;  %v1438_v36 = vcombine.high %v1322_v35, %v1322_v35  ;;  %3016 = vset.pattern.permute.xlu0 %v3264_v61 }
  0x6c   : > { %892 = vst [vmem:[#allocation2 + $0xa8] sm:$0xff] %v3471_v3  ;;  %939 = vrot.lane.b32.xlu0 %v3462_v2, %s5310_s1  ;;  %895 = vrot.lane.b32.xlu1 %v3458_v0, %s5306_s27  ;;  %s5320_s11 = smov 64   ;;  %s3258_s17 = smov 65   ;;  %v3578_v6 = vld [vmem:[#allocation6 + $0x3] ss:$8 sm:$0xf] }
  0x6d   : > { %s5316_s7 = smov 71   ;;  %s5318_s8 = smov 72   ;;  %v3580_v7 = vld [vmem:[#allocation6 + $0x4] ss:$8 sm:$0xf]  ;;  %vm943_vm0 = vcmp.lt.s32.totalorder %v3588_v9, 121  ;;  %2884 = vmatprep.mubr.msk.f32.mxu0 %vm1439_vm2, %v1438_v36  ;;  %2885 = vmatprep.mubr.msk.f32.mxu1 %vm1439_vm2, %v1438_v36 }
  0x6e   : > { %s5314_s13 = smov 73   ;;  %v331_v8 = vmul.f32 %v3580_v7, %v3578_v6  ;;  %v3612_v18 = vld [vmem:[#allocation6 + $0x5] ss:$8 sm:$0xf]  ;;  %v3614_v21 = vsub.s32 2, %v358_v5  ;;  %v3616_v22 = vsub.s32 3, %v358_v5  ;;  %v3652_v39 = vrot.slane %v3580_v7, %v3596_v11 }
  0x6f   : > { %vm901_vm1 = vcmp.lt.s32.totalorder %v3588_v9, 127  ;;  %v3626_v25 = vrot.slane %v3612_v18, %v3596_v11  ;;  %v3632_v26 = vrot.slane %v3612_v18, %v3590_v10  ;;  %vm5305_vm3 = vcmp.lt.s32.totalorder %v3588_v9, 1  ;;  %v3673_v46 = vld [vmem:[#allocation6 + $0x2] ss:$8 sm:$0xf]  ;;  %p5537_p5 = scmp.ne.s32.totalorder %s5329_s10, 0 }
  0x70   : > { %897 = vrot.lane.b32.xlu0 %v3462_v2, %s5306_s27  ;;  %893 = vrot.lane.b32.xlu1 %v3460_v1, %s5306_s27  ;;  %v3600_v12 = vrot.slane %v331_v8, %v3590_v10  ;;  %v3610_v17 = vrot.slane %v331_v8, %v3596_v11  ;;  %v3639_v31 = vrot.slane %v331_v8, %v3614_v21  ;;  %v1431_v59 = vld [vmem:[%s5200_s5] sm:$0xf]  ;;  %vm813_vm4 = vcmp.lt.s32.totalorder %v3588_v9, 7 }
  0x71   : > { %5343 = vst [vmem:[#allocation22_spill] sm:$0xff] %v3626_v25  ;;  %5344 = vst [vmem:[#allocation23_spill] sm:$0xff] %v3632_v26  ;;  %v3646_v34 = vrot.slane %v331_v8, %v3616_v22  ;;  %v3660_v42 = vrot.slane %v3612_v18, %v3614_v21  ;;  %v3671_v45 = vrot.slane %v3612_v18, %v3616_v22  ;;  %vm5304_vm5 = vcmp.lt.s32.totalorder %v3588_v9, 8  ;;  %v3753_v35 = vld [vmem:[#allocation6 + $0x1] ss:$8 sm:$0xf] }
  0x72   : > { %5341 = vst [vmem:[#allocation20_spill] sm:$0xff] %v3600_v12  ;;  %5342 = vst [vmem:[#allocation21_spill] sm:$0xff] %v3610_v17  ;;  %v3680_v49 = vrot.slane %v3580_v7, %v3590_v10  ;;  %v3692_v53 = vmul.f32 %v3612_v18, %v3673_v46  ;;  %vm729_vm6 = vcmp.lt.s32.totalorder %v3588_v9, 9  ;;  %vm687_vm7 = vcmp.lt.s32.totalorder %v3588_v9, 55 }
  0x73   : > { %5345 = vst [vmem:[#allocation24_spill] sm:$0xff] %v3639_v31  ;;  %5346 = vst [vmem:[#allocation25_spill] sm:$0xff] %v3646_v34  ;;  %vm645_vm8 = vcmp.lt.s32.totalorder %v3588_v9, 56  ;;  %vm603_vm9 = vcmp.lt.s32.totalorder %v3588_v9, 57  ;;  %vm561_vm10 = vcmp.lt.s32.totalorder %v3588_v9, 63  ;;  %vm519_vm11 = vcmp.lt.s32.totalorder %v3588_v9, 64 }
  0x74   : > { %941 = vrot.lane.b32.xlu0 %v3471_v3, %s5310_s1  ;;  %847 = vrot.lane.b32.xlu1 %v3460_v1, %s5210_s29  ;;  %5347 = vst [vmem:[#allocation26_spill] sm:$0xff] %v3652_v39  ;;  %5348 = vst [vmem:[#allocation27_spill] sm:$0xff] %v3660_v42  ;;  %v3710_v63 = vrot.slane %v3692_v53, %v3596_v11  ;;  %v3714_v4 = vrot.slane %v3692_v53, %v3590_v10  ;;  %vm477_vm12 = vcmp.lt.s32.totalorder %v3588_v9, 65 }
  0x75   : > { %5349 = vst [vmem:[#allocation28_spill] sm:$0xff] %v3671_v45  ;;  %5350 = vst [vmem:[#allocation29_spill] sm:$0xff] %v3680_v49  ;;  %vm435_vm13 = vcmp.lt.s32.totalorder %v3588_v9, 71  ;;  %vm393_vm14 = vcmp.lt.s32.totalorder %v3588_v9, 72  ;;  %vm351_vm15 = vcmp.lt.s32.totalorder %v3588_v9, 73  ;;  %vm1027_vm2 = vcmp.lt.s32.totalorder %v3588_v9, 119 }
  0x76   : > { %5351 = vst [vmem:[#allocation30_spill] sm:$0xff] %v3710_v63  ;;  %5352 = vst [vmem:[#allocation31_spill] sm:$0xff] %v3714_v4 }
  0x78   : > { %849 = vrot.lane.b32.xlu0 %v3458_v0, %s5210_s29  ;;  %899 = vrot.lane.b32.xlu1 %v3471_v3, %s5306_s27 }
  0x7c   : > { %853 = vrot.lane.b32.xlu0 %v3471_v3, %s5210_s29  ;;  %805 = vrot.lane.b32.xlu1 %v3460_v1, %s5212_s16 }
  0x80   : > { %807 = vrot.lane.b32.xlu0 %v3458_v0, %s5212_s16  ;;  %811 = vrot.lane.b32.xlu1 %v3471_v3, %s5212_s16 }
  0x84   : > { %763 = vrot.lane.b32.xlu0 %v3460_v1, %s5206_s18  ;;  %765 = vrot.lane.b32.xlu1 %v3458_v0, %s5206_s18 }
  0x88   : > { %851 = vrot.lane.b32.xlu0 %v3462_v2, %s5210_s29  ;;  %769 = vrot.lane.b32.xlu1 %v3471_v3, %s5206_s18 }
  0x8c   : > { %721 = vrot.lane.b32.xlu0 %v3460_v1, %s5208_s19  ;;  %723 = vrot.lane.b32.xlu1 %v3458_v0, %s5208_s19 }
  0x90   : > { %809 = vrot.lane.b32.xlu0 %v3462_v2, %s5212_s16  ;;  %727 = vrot.lane.b32.xlu1 %v3471_v3, %s5208_s19 }
  0x94   : > { %679 = vrot.lane.b32.xlu0 %v3460_v1, %s3253_s20  ;;  %681 = vrot.lane.b32.xlu1 %v3458_v0, %s3253_s20 }
  0x98   : > { %767 = vrot.lane.b32.xlu0 %v3462_v2, %s5206_s18  ;;  %685 = vrot.lane.b32.xlu1 %v3471_v3, %s3253_s20  ;;  %s5312_s18 = smov 119  }
  0x9c   : > { %637 = vrot.lane.b32.xlu0 %v3460_v1, %s3254_s14  ;;  %639 = vrot.lane.b32.xlu1 %v3458_v0, %s3254_s14 }
  0xa0   : > { %725 = vrot.lane.b32.xlu0 %v3462_v2, %s5208_s19  ;;  %643 = vrot.lane.b32.xlu1 %v3471_v3, %s3254_s14  ;;  %s5308_s19 = smov 120  }
  0xa4   : > { %595 = vrot.lane.b32.xlu0 %v3460_v1, %s3255_s12  ;;  %597 = vrot.lane.b32.xlu1 %v3458_v0, %s3255_s12 }
  0xa8   : > { %683 = vrot.lane.b32.xlu0 %v3462_v2, %s3253_s20  ;;  %601 = vrot.lane.b32.xlu1 %v3471_v3, %s3255_s12 }
  0xac   : > { %553 = vrot.lane.b32.xlu0 %v3460_v1, %s3256_s15  ;;  %555 = vrot.lane.b32.xlu1 %v3458_v0, %s3256_s15 }
  0xb0   : > { %641 = vrot.lane.b32.xlu0 %v3462_v2, %s3254_s14  ;;  %559 = vrot.lane.b32.xlu1 %v3471_v3, %s3256_s15 }
  0xb4   : > { %511 = vrot.lane.b32.xlu0 %v3460_v1, %s5320_s11  ;;  %513 = vrot.lane.b32.xlu1 %v3458_v0, %s5320_s11 }
  0xb8   : > { %599 = vrot.lane.b32.xlu0 %v3462_v2, %s3255_s12  ;;  %517 = vrot.lane.b32.xlu1 %v3471_v3, %s5320_s11 }
  0xbc   : > { %469 = vrot.lane.b32.xlu0 %v3460_v1, %s3258_s17  ;;  %471 = vrot.lane.b32.xlu1 %v3458_v0, %s3258_s17 }
  0xc0   : > { %557 = vrot.lane.b32.xlu0 %v3462_v2, %s3256_s15  ;;  %475 = vrot.lane.b32.xlu1 %v3471_v3, %s3258_s17 }
  0xc4   : > { %427 = vrot.lane.b32.xlu0 %v3460_v1, %s5316_s7  ;;  %429 = vrot.lane.b32.xlu1 %v3458_v0, %s5316_s7 }
  0xc8   : > { %515 = vrot.lane.b32.xlu0 %v3462_v2, %s5320_s11  ;;  %433 = vrot.lane.b32.xlu1 %v3471_v3, %s5316_s7 }
  0xcc   : > { %385 = vrot.lane.b32.xlu0 %v3460_v1, %s5318_s8  ;;  %387 = vrot.lane.b32.xlu1 %v3458_v0, %s5318_s8 }
  0xd0   : > { %473 = vrot.lane.b32.xlu0 %v3462_v2, %s3258_s17  ;;  %391 = vrot.lane.b32.xlu1 %v3471_v3, %s5318_s8 }
  0xd4   : > { %341 = vrot.lane.b32.xlu0 %v3460_v1, %s5314_s13  ;;  %343 = vrot.lane.b32.xlu1 %v3458_v0, %s5314_s13 }
  0xd8   : > { %431 = vrot.lane.b32.xlu0 %v3462_v2, %s5316_s7  ;;  %347 = vrot.lane.b32.xlu1 %v3471_v3, %s5314_s13 }
  0xda   : > { %v938_v13 = vpop.permute.xlu0 %937  ;;  %v936_v14 = vpop.permute.xlu1 %935 }
  0xdb   : > { %v946_v15 = vsel %vm943_vm0, %v936_v14, %v938_v13 }
  0xdc   : > { %v969_v16 = vmul.f32 %v3600_v12, %v946_v15  ;;  %389 = vrot.lane.b32.xlu0 %v3462_v2, %s5318_s8  ;;  %345 = vrot.lane.b32.xlu1 %v3462_v2, %s5314_s13  ;;  %s3267_s13 = smov 0.0  }
  0xde   : > { %v940_v19 = vpop.permute.xlu0 %939  ;;  %v896_v20 = vpop.permute.xlu1 %895 }
  0xdf   : > { %v945_v23 = vsel %vm943_vm0, %v938_v13, %v940_v19 }
  0xe0   : > { %v970_v24 = vmul.f32 %v3610_v17, %v945_v23  ;;  %1021 = vrot.lane.b32.xlu0 %v3458_v0, %s5312_s18  ;;  %1023 = vrot.lane.b32.xlu1 %v3462_v2, %s5312_s18 }
  0xe2   : > { %v898_v27 = vpop.permute.xlu0 %897  ;;  %v894_v28 = vpop.permute.xlu1 %893  ;;  %1442 = vmatprep.subr.mxu0 %v970_v24  ;;  %v3733_v24 = vmul.f32 %v3580_v7, %v3673_v46 }
  0xe3   : > { %v903_v29 = vsel %vm901_vm1, %v896_v20, %v898_v27  ;;  %v904_v30 = vsel %vm901_vm1, %v894_v28, %v896_v20  ;;  %1443 = vmatpush1.msra.mxu0 %v969_v16 }
  0xe4   : > { %v928_v32 = vmul.f32 %v3626_v25, %v903_v29  ;;  %v927_v33 = vmul.f32 %v3632_v26, %v904_v30  ;;  %1019 = vrot.lane.b32.xlu0 %v3460_v1, %s5312_s18  ;;  %979 = vrot.lane.b32.xlu1 %v3458_v0, %s5308_s19  ;;  %v3741_v29 = vrot.slane %v3580_v7, %v3614_v21 }
  0xe5   : > { %v3745_v30 = vrot.slane %v3580_v7, %v3616_v22  ;;  %v4058_v26 = vrot.slane %v3753_v35, %v3590_v10 }
  0xe6   : > { %v942_v37 = vpop.permute.xlu0 %941  ;;  %v848_v38 = vpop.permute.xlu1 %847  ;;  %1444 = vmatprep.subr.mxu0 %v928_v32  ;;  %5354 = vst [vmem:[#allocation33_spill] sm:$0xff] %v3741_v29  ;;  %v3749_v32 = vrot.slane %v3673_v46, %v3590_v10 }
  0xe7   : > { %v944_v40 = vsel %vm943_vm0, %v940_v19, %v942_v37  ;;  %v947_v41 = vsel %vm943_vm0, %v942_v37, %v936_v14  ;;  %1445 = vmatpush1.msra.mxu0 %v927_v33  ;;  %v3727_v19 = vrot.slane %v3673_v46, %v3596_v11  ;;  %5355 = vst [vmem:[#allocation34_spill] sm:$0xff] %v3745_v30  ;;  %v3751_v33 = vld [vmem:[#allocation6] ss:$8 sm:$0xf]  ;;  %5390 = vst [vmem:[#allocation69_spill] sm:$0xff] %v4058_v26 }
  0xe8   : > { %v971_v43 = vmul.f32 %v3639_v31, %v944_v40  ;;  %v972_v44 = vmul.f32 %v3646_v34, %v947_v41  ;;  %981 = vrot.lane.b32.xlu0 %v3462_v2, %s5308_s19  ;;  %977 = vrot.lane.b32.xlu1 %v3460_v1, %s5308_s19  ;;  %5356 = vst [vmem:[#allocation35_spill] sm:$0xff] %v3749_v32 }
  0xe9   : > { %1446 = vmatprep.subr.mxu0 %v3458_v0  ;;  %5353 = vst [vmem:[#allocation32_spill] sm:$0xff] %v3727_v19 }
  0xea   : > { %v3676_v47 = vpop.permute.xlu0 %849  ;;  %v900_v48 = vpop.permute.xlu1 %899  ;;  %1513 = vmatprep.subr.mxu1 %v972_v44  ;;  %1447 = vmatpush1.msra.mxu0 %v3460_v1  ;;  %v3769_v44 = vmul.f32 %v3578_v6, %v3751_v33 }
  0xeb   : > { %v858_v50 = vsel %vm5305_vm3, %v848_v38, %v3676_v47  ;;  %v902_v51 = vsel %vm901_vm1, %v898_v27, %v900_v48  ;;  %v905_v52 = vsel %vm901_vm1, %v900_v48, %v894_v28  ;;  %1514 = vmatpush1.msra.mxu1 %v971_v43 }
  0xec   : > { %v882_v54 = vmul.f32 %v3652_v39, %v858_v50  ;;  %v929_v55 = vmul.f32 %v3660_v42, %v902_v51  ;;  %v930_v56 = vmul.f32 %v3671_v45, %v905_v52  ;;  %1025 = vrot.lane.b32.xlu0 %v3471_v3, %s5312_s18  ;;  %983 = vrot.lane.b32.xlu1 %v3471_v3, %s5308_s19 }
  0xed   : > { %v3776_v52 = vmul.f32 %v3578_v6, %v3753_v35 }
  0xee   : > { %886 = vst [vmem:[#allocation2 + $0x228] sm:$0xff] %v882_v54  ;;  %v854_v57 = vpop.permute.xlu0 %853  ;;  %v806_v58 = vpop.permute.xlu1 %805  ;;  %1515 = vmatprep.subr.mxu1 %v930_v56  ;;  %1448 = vmatprep.subr.mxu0 %v882_v54  ;;  %v3785_v56 = vrot.slane %v3692_v53, %v3614_v21 }
  0xef   : > { %v859_v60 = vsel %vm5305_vm3, %v854_v57, %v848_v38  ;;  %1516 = vmatpush1.msra.mxu1 %v929_v55  ;;  %v3758_v38 = vrot.slane %v3733_v24, %v3596_v11  ;;  %v3802_v61 = vmul.f32 %v3776_v52, %v3612_v18 }
  0xf0   : > { %v881_v62 = vmul.f32 %v3680_v49, %v859_v60  ;;  %1517 = vmatprep.subr.mxu1 %v3471_v3  ;;  %1434 = vperm.xlu0 %3016, %v1431_v59   ;;  %5358 = vst [vmem:[#allocation37_spill] sm:$0xff] %v3785_v56  ;;  %v3794_v59 = vrot.slane %v3692_v53, %v3616_v22 }
  0xf1   : > { %1518 = vmatpush1.msra.mxu1 %v3462_v2  ;;  %5357 = vst [vmem:[#allocation36_spill] sm:$0xff] %v3758_v38  ;;  %v3798_v60 = vrot.slane %v3733_v24, %v3590_v10  ;;  %v3902_v2 = vrot.slane %v3769_v44, %v3590_v10  ;;  %v3906_v3 = vrot.slane %v3776_v52, %v3616_v22 }
  0xf2   : > { %885 = vst [vmem:[#allocation2 + $0x2b8] sm:$0xff] %v881_v62  ;;  %v808_v5 = vpop.permute.xlu0 %807  ;;  %v812_v8 = vpop.permute.xlu1 %811  ;;  %1449 = vmatpush1.msra.mxu0 %v881_v62  ;;  %5359 = vst [vmem:[#allocation38_spill] sm:$0xff] %v3794_v59  ;;  %v3961_v45 = vrot.slane %v3802_v61, %v3596_v11  ;;  %v3965_v42 = vrot.slane %v3802_v61, %v3614_v21  ;;  %v4018_v49 = vrot.slane %v3769_v44, %v3616_v22 }
  0xf3   : > { %v816_v13 = vsel %vm813_vm4, %v806_v58, %v808_v5  ;;  %v817_v14 = vsel %vm813_vm4, %v812_v8, %v806_v58  ;;  %5360 = vst [vmem:[#allocation39_spill] sm:$0xff] %v3798_v60  ;;  %5371 = vst [vmem:[#allocation50_spill] sm:$0xff] %v3902_v2 }
  0xf4   : > { %v840_v15 = vmul.f32 %v3710_v63, %v816_v13  ;;  %v839_v16 = vmul.f32 %v3714_v4, %v817_v14  ;;  %5372 = vst [vmem:[#allocation51_spill] sm:$0xff] %v3906_v3  ;;  %5377 = vst [vmem:[#allocation56_spill] sm:$0xff] %v3961_v45 }
  0xf5   : > { %5378 = vst [vmem:[#allocation57_spill] sm:$0xff] %v3965_v42  ;;  %5384 = vst [vmem:[#allocation63_spill] sm:$0xff] %v4018_v49 }
  0xf6   : > { %844 = vst [vmem:[#allocation2 + $0x1c0] sm:$0xff] %v840_v15  ;;  %843 = vst [vmem:[#allocation2 + $0x1c8] sm:$0xff] %v839_v16  ;;  %v764_v20 = vpop.permute.xlu0 %763  ;;  %v3729_v23 = vpop.permute.xlu1 %765  ;;  %1450 = vmatprep.subr.mxu0 %v840_v15 }
  0xf7   : > { %v774_v27 = vsel %vm5304_vm5, %v764_v20, %v3729_v23  ;;  %1451 = vmatpush1.msra.mxu0 %v839_v16 }
  0xf8   : > { %v798_v28 = vmul.f32 %v3727_v19, %v774_v27 }
  0xfa   : > { %802 = vst [vmem:[#allocation2 + $0x230] sm:$0xff] %v798_v28  ;;  %v852_v36 = vpop.permute.xlu0 %851  ;;  %v770_v37 = vpop.permute.xlu1 %769  ;;  %1452 = vmatprep.subr.mxu0 %v798_v28 }
  0xfb   : > { %v856_v40 = vsel %vm5305_vm3, %v852_v36, %v854_v57  ;;  %v857_v41 = vsel %vm5305_vm3, %v3676_v47, %v852_v36  ;;  %v775_v43 = vsel %vm5304_vm5, %v770_v37, %v764_v20  ;;  %v3789_v57 = vmul.f32 %v3769_v44, %v3612_v18 }
  0xfc   : > { %v883_v48 = vmul.f32 %v3741_v29, %v857_v41  ;;  %v884_v50 = vmul.f32 %v3745_v30, %v856_v40  ;;  %v797_v51 = vmul.f32 %v3749_v32, %v775_v43  ;;  %v3832_v41 = vrot.slane %v3673_v46, %v3614_v21 }
  0xfd   : > { %v3816_v16 = vrot.slane %v3789_v57, %v3596_v11  ;;  %v3836_v43 = vrot.slane %v3673_v46, %v3616_v22  ;;  %vm1585_vm3 = vcmask 1043456  }
  0xfe   : > { %887 = vst [vmem:[#allocation2 + $0x178] sm:$0xff] %v883_v48  ;;  %888 = vst [vmem:[#allocation2 + $0x200] sm:$0xff] %v884_v50  ;;  %v722_v47 = vpop.permute.xlu0 %721  ;;  %v3778_v54 = vpop.permute.xlu1 %723  ;;  %1519 = vmatprep.subr.mxu1 %v884_v50  ;;  %1453 = vmatpush1.msra.mxu0 %v797_v51 }
  0xff   : > { %801 = vst [vmem:[#allocation2 + $0x1a8] sm:$0xff] %v797_v51  ;;  %v732_v55 = vsel %vm729_vm6, %v722_v47, %v3778_v54  ;;  %1520 = vmatpush1.msra.mxu1 %v883_v48  ;;  %5361 = vst [vmem:[#allocation40_spill] sm:$0xff] %v3816_v16  ;;  %v3844_v51 = vrot.slane %v3789_v57, %v3590_v10 }
 0x100   : > { %v756_v58 = vmul.f32 %v3758_v38, %v732_v55  ;;  %5363 = vst [vmem:[#allocation42_spill] sm:$0xff] %v3832_v41  ;;  %5364 = vst [vmem:[#allocation43_spill] sm:$0xff] %v3836_v43 }
 0x101   : > { %5365 = vst [vmem:[#allocation44_spill] sm:$0xff] %v3844_v51 }
 0x102   : > { %760 = vst [vmem:[#allocation2 + $0x1e0] sm:$0xff] %v756_v58  ;;  %v810_v62 = vpop.permute.xlu0 %809  ;;  %v3804_v13 = vpop.permute.xlu1 %727  ;;  %1454 = vmatprep.subr.mxu0 %v756_v58 }
 0x103   : > { %v814_v14 = vsel %vm813_vm4, %v810_v62, %v812_v8  ;;  %v815_v53 = vsel %vm813_vm4, %v808_v5, %v810_v62  ;;  %v733_v15 = vsel %vm729_vm6, %v3804_v13, %v722_v47  ;;  %v3823_v8 = vrot.slane %v3802_v61, %v3590_v10 }
 0x104   : > { %v841_v20 = vmul.f32 %v3785_v56, %v815_v53  ;;  %v842_v27 = vmul.f32 %v3794_v59, %v814_v14  ;;  %v755_v28 = vmul.f32 %v3798_v60, %v733_v15  ;;  %v3848_v47 = vrot.slane %v3802_v61, %v3616_v22 }
 0x105   : > { %5362 = vst [vmem:[#allocation41_spill] sm:$0xff] %v3823_v8  ;;  %v3855_v62 = vrot.slane %v3769_v44, %v3596_v11 }
 0x106   : > { %845 = vst [vmem:[#allocation2 + $0x298] sm:$0xff] %v841_v20  ;;  %846 = vst [vmem:[#allocation2 + $0x310] sm:$0xff] %v842_v27  ;;  %v680_v5 = vpop.permute.xlu0 %679  ;;  %v3825_v36 = vpop.permute.xlu1 %681  ;;  %1521 = vmatprep.subr.mxu1 %v842_v27  ;;  %1455 = vmatpush1.msra.mxu0 %v755_v28 }
 0x107   : > { %759 = vst [vmem:[#allocation2 + $0x1d0] sm:$0xff] %v755_v28  ;;  %v690_v40 = vsel %vm687_vm7, %v680_v5, %v3825_v36  ;;  %1522 = vmatpush1.msra.mxu1 %v841_v20  ;;  %5366 = vst [vmem:[#allocation45_spill] sm:$0xff] %v3848_v47  ;;  %v3867_v20 = vrot.slane %v3776_v52, %v3590_v10 }
 0x108   : > { %v714_v48 = vmul.f32 %v3816_v16, %v690_v40  ;;  %v3840_v50 = vmul.f32 %v3823_v8, %v690_v40  ;;  %5367 = vst [vmem:[#allocation46_spill] sm:$0xff] %v3855_v62 }
 0x109   : > { %5368 = vst [vmem:[#allocation47_spill] sm:$0xff] %v3867_v20 }
 0x10a   : > { %718 = vst [vmem:[#allocation2 + $0x180] sm:$0xff] %v714_v48  ;;  %v768_v55 = vpop.permute.xlu0 %767  ;;  %v3850_v58 = vpop.permute.xlu1 %685  ;;  %1456 = vmatprep.subr.mxu0 %v714_v48 }
 0x10b   : > { %v772_v14 = vsel %vm5304_vm5, %v768_v55, %v770_v37  ;;  %v773_v53 = vsel %vm5304_vm5, %v3729_v23, %v768_v55  ;;  %v691_v15 = vsel %vm687_vm7, %v3850_v58, %v680_v5  ;;  %v3879_v5 = vmul.f32 %v3769_v44, %v3580_v7 }
 0x10c   : > { %v799_v27 = vmul.f32 %v3832_v41, %v773_v53  ;;  %v800_v28 = vmul.f32 %v3836_v43, %v772_v14  ;;  %v713_v40 = vmul.f32 %v3844_v51, %v691_v15  ;;  %v3873_v37 = vmul.f32 %v3848_v47, %v691_v15 }
 0x10d   : > { %v3886_v14 = vrot.slane %v3733_v24, %v3614_v21  ;;  %v3890_v53 = vrot.slane %v3733_v24, %v3616_v22  ;;  %v3894_v15 = vmul.f32 %v3776_v52, %v3580_v7  ;;  %vm985_vm5 = vcmp.lt.s32.totalorder %v3588_v9, 120 }
 0x10e   : > { %803 = vst [vmem:[#allocation2 + $0x328] sm:$0xff] %v799_v27  ;;  %804 = vst [vmem:[#allocation2 + $0x290] sm:$0xff] %v800_v28  ;;  %v638_v23 = vpop.permute.xlu0 %637  ;;  %v3875_v48 = vpop.permute.xlu1 %639  ;;  %1523 = vmatprep.subr.mxu1 %v800_v28  ;;  %1457 = vmatpush1.msra.mxu0 %v713_v40 }
 0x10f   : > { %717 = vst [vmem:[#allocation2 + $0x158] sm:$0xff] %v713_v40  ;;  %v648_v55 = vsel %vm645_vm8, %v638_v23, %v3875_v48  ;;  %5369 = vst [vmem:[#allocation48_spill] sm:$0xff] %v3886_v14  ;;  %1524 = vmatpush1.msra.mxu1 %v799_v27  ;;  %v3913_v27 = vrot.slane %v3879_v5, %v3596_v11  ;;  %v3926_v41 = vrot.slane %v3894_v15, %v3590_v10 }
 0x110   : > { %5370 = vst [vmem:[#allocation49_spill] sm:$0xff] %v3890_v53  ;;  %v672_v28 = vmul.f32 %v3855_v62, %v648_v55  ;;  %v3898_v40 = vmul.f32 %v3867_v20, %v648_v55  ;;  %v4103_v51 = vrot.slane %v3894_v15, %v3614_v21 }
 0x111   : > { %5373 = vst [vmem:[#allocation52_spill] sm:$0xff] %v3913_v27  ;;  %5374 = vst [vmem:[#allocation53_spill] sm:$0xff] %v3926_v41 }
 0x112   : > { %676 = vst [vmem:[#allocation2 + $0x248] sm:$0xff] %v672_v28  ;;  %v726_v24 = vpop.permute.xlu0 %725  ;;  %v3908_v1 = vpop.permute.xlu1 %643  ;;  %1458 = vmatprep.subr.mxu0 %v672_v28  ;;  %5394 = vst [vmem:[#allocation73_spill] sm:$0xff] %v4103_v51 }
 0x113   : > { %v730_v55 = vsel %vm729_vm6, %v726_v24, %v3804_v13  ;;  %v731_v0 = vsel %vm729_vm6, %v3778_v54, %v726_v24  ;;  %v649_v43 = vsel %vm645_vm8, %v3908_v1, %v638_v23  ;;  %v3938_v23 = vmul.f32 %v3612_v18, %v3751_v33 }
 0x114   : > { %v757_v30 = vmul.f32 %v3886_v14, %v731_v0  ;;  %v758_v28 = vmul.f32 %v3890_v53, %v730_v55  ;;  %v671_v29 = vmul.f32 %v3902_v2, %v649_v43  ;;  %v3932_v13 = vmul.f32 %v3906_v3, %v649_v43 }
 0x115   : > { %v3945_v43 = vrot.slane %v3789_v57, %v3614_v21  ;;  %v3949_v55 = vrot.slane %v3789_v57, %v3616_v22  ;;  %v3969_v57 = vrot.slane %v3879_v5, %v3590_v10  ;;  %v3980_v38 = vrot.slane %v3938_v23, %v3596_v11 }
 0x116   : > { %761 = vst [vmem:[#allocation2 + $0x2d8] sm:$0xff] %v757_v30  ;;  %762 = vst [vmem:[#allocation2 + $0xb0] sm:$0xff] %v758_v28  ;;  %v596_v54 = vpop.permute.xlu0 %595  ;;  %v3934_v24 = vpop.permute.xlu1 %597  ;;  %1525 = vmatprep.subr.mxu1 %v758_v28  ;;  %1459 = vmatpush1.msra.mxu0 %v671_v29  ;;  %v3953_v28 = vmul.f32 %v3612_v18, %v3753_v35  ;;  %v4030_v14 = vrot.slane %v3776_v52, %v3614_v21 }
 0x117   : > { %675 = vst [vmem:[#allocation2 + $0x1d8] sm:$0xff] %v671_v29  ;;  %v606_v0 = vsel %vm603_vm9, %v596_v54, %v3934_v24  ;;  %5375 = vst [vmem:[#allocation54_spill] sm:$0xff] %v3945_v43  ;;  %1526 = vmatpush1.msra.mxu1 %v757_v30  ;;  %v3973_v30 = vrot.slane %v3894_v15, %v3616_v22  ;;  %v4034_v63 = vrot.slane %v3938_v23, %v3590_v10 }
 0x118   : > { %5376 = vst [vmem:[#allocation55_spill] sm:$0xff] %v3949_v55  ;;  %v630_v32 = vmul.f32 %v3913_v27, %v606_v0  ;;  %v3957_v29 = vmul.f32 %v3926_v41, %v606_v0  ;;  %5379 = vst [vmem:[#allocation58_spill] sm:$0xff] %v3969_v57  ;;  %v3993_v4 = vrot.slane %v3953_v28, %v3590_v10 }
 0x119   : > { %5380 = vst [vmem:[#allocation59_spill] sm:$0xff] %v3973_v30  ;;  %5381 = vst [vmem:[#allocation60_spill] sm:$0xff] %v3980_v38  ;;  %v4107_v41 = vrot.slane %v3751_v33, %v3590_v10 }
 0x11a   : > { %634 = vst [vmem:[#allocation2 + $0x250] sm:$0xff] %v630_v32  ;;  %v684_v19 = vpop.permute.xlu0 %683  ;;  %v3975_v0 = vpop.permute.xlu1 %601  ;;  %1460 = vmatprep.subr.mxu0 %v630_v32  ;;  %5382 = vst [vmem:[#allocation61_spill] sm:$0xff] %v3993_v4 }
 0x11b   : > { %v688_v61 = vsel %vm687_vm7, %v684_v19, %v3850_v58  ;;  %v689_v60 = vsel %vm687_vm7, %v3825_v36, %v684_v19  ;;  %v607_v59 = vsel %vm603_vm9, %v3975_v0, %v596_v54  ;;  %5386 = vst [vmem:[#allocation65_spill] sm:$0xff] %v4030_v14  ;;  %5387 = vst [vmem:[#allocation66_spill] sm:$0xff] %v4034_v63 }
 0x11c   : > { %v715_v34 = vmul.f32 %v3945_v43, %v689_v60  ;;  %v716_v32 = vmul.f32 %v3949_v55, %v688_v61  ;;  %v3998_v31 = vmul.f32 %v3961_v45, %v689_v60  ;;  %v4001_v58 = vmul.f32 %v3965_v42, %v688_v61  ;;  %5395 = vst [vmem:[#allocation74_spill] sm:$0xff] %v4107_v41 }
 0x11d   : > { %v629_v19 = vmul.f32 %v3969_v57, %v607_v59  ;;  %v4005_v36 = vmul.f32 %v3973_v30, %v607_v59  ;;  %v4014_v61 = vrot.slane %v3769_v44, %v3614_v21  ;;  %v4076_v57 = vmul.f32 %v3580_v7, %v3751_v33 }
 0x11e   : > { %719 = vst [vmem:[#allocation2 + $0xc0] sm:$0xff] %v715_v34  ;;  %720 = vst [vmem:[#allocation2 + $0x60] sm:$0xff] %v716_v32  ;;  %v554_v54 = vpop.permute.xlu0 %553  ;;  %v4007_v39 = vpop.permute.xlu1 %555  ;;  %1527 = vmatprep.subr.mxu1 %v716_v32  ;;  %v4026_v32 = vrot.slane %v3776_v52, %v3596_v11  ;;  %v4099_v55 = vrot.slane %v3894_v15, %v3596_v11 }
 0x11f   : > { %633 = vst [vmem:[#allocation2 + $0x190] sm:$0xff] %v629_v19  ;;  %v564_v60 = vsel %vm561_vm10, %v554_v54, %v4007_v39  ;;  %5383 = vst [vmem:[#allocation62_spill] sm:$0xff] %v4014_v61  ;;  %1461 = vmatpush1.msra.mxu0 %v629_v19  ;;  %1528 = vmatpush1.msra.mxu1 %v715_v34  ;;  %v4038_v34 = vrot.slane %v3953_v28, %v3616_v22 }
 0x120   : > { %v588_v59 = vmul.f32 %v3980_v38, %v564_v60  ;;  %v4022_v53 = vmul.f32 %v3993_v4, %v564_v60  ;;  %5385 = vst [vmem:[#allocation64_spill] sm:$0xff] %v4026_v32  ;;  %v4045_v60 = vrot.slane %v3751_v33, %v3596_v11  ;;  %5393 = vst [vmem:[#allocation72_spill] sm:$0xff] %v4099_v55 }
 0x121   : > { %5388 = vst [vmem:[#allocation67_spill] sm:$0xff] %v4038_v34 }
 0x122   : > { %592 = vst [vmem:[#allocation2 + $0x268] sm:$0xff] %v588_v59  ;;  %v642_v44 = vpop.permute.xlu0 %641  ;;  %v4040_v19 = vpop.permute.xlu1 %559  ;;  %5389 = vst [vmem:[#allocation68_spill] sm:$0xff] %v4045_v60  ;;  %1462 = vmatprep.subr.mxu0 %v588_v59 }
 0x123   : > { %v646_v52 = vsel %vm645_vm8, %v642_v44, %v3908_v1  ;;  %v647_v56 = vsel %vm645_vm8, %v3875_v48, %v642_v44  ;;  %v565_v25 = vsel %vm561_vm10, %v4040_v19, %v554_v54 }
 0x124   : > { %v673_v17 = vmul.f32 %v4014_v61, %v647_v56  ;;  %v674_v59 = vmul.f32 %v4018_v49, %v646_v52  ;;  %v4063_v12 = vmul.f32 %v4026_v32, %v647_v56  ;;  %v4066_v1 = vmul.f32 %v4030_v14, %v646_v52 }
 0x125   : > { %v587_v48 = vmul.f32 %v4034_v63, %v565_v25  ;;  %v4070_v44 = vmul.f32 %v4038_v34, %v565_v25  ;;  %v4080_v56 = vmul.f32 %v3580_v7, %v3753_v35  ;;  %v4087_v52 = vrot.slane %v3879_v5, %v3614_v21 }
 0x126   : > { %677 = vst [vmem:[#allocation2 + $0x280] sm:$0xff] %v673_v17  ;;  %678 = vst [vmem:[#allocation2 + $0x260] sm:$0xff] %v674_v59  ;;  %v512_v54 = vpop.permute.xlu0 %511  ;;  %v4072_v30 = vpop.permute.xlu1 %513  ;;  %1529 = vmatprep.subr.mxu1 %v674_v59  ;;  %v4091_v59 = vrot.slane %v3879_v5, %v3616_v22  ;;  %v4139_v63 = vmul.f32 %v3673_v46, %v3753_v35 }
 0x127   : > { %591 = vst [vmem:[#allocation2 + $0x2d0] sm:$0xff] %v587_v48  ;;  %v522_v25 = vsel %vm519_vm11, %v512_v54, %v4072_v30  ;;  %5391 = vst [vmem:[#allocation70_spill] sm:$0xff] %v4087_v52  ;;  %1463 = vmatpush1.msra.mxu0 %v587_v48  ;;  %1530 = vmatpush1.msra.mxu1 %v673_v17  ;;  %v4111_v17 = vrot.slane %v3753_v35, %v3616_v22 }
 0x128   : > { %5392 = vst [vmem:[#allocation71_spill] sm:$0xff] %v4091_v59  ;;  %v546_v47 = vmul.f32 %v4045_v60, %v522_v25  ;;  %v4095_v42 = vmul.f32 %v4058_v26, %v522_v25  ;;  %v4118_v25 = vrot.slane %v4076_v57, %v3596_v11  ;;  %v4122_v15 = vrot.slane %v4080_v56, %v3590_v10 }
 0x129   : > { %5396 = vst [vmem:[#allocation75_spill] sm:$0xff] %v4111_v17  ;;  %v4126_v26 = vmul.f32 %v3673_v46, %v3751_v33 }
 0x12a   : > { %550 = vst [vmem:[#allocation2 + $0x188] sm:$0xff] %v546_v47  ;;  %v600_v5 = vpop.permute.xlu0 %599  ;;  %v4113_v48 = vpop.permute.xlu1 %517  ;;  %5397 = vst [vmem:[#allocation76_spill] sm:$0xff] %v4118_v25  ;;  %1464 = vmatprep.subr.mxu0 %v546_v47 }
 0x12b   : > { %5398 = vst [vmem:[#allocation77_spill] sm:$0xff] %v4122_v15  ;;  %v604_v60 = vsel %vm603_vm9, %v600_v5, %v3975_v0  ;;  %v605_v27 = vsel %vm603_vm9, %v3934_v24, %v600_v5  ;;  %v523_v34 = vsel %vm519_vm11, %v4113_v48, %v512_v54 }
 0x12c   : > { %v631_v47 = vmul.f32 %v4087_v52, %v605_v27  ;;  %v632_v4 = vmul.f32 %v4091_v59, %v604_v60  ;;  %v4144_v38 = vmul.f32 %v4099_v55, %v605_v27  ;;  %v4147_v0 = vmul.f32 %v4103_v51, %v604_v60 }
 0x12d   : > { %v545_v24 = vmul.f32 %v4107_v41, %v523_v34  ;;  %v4151_v5 = vmul.f32 %v4111_v17, %v523_v34  ;;  %v4157_v52 = vrot.slane %v3938_v23, %v3614_v21  ;;  %v4161_v27 = vmul.f32 %v4126_v26, %v3612_v18 }
 0x12e   : > { %635 = vst [vmem:[#allocation2 + $0x8] sm:$0xff] %v631_v47  ;;  %636 = vst [vmem:[#allocation2 + $0x120] sm:$0xff] %v632_v4  ;;  %v470_v54 = vpop.permute.xlu0 %469  ;;  %v4153_v46 = vpop.permute.xlu1 %471  ;;  %1531 = vmatprep.subr.mxu1 %v632_v4  ;;  %v4168_v60 = vrot.slane %v3938_v23, %v3616_v22  ;;  %v4172_v17 = vmul.f32 %v4139_v63, %v3612_v18  ;;  %v4180_v51 = vrot.slane %v3953_v28, %v3596_v11 }
 0x12f   : > { %5399 = vst [vmem:[#allocation78_spill] sm:$0xff] %v4157_v52  ;;  %549 = vst [vmem:[#allocation2 + $0x2c0] sm:$0xff] %v545_v24  ;;  %v480_v34 = vsel %vm477_vm12, %v470_v54, %v4153_v46  ;;  %1465 = vmatpush1.msra.mxu0 %v545_v24  ;;  %1532 = vmatpush1.msra.mxu1 %v631_v47  ;;  %v4184_v59 = vrot.slane %v3953_v28, %v3614_v21 }
 0x130   : > { %5400 = vst [vmem:[#allocation79_spill] sm:$0xff] %v4168_v60  ;;  %v504_v4 = vmul.f32 %v4118_v25, %v480_v34  ;;  %v4176_v41 = vmul.f32 %v4122_v15, %v480_v34  ;;  %5401 = vst [vmem:[#allocation80_spill] sm:$0xff] %v4180_v51  ;;  %v4188_v23 = vrot.slane %v4076_v57, %v3590_v10 }
 0x131   : > { %5402 = vst [vmem:[#allocation81_spill] sm:$0xff] %v4184_v59  ;;  %v4192_v47 = vrot.slane %v4080_v56, %v3616_v22  ;;  %v4199_v55 = vrot.slane %v4161_v27, %v3596_v11  ;;  %v4212_v15 = vrot.slane %v4172_v17, %v3590_v10 }
 0x132   : > { %5403 = vst [vmem:[#allocation82_spill] sm:$0xff] %v4188_v23  ;;  %508 = vst [vmem:[#allocation2 + $0x2c8] sm:$0xff] %v504_v4  ;;  %v558_v24 = vpop.permute.xlu0 %557  ;;  %v4194_v34 = vpop.permute.xlu1 %475  ;;  %1466 = vmatprep.subr.mxu0 %v504_v4 }
 0x133   : > { %5404 = vst [vmem:[#allocation83_spill] sm:$0xff] %v4192_v47  ;;  %5405 = vst [vmem:[#allocation84_spill] sm:$0xff] %v4199_v55  ;;  %v562_v28 = vsel %vm561_vm10, %v558_v24, %v4040_v19  ;;  %v563_v8 = vsel %vm561_vm10, %v4007_v39, %v558_v24  ;;  %v481_v16 = vsel %vm477_vm12, %v4194_v34, %v470_v54 }
 0x134   : > { %5406 = vst [vmem:[#allocation85_spill] sm:$0xff] %v4212_v15  ;;  %v589_v25 = vmul.f32 %v4157_v52, %v563_v8  ;;  %v590_v4 = vmul.f32 %v4168_v60, %v562_v28  ;;  %v4217_v3 = vmul.f32 %v4180_v51, %v563_v8  ;;  %v4220_v19 = vmul.f32 %v4184_v59, %v562_v28 }
 0x135   : > { %v503_v39 = vmul.f32 %v4188_v23, %v481_v16  ;;  %v4224_v24 = vmul.f32 %v4192_v47, %v481_v16  ;;  %v4233_v28 = vrot.slane %v3751_v33, %v3614_v21  ;;  %v4237_v23 = vrot.slane %v3751_v33, %v3616_v22 }
 0x136   : > { %593 = vst [vmem:[#allocation2 + $0x340] sm:$0xff] %v589_v25  ;;  %594 = vst [vmem:[#allocation2 + $0x110] sm:$0xff] %v590_v4  ;;  %v428_v54 = vpop.permute.xlu0 %427  ;;  %v4226_v20 = vpop.permute.xlu1 %429  ;;  %1533 = vmatprep.subr.mxu1 %v590_v4  ;;  %v4245_v4 = vrot.slane %v3753_v35, %v3596_v11  ;;  %v4249_v59 = vrot.slane %v3753_v35, %v3614_v21  ;;  %v4253_v60 = vrot.slane %v4161_v27, %v3590_v10 }
 0x137   : > { %507 = vst [vmem:[#allocation2 + $0x18] sm:$0xff] %v503_v39  ;;  %v438_v8 = vsel %vm435_vm13, %v428_v54, %v4226_v20  ;;  %5407 = vst [vmem:[#allocation86_spill] sm:$0xff] %v4233_v28  ;;  %1467 = vmatpush1.msra.mxu0 %v503_v39  ;;  %1534 = vmatpush1.msra.mxu1 %v589_v25  ;;  %v4257_v33 = vrot.slane %v4172_v17, %v3616_v22 }
 0x138   : > { %5408 = vst [vmem:[#allocation87_spill] sm:$0xff] %v4237_v23  ;;  %v462_v16 = vmul.f32 %v4199_v55, %v438_v8  ;;  %v4241_v47 = vmul.f32 %v4212_v15, %v438_v8  ;;  %5409 = vst [vmem:[#allocation88_spill] sm:$0xff] %v4245_v4  ;;  %v4264_v8 = vrot.slane %v4126_v26, %v3596_v11 }
 0x139   : > { %5410 = vst [vmem:[#allocation89_spill] sm:$0xff] %v4249_v59  ;;  %5411 = vst [vmem:[#allocation90_spill] sm:$0xff] %v4253_v60  ;;  %v4277_v51 = vrot.slane %v4139_v63, %v3590_v10 }
 0x13a   : > { %5412 = vst [vmem:[#allocation91_spill] sm:$0xff] %v4257_v33  ;;  %466 = vst [vmem:[#allocation2 + $0x308] sm:$0xff] %v462_v16  ;;  %v516_v25 = vpop.permute.xlu0 %515  ;;  %v4259_v39 = vpop.permute.xlu1 %433  ;;  %1468 = vmatprep.subr.mxu0 %v462_v16 }
 0x13b   : > { %5413 = vst [vmem:[#allocation92_spill] sm:$0xff] %v4264_v8  ;;  %v520_v35 = vsel %vm519_vm11, %v516_v25, %v4113_v48  ;;  %v521_v15 = vsel %vm519_vm11, %v4072_v30, %v516_v25  ;;  %v439_v55 = vsel %vm435_vm13, %v4259_v39, %v428_v54  ;;  %5414 = vst [vmem:[#allocation93_spill] sm:$0xff] %v4277_v51 }
 0x13c   : > { %v547_v52 = vmul.f32 %v4233_v28, %v521_v15  ;;  %v548_v16 = vmul.f32 %v4237_v23, %v520_v35  ;;  %v4282_v62 = vmul.f32 %v4245_v4, %v521_v15  ;;  %v4285_v48 = vmul.f32 %v4249_v59, %v520_v35 }
 0x13d   : > { %v461_v30 = vmul.f32 %v4253_v60, %v439_v55  ;;  %v4289_v25 = vmul.f32 %v4257_v33, %v439_v55  ;;  %v4295_v28 = vrot.slane %v4076_v57, %v3614_v21  ;;  %v322_v15 = vmul.f32 %v4126_v26, %v3580_v7 }
 0x13e   : > { %551 = vst [vmem:[#allocation2 + $0x198] sm:$0xff] %v547_v52  ;;  %552 = vst [vmem:[#allocation2 + $0x148] sm:$0xff] %v548_v16  ;;  %v386_v54 = vpop.permute.xlu0 %385  ;;  %v4291_v2 = vpop.permute.xlu1 %387  ;;  %1535 = vmatprep.subr.mxu1 %v548_v16  ;;  %v4304_v55 = vrot.slane %v4076_v57, %v3616_v22  ;;  %v4308_v33 = vmul.f32 %v4139_v63, %v3580_v7  ;;  %v4316_v59 = vrot.slane %v4080_v56, %v3596_v11 }
 0x13f   : > { %5415 = vst [vmem:[#allocation94_spill] sm:$0xff] %v4295_v28  ;;  %465 = vst [vmem:[#allocation2 + $0x80] sm:$0xff] %v461_v30  ;;  %v396_v35 = vsel %vm393_vm14, %v386_v54, %v4291_v2  ;;  %1469 = vmatpush1.msra.mxu0 %v461_v30  ;;  %1536 = vmatpush1.msra.mxu1 %v547_v52  ;;  %v4320_v23 = vrot.slane %v4080_v56, %v3614_v21 }
 0x140   : > { %5416 = vst [vmem:[#allocation95_spill] sm:$0xff] %v4304_v55  ;;  %v420_v16 = vmul.f32 %v4264_v8, %v396_v35  ;;  %v4312_v60 = vmul.f32 %v4277_v51, %v396_v35  ;;  %5417 = vst [vmem:[#allocation96_spill] sm:$0xff] %v4316_v59  ;;  %v4324_v57 = vrot.slane %v4126_v26, %v3590_v10 }
 0x141   : > { %5418 = vst [vmem:[#allocation97_spill] sm:$0xff] %v4320_v23  ;;  %v4328_v7 = vrot.slane %v4139_v63, %v3616_v22  ;;  %v4332_v35 = vrot.slane %v322_v15, %v3596_v11  ;;  %v4344_v8 = vrot.slane %v4308_v33, %v3590_v10  ;;  %v4419_v32 = vrot.slane %v322_v15, %v3616_v22 }
 0x142   : > { %5419 = vst [vmem:[#allocation98_spill] sm:$0xff] %v4324_v57  ;;  %424 = vst [vmem:[#allocation2 + $0x38] sm:$0xff] %v420_v16  ;;  %v474_v52 = vpop.permute.xlu0 %473  ;;  %v392_v30 = vpop.permute.xlu1 %391  ;;  %1470 = vmatprep.subr.mxu0 %v420_v16 }
 0x143   : > { %5420 = vst [vmem:[#allocation99_spill] sm:$0xff] %v4328_v7  ;;  %5421 = vst [vmem:[#allocation100_spill] sm:$0xff] %v4332_v35  ;;  %v478_v56 = vsel %vm477_vm12, %v474_v52, %v4194_v34  ;;  %v479_v4 = vsel %vm477_vm12, %v4153_v46, %v474_v52  ;;  %v397_v51 = vsel %vm393_vm14, %v392_v30, %v386_v54 }
 0x144   : > { %5422 = vst [vmem:[#allocation101_spill] sm:$0xff] %v4344_v8  ;;  %v505_v14 = vmul.f32 %v4295_v28, %v479_v4  ;;  %v506_v49 = vmul.f32 %v4304_v55, %v478_v56  ;;  %v4349_v16 = vmul.f32 %v4316_v59, %v479_v4  ;;  %v4352_v34 = vmul.f32 %v4320_v23, %v478_v56 }
 0x145   : > { %v419_v45 = vmul.f32 %v4324_v57, %v397_v51  ;;  %v4356_v46 = vmul.f32 %v4328_v7, %v397_v51  ;;  %v4362_v4 = vrot.slane %v4161_v27, %v3614_v21  ;;  %v4366_v56 = vrot.slane %v4161_v27, %v3616_v22 }
 0x146   : > { %509 = vst [vmem:[#allocation2 + $0x318] sm:$0xff] %v505_v14  ;;  %510 = vst [vmem:[#allocation2 + $0x20] sm:$0xff] %v506_v49  ;;  %v342_v54 = vpop.permute.xlu0 %341  ;;  %v344_v52 = vpop.permute.xlu1 %343  ;;  %1537 = vmatprep.subr.mxu1 %v506_v49  ;;  %v4374_v49 = vrot.slane %v4172_v17, %v3596_v11  ;;  %v4378_v57 = vrot.slane %v4172_v17, %v3614_v21  ;;  %v4381_v23 = vrot.slane %v322_v15, %v3590_v10 }
 0x147   : > { %423 = vst [vmem:[#allocation2 + $0x320] sm:$0xff] %v419_v45  ;;  %v354_v55 = vsel %vm351_vm15, %v342_v54, %v344_v52  ;;  %5423 = vst [vmem:[#allocation102_spill] sm:$0xff] %v4366_v56  ;;  %1471 = vmatpush1.msra.mxu0 %v419_v45  ;;  %1538 = vmatpush1.msra.mxu1 %v505_v14  ;;  %v4385_v45 = vrot.slane %v4308_v33, %v3616_v22 }
 0x148   : > { %v378_v51 = vmul.f32 %v4332_v35, %v354_v55  ;;  %v4370_v7 = vmul.f32 %v4344_v8, %v354_v55  ;;  %5424 = vst [vmem:[#allocation103_spill] sm:$0xff] %v4378_v57  ;;  %5425 = vst [vmem:[#allocation104_spill] sm:$0xff] %v4381_v23  ;;  %v4389_v14 = vrot.slane %v4126_v26, %v3614_v21 }
 0x149   : > { %5426 = vst [vmem:[#allocation105_spill] sm:$0xff] %v4385_v45  ;;  %v4393_v27 = vrot.slane %v4126_v26, %v3616_v22  ;;  %v4397_v17 = vrot.slane %v4139_v63, %v3596_v11  ;;  %v4401_v35 = vrot.slane %v4139_v63, %v3614_v21  ;;  %v4404_v59 = vrot.slane %v322_v15, %v3614_v21 }
 0x14a   : > { %382 = vst [vmem:[#allocation2 + $0xd0] sm:$0xff] %v378_v51  ;;  %v432_v55 = vpop.permute.xlu0 %431  ;;  %v348_v8 = vpop.permute.xlu1 %347  ;;  %1472 = vmatprep.subr.mxu0 %v378_v51  ;;  %v4408_v28 = vmul.f32 %v3612_v18, %v3578_v6  ;;  %v4439_v15 = vrot.slane %v4308_v33, %v3614_v21 }
 0x14b   : > { %v436_v26 = vsel %vm435_vm13, %v432_v55, %v4259_v39  ;;  %v437_v43 = vsel %vm435_vm13, %v4226_v20, %v432_v55  ;;  %v355_v63 = vsel %vm351_vm15, %v348_v8, %v342_v54  ;;  %v4435_v54 = vrot.slane %v4308_v33, %v3596_v11 }
 0x14c   : > { %v463_v51 = vmul.f32 %v4362_v4, %v437_v43  ;;  %v464_v61 = vmul.f32 %v4366_v56, %v436_v26  ;;  %v4424_v6 = vmul.f32 %v4374_v49, %v437_v43  ;;  %v4427_v18 = vmul.f32 %v4378_v57, %v436_v26 }
 0x14d   : > { %v377_v39 = vmul.f32 %v4381_v23, %v355_v63  ;;  %v4431_v20 = vmul.f32 %v4385_v45, %v355_v63  ;;  %v4444_v26 = vrot.slane %v4408_v28, %v3596_v11 }
 0x14e   : > { %467 = vst [vmem:[#allocation2 + $0x138] sm:$0xff] %v463_v51  ;;  %468 = vst [vmem:[#allocation2 + $0xf0] sm:$0xff] %v464_v61  ;;  %v390_v43 = vpop.permute.xlu0 %389  ;;  %v346_v55 = vpop.permute.xlu1 %345  ;;  %1539 = vmatprep.subr.mxu1 %v464_v61 }
 0x14f   : > { %381 = vst [vmem:[#allocation2 + $0x2b0] sm:$0xff] %v377_v39  ;;  %v394_v63 = vsel %vm393_vm14, %v390_v43, %v392_v30  ;;  %v395_v33 = vsel %vm393_vm14, %v4291_v2, %v390_v43  ;;  %v352_v57 = vsel %vm351_vm15, %v346_v55, %v348_v8  ;;  %v353_v56 = vsel %vm351_vm15, %v344_v52, %v346_v55 }
 0x150   : > { %1473 = vmatpush1.msra.mxu0 %v377_v39  ;;  %v421_v45 = vmul.f32 %v4389_v14, %v395_v33  ;;  %v422_v23 = vmul.f32 %v4393_v27, %v394_v63  ;;  %v4458_v61 = vmul.f32 %v4397_v17, %v395_v33  ;;  %v4461_v30 = vmul.f32 %v4401_v35, %v394_v63 }
 0x151   : > { %1484 = vmatprep.subr.mxu0 %v3998_v31  ;;  %v379_v2 = vmul.f32 %v4404_v59, %v353_v56  ;;  %v380_v8 = vmul.f32 %v4419_v32, %v352_v57  ;;  %v4467_v43 = vmul.f32 %v4435_v54, %v353_v56  ;;  %v4470_v52 = vmul.f32 %v4439_v15, %v352_v57 }
 0x152   : > { %1540 = vmatpush1.msra.mxu1 %v463_v51  ;;  %425 = vst [vmem:[#allocation2 + $0xf8] sm:$0xff] %v421_v45  ;;  %426 = vst [vmem:[#allocation2 + $0x100] sm:$0xff] %v422_v23  ;;  %v1022_v39 = vpop.permute.xlu0 %1021  ;;  %v1024_v55 = vpop.permute.xlu1 %1023  ;;  %1485 = vmatpush2.msra.mxu0 %v3840_v50  ;;  %v4479_v57 = vrot.slane %v4408_v28, %v3590_v10 }
 0x153   : > { %1541 = vmatprep.subr.mxu1 %v422_v23  ;;  %383 = vst [vmem:[#allocation2 + $0x10] sm:$0xff] %v379_v2  ;;  %384 = vst [vmem:[#allocation2 + $0x48] sm:$0xff] %v380_v8  ;;  %v1029_v31 = vsel %vm1027_vm2, %v1022_v39, %v1024_v55  ;;  %1486 = vmatprep.subr.mxu0 %v4063_v12 }
 0x154   : > { %1542 = vmatpush1.msra.mxu1 %v421_v45  ;;  %v1054_v56 = vmul.f32 %v4444_v26, %v1029_v31  ;;  %1487 = vmatpush2.msra.mxu0 %v3898_v40  ;;  %v3061_v40 = vld [vmem:[#allocation6 + $0x3] ss:$8 sm:$0xf] }
 0x155   : > { %1543 = vmatprep.subr.mxu1 %v380_v8  ;;  %1488 = vmatprep.subr.mxu0 %v4144_v38  ;;  %v4492_v38 = vrot.slane %v3061_v40, %v3596_v11  ;;  %v4495_v51 = vrot.slane %v3061_v40, %v3590_v10  ;;  %v4507_v11 = vrot.slane %v4408_v28, %v3616_v22 }
 0x156   : > { %1544 = vmatpush1.msra.mxu1 %v379_v2  ;;  %v1020_v50 = vpop.permute.xlu0 %1019  ;;  %v980_v23 = vpop.permute.xlu1 %979  ;;  %1489 = vmatpush2.msra.mxu0 %v3957_v29  ;;  %v4503_v29 = vrot.slane %v4408_v28, %v3614_v21 }
 0x157   : > { %1555 = vmatprep.subr.mxu1 %v3873_v37  ;;  %v1030_v12 = vsel %vm1027_vm2, %v1020_v50, %v1022_v39  ;;  %1490 = vmatprep.subr.mxu0 %v4217_v3 }
 0x158   : > { %1556 = vmatpush2.msra.mxu1 %v4001_v58  ;;  %v1053_v45 = vmul.f32 %v4479_v57, %v1030_v12  ;;  %1491 = vmatpush2.msra.mxu0 %v4022_v53  ;;  %v4516_v53 = vrot.slane %v3061_v40, %v3614_v21 }
 0x159   : > { %1557 = vmatprep.subr.mxu1 %v3932_v13  ;;  %1492 = vmatprep.subr.mxu0 %v4282_v62 }
 0x15a   : > { %1558 = vmatpush2.msra.mxu1 %v4066_v1  ;;  %v982_v3 = vpop.permute.xlu0 %981  ;;  %v978_v37 = vpop.permute.xlu1 %977  ;;  %1493 = vmatpush2.msra.mxu0 %v4095_v42  ;;  %v4523_v42 = vrot.slane %v3061_v40, %v3616_v22  ;;  %v3265_v40 = vmov 1  }
 0x15b   : > { %1559 = vmatprep.subr.mxu1 %v4005_v36  ;;  %v987_v10 = vsel %vm985_vm5, %v980_v23, %v982_v3  ;;  %v988_v62 = vsel %vm985_vm5, %v978_v37, %v980_v23  ;;  %1494 = vmatprep.subr.mxu0 %v4349_v16 }
 0x15c   : > { %1560 = vmatpush2.msra.mxu1 %v4147_v0  ;;  %v1012_v13 = vmul.f32 %v4492_v38, %v987_v10  ;;  %v1011_v58 = vmul.f32 %v4495_v51, %v988_v62  ;;  %1495 = vmatpush2.msra.mxu0 %v4176_v41 }
 0x15d   : > { %1561 = vmatprep.subr.mxu1 %v4070_v44  ;;  %1496 = vmatprep.subr.mxu0 %v4424_v6 }
 0x15e   : > { %1562 = vmatpush2.msra.mxu1 %v4220_v19  ;;  %v1026_v21 = vpop.permute.xlu0 %1025  ;;  %v984_v36 = vpop.permute.xlu1 %983  ;;  %1497 = vmatpush2.msra.mxu0 %v4241_v47 }
 0x15f   : > { %1563 = vmatprep.subr.mxu1 %v4151_v5  ;;  %v1028_v1 = vsel %vm1027_vm2, %v1024_v55, %v1026_v21  ;;  %v1031_v22 = vsel %vm1027_vm2, %v1026_v21, %v1020_v50  ;;  %v986_v41 = vsel %vm985_vm5, %v982_v3, %v984_v36  ;;  %v989_v44 = vsel %vm985_vm5, %v984_v36, %v978_v37  ;;  %v1584_v3 = vld [vmem:[%s5200_s5] sm:$0xf] }
 0x160   : > { %1498 = vmatprep.subr.mxu0 %v4458_v61  ;;  %v1055_v0 = vmul.f32 %v4503_v29, %v1028_v1  ;;  %v1056_v47 = vmul.f32 %v4507_v11, %v1031_v22  ;;  %v1013_v5 = vmul.f32 %v4516_v53, %v986_v41  ;;  %v1014_v19 = vmul.f32 %v4523_v42, %v989_v44 }
 0x161   : > { %1499 = vmatpush2.msra.mxu0 %v4312_v60  ;;  %1564 = vmatpush2.msra.mxu1 %v4285_v48  ;;  %v3062_v60 = vld [vmem:[#allocation8] sm:$0xff]  ;;  %v3266_v37 = vmov 2  }
 0x162   : > { %1500 = vmatprep.subr.mxu0 %v4467_v43  ;;  %1565 = vmatprep.subr.mxu1 %v4224_v24 }
 0x163   : > { %1501 = vmatpush2.msra.mxu0 %v4370_v7  ;;  %1566 = vmatpush2.msra.mxu1 %v4352_v34 }
 0x164   : > { %1502 = vmatprep.subr.mxu0 %v1054_v56  ;;  %1567 = vmatprep.subr.mxu1 %v4289_v25 }
 0x165   : > { %1503 = vmatpush2.msra.mxu0 %v1053_v45  ;;  %1568 = vmatpush2.msra.mxu1 %v4427_v18 }
 0x166   : > { %1504 = vmatprep.subr.mxu0 %v1012_v13  ;;  %1569 = vmatprep.subr.mxu1 %v4356_v46 }
 0x167   : > { %1505 = vmatpush2.msra.mxu0 %v1011_v58  ;;  %1570 = vmatpush2.msra.mxu1 %v4461_v30 }
 0x168   : > { %1507 = vmatmul.mubr.f32.vlgmr.msra.gmra.mxu0 %v3062_v60  ;;  %1571 = vmatprep.subr.mxu1 %v4431_v20 }
 0x169   : > { %1572 = vmatpush2.msra.mxu1 %v4470_v52  ;;  %3017 = vset.pattern.permute.xlu1 %v3265_v40 }
 0x16a   : > { %1573 = vmatprep.subr.mxu1 %v1056_v47  ;;  %3018 = vset.pattern.permute.xlu0 %v3266_v37 }
 0x16b   : > { %1574 = vmatpush2.msra.mxu1 %v1055_v0  ;;  %v1435_v24 = vpop.permute.xlu0 %1434 }
 0x16c   : > { %1575 = vmatprep.subr.mxu1 %v1014_v19 }
 0x16d   : > { %1576 = vmatpush2.msra.mxu1 %v1013_v5 }
 0x16e   : > { %1578 = vmatmul.mubr.f32.vlgmr.msra.gmra.mxu1 %v3062_v60 }
 0x228   : > { %v1508_v28 = vpop.f32.mrf.mxu0 }
 0x229   : > { %v4556_v48 = vadd.f32 %v1508_v28, %v1435_v24 }
 0x22a   : > { %v1510_v25 = vpop.f32.mrf.mxu0 }
 0x22b   : > { %v4558_v7 = vadd.f32 %v1510_v25, %v1435_v24  ;;  %v1602_v16 = vmul.f32 %v4556_v48, %v4556_v48  ;;  %v1586_v6 = vsel %vm1585_vm3, %v4556_v48, 0.0 }
 0x22d   : > { %v1603_v34 = vmul.f32 %v4558_v7, %v4558_v7  ;;  %v1587_v46 = vsel %vm1585_vm3, %v4558_v7, 0.0  ;;  %v1606_v63 = vsel %vm1585_vm3, %v1602_v16, 0.0 }
 0x22e   : > { %v1579_v18 = vpop.f32.mrf.mxu1  ;;  %v1588_v30 = vadd.f32 %v1587_v46, %v1586_v6 }
 0x22f   : > { %v4568_v20 = vadd.f32 %v1579_v18, %v1435_v24  ;;  %v1607_v33 = vsel %vm1585_vm3, %v1603_v34, 0.0 }
 0x230   : > { %v1581_v61 = vpop.f32.mrf.mxu1  ;;  %v1608_v39 = vadd.f32 %v1607_v33, %v1606_v63 }
 0x231   : > { %v1604_v2 = vmul.f32 %v4568_v20, %v4568_v20  ;;  %v1582_v8 = vadd.f32 %v1581_v61, %v1435_v24  ;;  %v1589_v43 = vsel %vm1585_vm3, %v4568_v20, 0.0 }
 0x232   : > { %v1590_v52 = vadd.f32 %v1589_v43, %v1588_v30 }
 0x233   : > { %v1591_v55 = vsel %vm1585_vm3, %v1582_v8, 0.0  ;;  %v1605_v31 = vmul.f32 %v1582_v8, %v1582_v8  ;;  %v1609_v56 = vsel %vm1585_vm3, %v1604_v2, 0.0 }
 0x234   : > { %v1592_v50 = vadd.f32 %v1591_v55, %v1590_v52  ;;  %v1610_v23 = vadd.f32 %v1609_v56, %v1608_v39 }
 0x235   : > { %v1611_v12 = vsel %vm1585_vm3, %v1605_v31, 0.0 }
 0x236   : > { %1593 = vadd.xlane.f32.xlu1 %v1592_v50  ;;  %v1612_v45 = vadd.f32 %v1611_v12, %v1610_v23 }
 0x238   : > { %1613 = vadd.xlane.f32.xlu0 %v1612_v45 }
 0x247   : > { %1647 = vperm.xlu1 %3017, %v1584_v3  }
 0x24e   : > { %1655 = vperm.xlu0 %3018, %v1584_v3  }
 0x2bf   : > { %v1594_v10 = vpop.xlane.xlu1 %1593 }
 0x2c0   : > { %v1595_v62 = vrot.slane %v1594_v10, 4 }
 0x2c1   : > { %v1614_v13 = vpop.xlane.xlu0 %1613 }
 0x2c2   : > { %v1596_v58 = vadd.f32 %v1595_v62, %v1594_v10  ;;  %v1615_v21 = vrot.slane %v1614_v13, 4 }
 0x2c3   : > { %v1648_v18 = vpop.permute.xlu1 %1647 }
 0x2c4   : > { %v1597_v36 = vrot.slane %v1596_v58, 2  ;;  %v1616_v1 = vadd.f32 %v1615_v21, %v1614_v13 }
 0x2c6   : > { %v1617_v22 = vrot.slane %v1616_v1, 2  ;;  %v1598_v41 = vadd.f32 %v1597_v36, %v1596_v58 }
 0x2c8   : > { %v1599_v44 = vrot.slane %v1598_v41, 1  ;;  %v1618_v0 = vadd.f32 %v1617_v22, %v1616_v1 }
 0x2c9   : > { %v1656_v2 = vpop.permute.xlu0 %1655 }
 0x2ca   : > { %v1600_v47 = vadd.f32 %v1599_v44, %v1598_v41  ;;  %v1619_v5 = vrot.slane %v1618_v0, 1 }
 0x2cc   : > { %2901 = vpush %v1600_v47  ;;  %v1620_v19 = vadd.f32 %v1619_v5, %v1618_v0 }
 0x2ce   : > { %2903 = vpush %v1620_v19 }
 0x2fd   : > { %s2902_s29 = spop %2901 }
 0x2fe   : > { %s1624_s16 = smul.f32 0.00048828125, %s2902_s29 }
 0x2ff   : > { %s2904_s27 = spop %2903 }
 0x300   : > { %s1628_s19 = smul.f32 %s1624_s16, %s1624_s16  ;;  %v1635_v28 = vstv %s1624_s16 }
 0x301   : > { %s1627_s1 = smul.f32 0.00048828125, %s2904_s27  ;;  %v1636_v25 = vsub.f32 %v4556_v48, %v1635_v28  ;;  %v1637_v16 = vsub.f32 %v4558_v7, %v1635_v28  ;;  %v1638_v34 = vsub.f32 %v4568_v20, %v1635_v28  ;;  %v1639_v46 = vsub.f32 %v1582_v8, %v1635_v28  ;;  %s5428_s27 = smov 72  }
 0x303   : > { %s1629_s18 = ssub.f32 %s1627_s1, %s1628_s19  ;;  %s5427_s1 = smov 64  }
 0x304   : > { %s5430_s19 = smov 73  }
 0x305   : > { %s1630_s7 = smax.f32 %s3267_s13, %s1629_s18  ;;  %s5429_s18 = smov 71  }
 0x306   : > { %s1631_s8 = sadd.f32 1e-05, %s1630_s7  ;;  %s5437_s7 = smov 9  }
 0x308   : > { %v1632_v60 = vstv %s1631_s8  ;;  %s5438_s8 = smov 8  }
 0x309   : > { %3025 = vrsqrt.f32 %v1632_v60 }
 0x316   : > { %v3026_v24 = vpop.eup %3025 }
 0x317   : > { %2905 = vpush %v3026_v24 }
 0x348   : > { %s2906_s11 = spop %2905 }
 0x349   : > { %v1640_v6 = vstv %s2906_s11  ;;  %s5433_s11 = smov 120  }
 0x34a   : > { %v1641_v63 = vmul.f32 %v1640_v6, %v1636_v25  ;;  %v1642_v33 = vmul.f32 %v1640_v6, %v1637_v16  ;;  %v1643_v61 = vmul.f32 %v1640_v6, %v1638_v34  ;;  %v1644_v30 = vmul.f32 %v1640_v6, %v1639_v46 }
 0x34c   : > { %v1650_v43 = vmul.f32 %v1648_v18, %v1641_v63  ;;  %v1651_v52 = vmul.f32 %v1648_v18, %v1642_v33  ;;  %v1652_v39 = vmul.f32 %v1648_v18, %v1643_v61  ;;  %v1653_v55 = vmul.f32 %v1648_v18, %v1644_v30  ;;  %v5439_v33 = vld [vmem:[#allocation62_spill] sm:$0xff]  ;;  %v5440_v30 = vld [vmem:[#allocation64_spill] sm:$0xff] }
 0x34e   : > { %v1658_v31 = vadd.f32 %v1656_v2, %v1650_v43  ;;  %v1659_v56 = vadd.f32 %v1656_v2, %v1651_v52  ;;  %v1660_v50 = vadd.f32 %v1656_v2, %v1652_v39  ;;  %v1661_v48 = vadd.f32 %v1656_v2, %v1653_v55 }
 0x350   : > { %v1662_v23 = vsub.f32 0.0, %v1658_v31  ;;  %v1663_v7 = vsub.f32 0.0, %v1659_v56  ;;  %v1664_v12 = vsub.f32 0.0, %v1660_v50  ;;  %v1665_v20 = vsub.f32 0.0, %v1661_v48 }
 0x352   : > { %v1666_v8 = vmul.f32 1.442695, %v1662_v23  ;;  %v1668_v45 = vmul.f32 1.442695, %v1663_v7  ;;  %v1670_v40 = vmul.f32 1.442695, %v1664_v12 }
 0x353   : > { %v1672_v3 = vmul.f32 1.442695, %v1665_v20  ;;  %v5442_v7 = vld [vmem:[#allocation56_spill] sm:$0xff] }
 0x354   : > { %3027 = vpow2.f32 %v1666_v8 }
 0x355   : > { %3029 = vpow2.f32 %v1668_v45 }
 0x356   : > { %3031 = vpow2.f32 %v1670_v40 }
 0x357   : > { %3033 = vpow2.f32 %v1672_v3 }
 0x361   : > { %v3028_v37 = vpop.eup %3027 }
 0x362   : > { %v3030_v10 = vpop.eup %3029  ;;  %v1674_v62 = vadd.f32 1.0, %v3028_v37  ;;  %v5443_v37 = vld [vmem:[#allocation63_spill] sm:$0xff] }
 0x363   : > { %v3032_v13 = vpop.eup %3031  ;;  %v1675_v58 = vadd.f32 1.0, %v3030_v10 }
 0x364   : > { %v3034_v21 = vpop.eup %3033  ;;  %v1676_v36 = vadd.f32 1.0, %v3032_v13  ;;  %3035 = vrcp.f32 %v1674_v62  ;;  %v5444_v62 = vld [vmem:[#allocation65_spill] sm:$0xff] }
 0x365   : > { %v1677_v1 = vadd.f32 1.0, %v3034_v21  ;;  %3037 = vrcp.f32 %v1675_v58  ;;  %v5445_v58 = vld [vmem:[#allocation50_spill] sm:$0xff] }
 0x366   : > { %3039 = vrcp.f32 %v1676_v36  ;;  %v5446_v36 = vld [vmem:[#allocation46_spill] sm:$0xff] }
 0x367   : > { %3041 = vrcp.f32 %v1677_v1 }
 0x371   : > { %v3036_v22 = vpop.eup %3035 }
 0x372   : > { %v3038_v41 = vpop.eup %3037  ;;  %v4586_v44 = vmul.f32 %v3036_v22, %v1658_v31  ;;  %v5447_v22 = vld [vmem:[#allocation47_spill] sm:$0xff] }
 0x373   : > { %v3040_v0 = vpop.eup %3039  ;;  %v4588_v47 = vmul.f32 %v3038_v41, %v1659_v56 }
 0x374   : > { %v3042_v5 = vpop.eup %3041  ;;  %v4590_v19 = vmul.f32 %v3040_v0, %v1660_v50  ;;  %v2026_v60 = vrot.slane %v4586_v44, 4  ;;  %v5448_v0 = vld [vmem:[#allocation51_spill] sm:$0xff] }
 0x375   : > { %v4593_v24 = vmul.f32 %v3042_v5, %v1661_v48  ;;  %1848 = vrot.lane.b32.xlu0 %v4588_v47, %s3255_s12  ;;  %1868 = vrot.lane.b32.xlu1 %v4588_v47, %s3254_s14  ;;  %v2027_v28 = vrot.slane %v4588_v47, 4  ;;  %v5441_v48 = vld [vmem:[#allocation54_spill] sm:$0xff] }
 0x376   : > { %2034 = vst [vmem:[#allocation2 + $0x190] sm:$0xf0] %v2026_v60  ;;  %v2028_v25 = vrot.slane %v4590_v19, 4 }
 0x377   : > { %2035 = vst [vmem:[#allocation2 + $0x250] sm:$0xf0] %v2027_v28  ;;  %v2029_v16 = vrot.slane %v4593_v24, 4 }
 0x378   : > { %2036 = vst [vmem:[#allocation2 + $0x8] sm:$0xf0] %v2028_v25 }
 0x379   : > { %1870 = vrot.lane.b32.xlu1 %v4590_v19, %s3254_s14  ;;  %1814 = vrot.lane.b32.xlu0 %v4586_v44, %s3256_s15  ;;  %2037 = vst [vmem:[#allocation2 + $0x120] sm:$0xf0] %v2029_v16 }
 0x37d   : > { %1900 = vrot.lane.b32.xlu1 %v4588_v47, %s3253_s20  ;;  %1764 = vrot.lane.b32.xlu0 %v4588_v47, %s3258_s17 }
 0x381   : > { %1902 = vrot.lane.b32.xlu1 %v4590_v19, %s3253_s20  ;;  %1796 = vrot.lane.b32.xlu0 %v4588_v47, %s5427_s1 }
 0x385   : > { %1872 = vrot.lane.b32.xlu0 %v4593_v24, %s3254_s14  ;;  %1866 = vrot.lane.b32.xlu1 %v4586_v44, %s3254_s14  ;;  %s5431_s14 = smov 119  }
 0x389   : > { %1762 = vrot.lane.b32.xlu0 %v4586_v44, %s3258_s17  ;;  %1898 = vrot.lane.b32.xlu1 %v4586_v44, %s3253_s20 }
 0x38d   : > { %1712 = vrot.lane.b32.xlu0 %v4588_v47, %s5428_s27  ;;  %1816 = vrot.lane.b32.xlu1 %v4588_v47, %s3256_s15 }
 0x391   : > { %1744 = vrot.lane.b32.xlu0 %v4588_v47, %s5429_s18  ;;  %1818 = vrot.lane.b32.xlu1 %v4590_v19, %s3256_s15 }
 0x395   : > { %1820 = vrot.lane.b32.xlu0 %v4593_v24, %s3256_s15  ;;  %1850 = vrot.lane.b32.xlu1 %v4590_v19, %s3255_s12  ;;  %s5432_s15 = smov 121  }
 0x399   : > { %1710 = vrot.lane.b32.xlu0 %v4586_v44, %s5428_s27  ;;  %1846 = vrot.lane.b32.xlu1 %v4586_v44, %s3255_s12 }
 0x39d   : > { %1692 = vrot.lane.b32.xlu0 %v4588_v47, %s5430_s19  ;;  %1766 = vrot.lane.b32.xlu1 %v4590_v19, %s3258_s17 }
 0x3a1   : > { %1768 = vrot.lane.b32.xlu0 %v4593_v24, %s3258_s17  ;;  %1798 = vrot.lane.b32.xlu1 %v4590_v19, %s5427_s1  ;;  %s5436_s17 = smov 1  }
 0x3a5   : > { %2112 = vrot.lane.b32.xlu0 %v4588_v47, %s5431_s14  ;;  %1904 = vrot.lane.b32.xlu1 %v4593_v24, %s3253_s20  ;;  %s5434_s20 = smov 127  }
 0x3a9   : > { %1690 = vrot.lane.b32.xlu0 %v4586_v44, %s5430_s19  ;;  %1794 = vrot.lane.b32.xlu1 %v4586_v44, %s5427_s1 }
 0x3ad   : > { %1716 = vrot.lane.b32.xlu0 %v4593_v24, %s5428_s27  ;;  %1714 = vrot.lane.b32.xlu1 %v4590_v19, %s5428_s27 }
 0x3b1   : > { %2060 = vrot.lane.b32.xlu0 %v4588_v47, %s5432_s15  ;;  %1746 = vrot.lane.b32.xlu1 %v4590_v19, %s5429_s18 }
 0x3b5   : > { %2092 = vrot.lane.b32.xlu0 %v4588_v47, %s5433_s11  ;;  %1852 = vrot.lane.b32.xlu1 %v4593_v24, %s3255_s12  ;;  %s5435_s12 = smov 7  }
 0x3b9   : > { %2058 = vrot.lane.b32.xlu0 %v4586_v44, %s5432_s15  ;;  %1742 = vrot.lane.b32.xlu1 %v4586_v44, %s5429_s18 }
 0x3bd   : > { %1696 = vrot.lane.b32.xlu0 %v4593_v24, %s5430_s19  ;;  %1694 = vrot.lane.b32.xlu1 %v4590_v19, %s5430_s19 }
 0x3c1   : > { %2042 = vrot.lane.b32.xlu0 %v4590_v19, %s5434_s20  ;;  %1800 = vrot.lane.b32.xlu1 %v4593_v24, %s5427_s1 }
 0x3c5   : > { %2038 = vrot.lane.b32.xlu0 %v4586_v44, %s5434_s20  ;;  %2114 = vrot.lane.b32.xlu1 %v4590_v19, %s5431_s14 }
 0x3c9   : > { %1972 = vrot.lane.b32.xlu0 %v4588_v47, %s5435_s12  ;;  %2110 = vrot.lane.b32.xlu1 %v4586_v44, %s5431_s14 }
 0x3cd   : > { %2004 = vrot.lane.b32.xlu0 %v4588_v47, %s5436_s17  ;;  %1748 = vrot.lane.b32.xlu1 %v4593_v24, %s5429_s18 }
 0x3d1   : > { %2096 = vrot.lane.b32.xlu0 %v4593_v24, %s5433_s11  ;;  %2062 = vrot.lane.b32.xlu1 %v4590_v19, %s5432_s15 }
 0x3d5   : > { %2008 = vrot.lane.b32.xlu0 %v4593_v24, %s5436_s17  ;;  %2094 = vrot.lane.b32.xlu1 %v4590_v19, %s5433_s11 }
 0x3d9   : > { %1920 = vrot.lane.b32.xlu0 %v4588_v47, %s5437_s7  ;;  %2090 = vrot.lane.b32.xlu1 %v4586_v44, %s5433_s11 }
 0x3dd   : > { %1952 = vrot.lane.b32.xlu0 %v4588_v47, %s5438_s8  ;;  %2040 = vrot.lane.b32.xlu1 %v4588_v47, %s5434_s20 }
 0x3e1   : > { %1924 = vrot.lane.b32.xlu0 %v4593_v24, %s5437_s7  ;;  %2116 = vrot.lane.b32.xlu1 %v4593_v24, %s5431_s14 }
 0x3e5   : > { %1974 = vrot.lane.b32.xlu0 %v4590_v19, %s5435_s12  ;;  %1970 = vrot.lane.b32.xlu1 %v4586_v44, %s5435_s12 }
 0x3e7   : > { %v4714_v34 = vpop.permute.xlu0 %1848  ;;  %v1869_v46 = vpop.permute.xlu1 %1868 }
 0x3e9   : > { %1922 = vrot.lane.b32.xlu0 %v4590_v19, %s5437_s7  ;;  %2002 = vrot.lane.b32.xlu1 %v4586_v44, %s5436_s17 }
 0x3eb   : > { %v1871_v6 = vpop.permute.xlu1 %1870  ;;  %v4720_v18 = vpop.permute.xlu0 %1814 }
 0x3ec   : > { %v1875_v63 = vsel %vm645_vm8, %v1869_v46, %v1871_v6 }
 0x3ed   : > { %v1880_v61 = vmul.f32 %v1875_v63, %v5439_v33  ;;  %v2235_v2 = vmul.f32 %v1875_v63, %v5440_v30  ;;  %2064 = vrot.lane.b32.xlu1 %v4593_v24, %s5432_s15 }
 0x3ef   : > { %v1888_v43 = vrot.slane %v1880_v61, 4  ;;  %v2243_v52 = vrot.slane %v2235_v2, 4  ;;  %v1901_v39 = vpop.permute.xlu1 %1900  ;;  %v4728_v55 = vpop.permute.xlu0 %1764  ;;  %v5449_v61 = vld [vmem:[#allocation76_spill] sm:$0xff]  ;;  %v5450_v2 = vld [vmem:[#allocation77_spill] sm:$0xff] }
 0x3f1   : > { %1896 = vst [vmem:[#allocation2 + $0x318] sm:$0xf0] %v1888_v43  ;;  %2251 = vst [vmem:[#allocation2 + $0x228] sm:$0xf0] %v2243_v52  ;;  %1976 = vrot.lane.b32.xlu1 %v4593_v24, %s5435_s12  ;;  %v5451_v52 = vld [vmem:[#allocation40_spill] sm:$0xff] }
 0x3f3   : > { %v4732_v31 = vpop.permute.xlu1 %1902  ;;  %v4734_v56 = vpop.permute.xlu0 %1796 }
 0x3f4   : > { %v1907_v50 = vsel %vm687_vm7, %v1901_v39, %v4732_v31 }
 0x3f5   : > { %v1912_v23 = vmul.f32 %v1907_v50, %v5441_v48  ;;  %v2255_v12 = vmul.f32 %v1907_v50, %v5442_v7  ;;  %1918 = vrot.lane.b32.xlu1 %v4586_v44, %s5437_s7  ;;  %v5452_v48 = vld [vmem:[#allocation41_spill] sm:$0xff] }
 0x3f7   : > { %1916 = vst [vmem:[#allocation2 + $0x198] sm:$0xf] %v1912_v23  ;;  %2259 = vst [vmem:[#allocation2 + $0x208] sm:$0xf] %v2255_v12  ;;  %v1873_v20 = vpop.permute.xlu0 %1872  ;;  %v1867_v8 = vpop.permute.xlu1 %1866 }
 0x3f8   : > { %v1874_v45 = vsel %vm645_vm8, %v1871_v6, %v1873_v20  ;;  %v1876_v40 = vsel %vm645_vm8, %v1867_v8, %v1869_v46  ;;  %v1877_v3 = vsel %vm645_vm8, %v1873_v20, %v1867_v8 }
 0x3f9   : > { %v1881_v10 = vmul.f32 %v1874_v45, %v5443_v37  ;;  %v2236_v13 = vmul.f32 %v1874_v45, %v5444_v62  ;;  %v1878_v21 = vmul.f32 %v1877_v3, %v5445_v58  ;;  %v1879_v1 = vmul.f32 %v1876_v40, %v5446_v36  ;;  %1950 = vrot.lane.b32.xlu1 %v4586_v44, %s5438_s8  ;;  %v5454_v37 = vld [vmem:[#allocation61_spill] sm:$0xff] }
 0x3fa   : > { %v2234_v41 = vmul.f32 %v1876_v40, %v5447_v22  ;;  %v2237_v47 = vmul.f32 %v1877_v3, %v5448_v0  ;;  %v5453_v40 = vld [vmem:[#allocation60_spill] sm:$0xff] }
 0x3fb   : > { %v1889_v5 = vrot.slane %v1881_v10, 4  ;;  %v2244_v60 = vrot.slane %v2236_v13, 4  ;;  %v1886_v28 = vrot.slane %v1878_v21, 4  ;;  %v1887_v25 = vrot.slane %v1879_v1, 4  ;;  %v4757_v16 = vpop.permute.xlu0 %1762  ;;  %v4759_v46 = vpop.permute.xlu1 %1898  ;;  %v5455_v1 = vld [vmem:[#allocation78_spill] sm:$0xff] }
 0x3fc   : > { %v2242_v6 = vrot.slane %v2234_v41, 4  ;;  %v2245_v63 = vrot.slane %v2237_v47, 4  ;;  %v1772_v33 = vsel %vm477_vm12, %v4757_v16, %v4728_v55  ;;  %v1908_v44 = vsel %vm687_vm7, %v4759_v46, %v1901_v39  ;;  %v5456_v41 = vld [vmem:[#allocation80_spill] sm:$0xff] }
 0x3fd   : > { %1897 = vst [vmem:[#allocation2 + $0x20] sm:$0xf0] %v1889_v5  ;;  %2252 = vst [vmem:[#allocation2 + $0x178] sm:$0xf0] %v2244_v60  ;;  %v1775_v30 = vmul.f32 %v1772_v33, %v5449_v61  ;;  %v2178_v43 = vmul.f32 %v1772_v33, %v5450_v2  ;;  %v1911_v50 = vmul.f32 %v1908_v44, %v5451_v52  ;;  %2044 = vrot.lane.b32.xlu1 %v4593_v24, %s5434_s20  ;;  %v5457_v33 = vld [vmem:[#allocation66_spill] sm:$0xff]  ;;  %v5458_v61 = vld [vmem:[#allocation79_spill] sm:$0xff] }
 0x3fe   : > { %1894 = vst [vmem:[#allocation2 + $0x18] sm:$0xf0] %v1886_v28  ;;  %1895 = vst [vmem:[#allocation2 + $0x2c8] sm:$0xf0] %v1887_v25  ;;  %v2254_v23 = vmul.f32 %v1908_v44, %v5452_v48  ;;  %v2316_v7 = vld [vmem:[#allocation2 + $0x208] sm:$0xf] }
 0x3ff   : > { %2250 = vst [vmem:[#allocation2 + $0x2b8] sm:$0xf0] %v2242_v6  ;;  %2253 = vst [vmem:[#allocation2 + $0x200] sm:$0xf0] %v2245_v63  ;;  %v1783_v12 = vrot.slane %v1775_v30, 4  ;;  %v2186_v39 = vrot.slane %v2178_v43, 4  ;;  %2886 = vmatprep.subr.msk.mxu0 %vm1585_vm3, %v2316_v7  ;;  %v4775_v20 = vpop.permute.xlu0 %1712  ;;  %v1817_v8 = vpop.permute.xlu1 %1816 }
 0x400   : > { %1915 = vst [vmem:[#allocation2 + $0x188] sm:$0xf] %v1911_v50  ;;  %2258 = vst [vmem:[#allocation2 + $0x2e8] sm:$0xf] %v2254_v23  ;;  %v1824_v45 = vsel %vm561_vm10, %v4720_v18, %v1817_v8  ;;  %v5459_v2 = vld [vmem:[#allocation81_spill] sm:$0xff]  ;;  %v5460_v52 = vld [vmem:[#allocation67_spill] sm:$0xff] }
 0x401   : > { %1791 = vst [vmem:[#allocation2 + $0x38] sm:$0xf0] %v1783_v12  ;;  %2194 = vst [vmem:[#allocation2 + $0x1a8] sm:$0xf0] %v2186_v39  ;;  %v1827_v3 = vmul.f32 %v1824_v45, %v5453_v40  ;;  %v2206_v10 = vmul.f32 %v1824_v45, %v5454_v37  ;;  %1956 = vrot.lane.b32.xlu1 %v4593_v24, %s5438_s8  ;;  %v5461_v48 = vld [vmem:[#allocation70_spill] sm:$0xff]  ;;  %v5462_v23 = vld [vmem:[#allocation72_spill] sm:$0xff] }
 0x403   : > { %v1835_v62 = vrot.slane %v1827_v3, 4  ;;  %v2214_v13 = vrot.slane %v2206_v10, 4  ;;  %v4784_v58 = vpop.permute.xlu0 %1744  ;;  %v1819_v21 = vpop.permute.xlu1 %1818  ;;  %v5463_v10 = vld [vmem:[#allocation92_spill] sm:$0xff] }
 0x404   : > { %v1823_v36 = vsel %vm561_vm10, %v1817_v8, %v1819_v21 }
 0x405   : > { %1843 = vst [vmem:[#allocation2 + $0x308] sm:$0xf0] %v1835_v62  ;;  %2222 = vst [vmem:[#allocation2 + $0x1c8] sm:$0xf0] %v2214_v13  ;;  %v1828_v22 = vmul.f32 %v1823_v36, %v5455_v1  ;;  %v2207_v0 = vmul.f32 %v1823_v36, %v5456_v41  ;;  %2006 = vrot.lane.b32.xlu1 %v4590_v19, %s5436_s17  ;;  %v5464_v13 = vld [vmem:[#allocation93_spill] sm:$0xff]  ;;  %v5465_v36 = vld [vmem:[#allocation52_spill] sm:$0xff] }
 0x407   : > { %v2315_v47 = vld [vmem:[#allocation2 + $0x2e8] sm:$0xf]  ;;  %v1836_v5 = vrot.slane %v1828_v22, 4  ;;  %v2215_v24 = vrot.slane %v2207_v0, 4  ;;  %v1821_v60 = vpop.permute.xlu0 %1820  ;;  %v4793_v28 = vpop.permute.xlu1 %1850  ;;  %v5466_v22 = vld [vmem:[#allocation53_spill] sm:$0xff]  ;;  %v3268_v0 = vmov 0.0  }
 0x408   : > { %2887 = vmatpush1.msk.msra.mxu0 %vm1585_vm3, %v2315_v47  ;;  %v1822_v25 = vsel %vm561_vm10, %v1819_v21, %v1821_v60  ;;  %v1825_v6 = vsel %vm561_vm10, %v1821_v60, %v4720_v18  ;;  %v1855_v63 = vsel %vm603_vm9, %v4714_v34, %v4793_v28  ;;  %2405 = vmatprep.mubr.f32.mxu0 %v3268_v0  ;;  %vm2325_vm10 = vcmask 883712  }
 0x409   : > { %1844 = vst [vmem:[#allocation2 + $0x138] sm:$0xf0] %v1836_v5  ;;  %2223 = vst [vmem:[#allocation2 + $0x1c0] sm:$0xf0] %v2215_v24  ;;  %v1826_v44 = vmul.f32 %v1825_v6, %v5457_v33  ;;  %v1829_v30 = vmul.f32 %v1822_v25, %v5458_v61  ;;  %v2208_v43 = vmul.f32 %v1822_v25, %v5459_v2  ;;  %1954 = vrot.lane.b32.xlu1 %v4590_v19, %s5438_s8  ;;  %v5467_v25 = vld [vmem:[#allocation94_spill] sm:$0xff]  ;;  %s2900_s8 = sshll.u32 %s3330_s25, 8 }
 0x40a   : > { %v2209_v50 = vmul.f32 %v1825_v6, %v5460_v52  ;;  %v1860_v18 = vmul.f32 %v1855_v63, %v5461_v48  ;;  %v2227_v7 = vmul.f32 %v1855_v63, %v5462_v23  ;;  %2476 = vmatprep.mubr.f32.mxu1 %v3268_v0  ;;  %v5468_v63 = vld [vmem:[#allocation96_spill] sm:$0xff]  ;;  %v3269_v48 = vmov 3   ;;  %v5469_v23 = vld [vmem:[#allocation82_spill] sm:$0xff] }
 0x40b   : > { %v1834_v12 = vrot.slane %v1826_v44, 4  ;;  %v1837_v39 = vrot.slane %v1829_v30, 4  ;;  %v2216_v8 = vrot.slane %v2208_v43, 4  ;;  %v4812_v40 = vpop.permute.xlu0 %1710  ;;  %v4814_v3 = vpop.permute.xlu1 %1846  ;;  %3019 = vset.pattern.permute.xlu0 %v3269_v48 }
 0x40c   : > { %v2217_v45 = vrot.slane %v2209_v50, 4  ;;  %1864 = vst [vmem:[#allocation2 + $0x318] sm:$0xf] %v1860_v18  ;;  %2231 = vst [vmem:[#allocation2 + $0x228] sm:$0xf] %v2227_v7  ;;  %v1720_v37 = vsel %vm393_vm14, %v4812_v40, %v4775_v20  ;;  %v1856_v19 = vsel %vm603_vm9, %v4814_v3, %v4714_v34 }
 0x40d   : > { %1842 = vst [vmem:[#allocation2 + $0x80] sm:$0xf0] %v1834_v12  ;;  %1845 = vst [vmem:[#allocation2 + $0xf0] sm:$0xf0] %v1837_v39  ;;  %v1723_v62 = vmul.f32 %v1720_v37, %v5463_v10  ;;  %v2150_v21 = vmul.f32 %v1720_v37, %v5464_v13  ;;  %v1859_v1 = vmul.f32 %v1856_v19, %v5465_v36  ;;  %v4851_v18 = vld [vmem:[%s5200_s5] sm:$0xf] }
 0x40e   : > { %2224 = vst [vmem:[#allocation2 + $0x298] sm:$0xf0] %v2216_v8  ;;  %2225 = vst [vmem:[#allocation2 + $0x310] sm:$0xf0] %v2217_v45  ;;  %v2226_v41 = vmul.f32 %v1856_v19, %v5466_v22  ;;  %v5470_v12 = vld [vmem:[#allocation95_spill] sm:$0xff]  ;;  %2322 = vperm.xlu0 %3019, %v4851_v18   ;;  %v5473_v19 = vld [vmem:[#allocation86_spill] sm:$0xff] }
 0x40f   : > { %v1731_v47 = vrot.slane %v1723_v62, 4  ;;  %v2158_v5 = vrot.slane %v2150_v21, 4  ;;  %1863 = vst [vmem:[#allocation2 + $0x2c8] sm:$0xf] %v1859_v1  ;;  %v4830_v34 = vpop.permute.xlu0 %1692  ;;  %v1767_v24 = vpop.permute.xlu1 %1766  ;;  %v5472_v45 = vld [vmem:[#allocation83_spill] sm:$0xff]  ;;  %v5474_v62 = vld [vmem:[#allocation88_spill] sm:$0xff] }
 0x410   : > { %2230 = vst [vmem:[#allocation2 + $0x2b8] sm:$0xf] %v2226_v41  ;;  %v1771_v60 = vsel %vm477_vm12, %v4728_v55, %v1767_v24 }
 0x411   : > { %1739 = vst [vmem:[#allocation2 + $0xd0] sm:$0xf0] %v1731_v47  ;;  %2166 = vst [vmem:[#allocation2 + $0x1d0] sm:$0xf0] %v2158_v5  ;;  %v1776_v6 = vmul.f32 %v1771_v60, %v5467_v25  ;;  %v2179_v33 = vmul.f32 %v1771_v60, %v5468_v63  ;;  %v5475_v25 = vld [vmem:[#allocation44_spill] sm:$0xff]  ;;  %v5476_v63 = vld [vmem:[#allocation55_spill] sm:$0xff] }
 0x413   : > { %v1784_v44 = vrot.slane %v1776_v6, 4  ;;  %v2187_v61 = vrot.slane %v2179_v33, 4  ;;  %v1769_v30 = vpop.permute.xlu0 %1768  ;;  %v2312_v2 = vld [vmem:[#allocation2 + $0x228] sm:$0xff]  ;;  %v4837_v43 = vpop.permute.xlu1 %1798 }
 0x414   : > { %v1770_v52 = vsel %vm477_vm12, %v1767_v24, %v1769_v30  ;;  %v1773_v50 = vsel %vm477_vm12, %v1769_v30, %v4757_v16  ;;  %2347 = vmatprep.subr.mxu0 %v2312_v2  ;;  %v1803_v55 = vsel %vm519_vm11, %v4734_v56, %v4837_v43  ;;  %v5471_v16 = vld [vmem:[#allocation97_spill] sm:$0xff] }
 0x415   : > { %1792 = vst [vmem:[#allocation2 + $0xf8] sm:$0xf0] %v1784_v44  ;;  %2195 = vst [vmem:[#allocation2 + $0x230] sm:$0xf0] %v2187_v61  ;;  %v1774_v7 = vmul.f32 %v1773_v50, %v5469_v23  ;;  %v1777_v39 = vmul.f32 %v1770_v52, %v5470_v12  ;;  %v2180_v8 = vmul.f32 %v1770_v52, %v5471_v16  ;;  %v5477_v44 = vld [vmem:[#allocation57_spill] sm:$0xff]  ;;  %v5481_v12 = vld [vmem:[#allocation68_spill] sm:$0xff] }
 0x416   : > { %v2181_v37 = vmul.f32 %v1773_v50, %v5472_v45  ;;  %v1808_v10 = vmul.f32 %v1803_v55, %v5473_v19  ;;  %v2199_v13 = vmul.f32 %v1803_v55, %v5474_v62  ;;  %v5478_v30 = vld [vmem:[#allocation45_spill] sm:$0xff]  ;;  %v5479_v55 = vld [vmem:[#allocation100_spill] sm:$0xff] }
 0x417   : > { %v2311_v21 = vld [vmem:[#allocation2 + $0x2b8] sm:$0xff]  ;;  %v1782_v36 = vrot.slane %v1774_v7, 4  ;;  %v1785_v1 = vrot.slane %v1777_v39, 4  ;;  %v2188_v22 = vrot.slane %v2180_v8, 4  ;;  %v4860_v47 = vpop.permute.xlu0 %2112  ;;  %v1905_v5 = vpop.permute.xlu1 %1904 }
 0x418   : > { %v2189_v41 = vrot.slane %v2181_v37, 4  ;;  %2348 = vmatpush1.msra.mxu0 %v2311_v21  ;;  %1812 = vst [vmem:[#allocation2 + $0x138] sm:$0xf] %v1808_v10  ;;  %2203 = vst [vmem:[#allocation2 + $0x1c0] sm:$0xf] %v2199_v13  ;;  %v1906_v24 = vsel %vm687_vm7, %v4732_v31, %v1905_v5  ;;  %v1909_v60 = vsel %vm687_vm7, %v1905_v5, %v4759_v46  ;;  %v5480_v23 = vld [vmem:[#allocation101_spill] sm:$0xff] }
 0x419   : > { %1790 = vst [vmem:[#allocation2 + $0x320] sm:$0xf0] %v1782_v36  ;;  %1793 = vst [vmem:[#allocation2 + $0x100] sm:$0xf0] %v1785_v1  ;;  %v1910_v6 = vmul.f32 %v1909_v60, %v5475_v25  ;;  %v1913_v33 = vmul.f32 %v1906_v24, %v5476_v63  ;;  %v2256_v61 = vmul.f32 %v1906_v24, %v5477_v44  ;;  %v5482_v16 = vld [vmem:[#allocation69_spill] sm:$0xff]  ;;  %v5483_v13 = vld [vmem:[#allocation98_spill] sm:$0xff] }
 0x41a   : > { %2196 = vst [vmem:[#allocation2 + $0x328] sm:$0xf0] %v2188_v22  ;;  %2197 = vst [vmem:[#allocation2 + $0x290] sm:$0xf0] %v2189_v41  ;;  %v2257_v2 = vmul.f32 %v1909_v60, %v5478_v30  ;;  %v5484_v36 = vld [vmem:[#allocation99_spill] sm:$0xff] }
 0x41b   : > { %1914 = vst [vmem:[#allocation2 + $0x2c0] sm:$0xf] %v1910_v6  ;;  %1917 = vst [vmem:[#allocation2 + $0x148] sm:$0xf] %v1913_v33  ;;  %v4872_v31 = vpop.permute.xlu0 %1690  ;;  %v4874_v52 = vpop.permute.xlu1 %1794 }
 0x41c   : > { %2260 = vst [vmem:[#allocation2 + $0x2f8] sm:$0xf] %v2256_v61  ;;  %2261 = vst [vmem:[#allocation2 + $0xa8] sm:$0xf] %v2257_v2  ;;  %v1700_v46 = vsel %vm351_vm15, %v4872_v31, %v4830_v34  ;;  %v1804_v50 = vsel %vm519_vm11, %v4874_v52, %v4734_v56 }
 0x41d   : > { %v1703_v48 = vmul.f32 %v1700_v46, %v5479_v55  ;;  %v2142_v7 = vmul.f32 %v1700_v46, %v5480_v23  ;;  %v1807_v39 = vmul.f32 %v1804_v50, %v5481_v12  ;;  %v2198_v8 = vmul.f32 %v1804_v50, %v5482_v16 }
 0x41f   : > { %1707 = vst [vmem:[#allocation2 + $0xd0] sm:$0xf] %v1703_v48  ;;  %2146 = vst [vmem:[#allocation2 + $0x1d0] sm:$0xf] %v2142_v7  ;;  %v1717_v45 = vpop.permute.xlu0 %1716  ;;  %v2308_v37 = vld [vmem:[#allocation2 + $0x1c0] sm:$0xff]  ;;  %v1715_v19 = vpop.permute.xlu1 %1714  ;;  %v5487_v7 = vld [vmem:[#allocation73_spill] sm:$0xff] }
 0x420   : > { %1811 = vst [vmem:[#allocation2 + $0x308] sm:$0xf] %v1807_v39  ;;  %2202 = vst [vmem:[#allocation2 + $0x1c8] sm:$0xf] %v2198_v8  ;;  %v1721_v10 = vsel %vm393_vm14, %v1717_v45, %v4812_v40  ;;  %2349 = vmatprep.subr.mxu0 %v2308_v37  ;;  %v1718_v56 = vsel %vm393_vm14, %v1715_v19, %v1717_v45  ;;  %v1719_v62 = vsel %vm393_vm14, %v4775_v20, %v1715_v19  ;;  %v5488_v39 = vld [vmem:[#allocation59_spill] sm:$0xff]  ;;  %v5489_v37 = vld [vmem:[#allocation20_spill] sm:$0xff] }
 0x421   : > { %v1722_v21 = vmul.f32 %v1721_v10, %v5483_v13  ;;  %v2153_v1 = vmul.f32 %v1721_v10, %v5484_v36  ;;  %v1724_v22 = vmul.f32 %v1719_v62, %v4389_v14  ;;  %v1725_v41 = vmul.f32 %v1718_v56, %v4393_v27  ;;  %v5490_v10 = vld [vmem:[#allocation84_spill] sm:$0xff] }
 0x422   : > { %v2151_v5 = vmul.f32 %v1719_v62, %v4397_v17  ;;  %v2152_v40 = vmul.f32 %v1718_v56, %v4401_v35  ;;  %v5491_v62 = vld [vmem:[#allocation85_spill] sm:$0xff] }
 0x423   : > { %v2318_v24 = vld [vmem:[#allocation2 + $0xa8] sm:$0xf]  ;;  %v2317_v60 = vld [vmem:[#allocation2 + $0x2f8] sm:$0xf]  ;;  %v1730_v25 = vrot.slane %v1722_v21, 4  ;;  %v2161_v6 = vrot.slane %v2153_v1, 4  ;;  %v4902_v44 = vpop.permute.xlu0 %2060  ;;  %v4905_v20 = vpop.permute.xlu1 %1746 }
 0x424   : > { %v1732_v63 = vrot.slane %v1724_v22, 4  ;;  %v1733_v33 = vrot.slane %v1725_v41, 4  ;;  %2889 = vmatprep.subr.msk.mxu1 %vm1585_vm3, %v2318_v24  ;;  %v2159_v61 = vrot.slane %v2151_v5, 4  ;;  %v2160_v14 = vrot.slane %v2152_v40, 4  ;;  %v5492_v40 = vld [vmem:[#allocation104_spill] sm:$0xff] }
 0x425   : > { %v1751_v27 = vsel %vm435_vm13, %v4784_v58, %v4905_v20  ;;  %2890 = vmatpush1.msk.msra.mxu1 %vm1585_vm3, %v2317_v60  ;;  %1738 = vst [vmem:[#allocation2 + $0x2b0] sm:$0xf0] %v1730_v25  ;;  %2169 = vst [vmem:[#allocation2 + $0xb0] sm:$0xf0] %v2161_v6  ;;  %v5493_v60 = vld [vmem:[#allocation105_spill] sm:$0xff] }
 0x426   : > { %1740 = vst [vmem:[#allocation2 + $0x10] sm:$0xf0] %v1732_v63  ;;  %1741 = vst [vmem:[#allocation2 + $0x48] sm:$0xf0] %v1733_v33  ;;  %v1756_v35 = vmul.f32 %v1751_v27, %v4362_v4  ;;  %v2171_v17 = vmul.f32 %v1751_v27, %v4374_v49  ;;  %v5485_v4 = vld [vmem:[#allocation58_spill] sm:$0xff]  ;;  %v5486_v49 = vld [vmem:[#allocation71_spill] sm:$0xff] }
 0x427   : > { %2167 = vst [vmem:[#allocation2 + $0x1e0] sm:$0xf0] %v2159_v61  ;;  %2168 = vst [vmem:[#allocation2 + $0x2d8] sm:$0xf0] %v2160_v14  ;;  %v2307_v30 = vld [vmem:[#allocation2 + $0x1c8] sm:$0xff]  ;;  %v4914_v2 = vpop.permute.xlu0 %2092  ;;  %v1853_v46 = vpop.permute.xlu1 %1852 }
 0x428   : > { %1760 = vst [vmem:[#allocation2 + $0xf8] sm:$0xf] %v1756_v35  ;;  %2175 = vst [vmem:[#allocation2 + $0x230] sm:$0xf] %v2171_v17  ;;  %2350 = vmatpush1.msra.mxu0 %v2307_v30  ;;  %v1854_v50 = vsel %vm603_vm9, %v4793_v28, %v1853_v46  ;;  %v1857_v55 = vsel %vm603_vm9, %v1853_v46, %v4814_v3  ;;  %v5495_v35 = vld [vmem:[#allocation87_spill] sm:$0xff]  ;;  %v5496_v30 = vld [vmem:[#allocation89_spill] sm:$0xff] }
 0x429   : > { %v1858_v48 = vmul.f32 %v1857_v55, %v5485_v4  ;;  %v1861_v23 = vmul.f32 %v1854_v50, %v5486_v49  ;;  %v2228_v12 = vmul.f32 %v1854_v50, %v5487_v7  ;;  %v2229_v16 = vmul.f32 %v1857_v55, %v5488_v39  ;;  %v5497_v50 = vld [vmem:[#allocation75_spill] sm:$0xff] }
 0x42b   : > { %1862 = vst [vmem:[#allocation2 + $0x18] sm:$0xf] %v1858_v48  ;;  %1865 = vst [vmem:[#allocation2 + $0x20] sm:$0xf] %v1861_v23  ;;  %v4926_v8 = vpop.permute.xlu0 %2058  ;;  %v4928_v45 = vpop.permute.xlu1 %1742 }
 0x42c   : > { %2232 = vst [vmem:[#allocation2 + $0x178] sm:$0xf] %v2228_v12  ;;  %2233 = vst [vmem:[#allocation2 + $0x200] sm:$0xf] %v2229_v16  ;;  %v2068_v28 = vsel %vm943_vm0, %v4926_v8, %v4902_v44  ;;  %v1752_v3 = vsel %vm435_vm13, %v4928_v45, %v4784_v58 }
 0x42d   : > { %v2070_v19 = vmul.f32 %v2068_v28, %v5489_v37  ;;  %v1755_v56 = vmul.f32 %v1752_v3, %v5490_v10  ;;  %v2170_v13 = vmul.f32 %v1752_v3, %v5491_v62  ;;  %v2299_v28 = vld [vmem:[#allocation2 + $0x1d0] sm:$0xff] }
 0x42f   : > { %v2304_v21 = vld [vmem:[#allocation2 + $0x230] sm:$0xff]  ;;  %v2078_v36 = vrot.slane %v2070_v19, 4  ;;  %1759 = vst [vmem:[#allocation2 + $0x38] sm:$0xf] %v1755_v56  ;;  %2174 = vst [vmem:[#allocation2 + $0x1a8] sm:$0xf] %v2170_v13  ;;  %v1697_v1 = vpop.permute.xlu0 %1696  ;;  %v1695_v22 = vpop.permute.xlu1 %1694 }
 0x430   : > { %2351 = vmatprep.subr.mxu0 %v2304_v21  ;;  %v1701_v41 = vsel %vm351_vm15, %v1697_v1, %v4872_v31  ;;  %v1698_v58 = vsel %vm351_vm15, %v1695_v22, %v1697_v1  ;;  %v1699_v5 = vsel %vm351_vm15, %v4830_v34, %v1695_v22  ;;  %v5498_v13 = vld [vmem:[#allocation90_spill] sm:$0xff]  ;;  %v5500_v1 = vld [vmem:[#allocation103_spill] sm:$0xff] }
 0x431   : > { %2086 = vst [vmem:[#allocation2 + $0x1d8] sm:$0xf0] %v2078_v36  ;;  %v1702_v24 = vmul.f32 %v1701_v41, %v5492_v40  ;;  %v2145_v25 = vmul.f32 %v1701_v41, %v5493_v60  ;;  %v1704_v6 = vmul.f32 %v1699_v5, %v4404_v59  ;;  %v1705_v63 = vmul.f32 %v1698_v58, %v4419_v32  ;;  %v5499_v21 = vld [vmem:[#allocation102_spill] sm:$0xff]  ;;  %v5501_v41 = vld [vmem:[#allocation91_spill] sm:$0xff]  ;;  %v5502_v40 = vld [vmem:[#allocation21_spill] sm:$0xff] }
 0x432   : > { %v2143_v33 = vmul.f32 %v1699_v5, %v4435_v54  ;;  %v2144_v31 = vmul.f32 %v1698_v58, %v4439_v15  ;;  %v5494_v54 = vld [vmem:[#allocation74_spill] sm:$0xff] }
 0x433   : > { %v2314_v61 = vld [vmem:[#allocation2 + $0x200] sm:$0xff]  ;;  %v2313_v14 = vld [vmem:[#allocation2 + $0x178] sm:$0xff]  ;;  %1706 = vst [vmem:[#allocation2 + $0x2b0] sm:$0xf] %v1702_v24  ;;  %2149 = vst [vmem:[#allocation2 + $0xb0] sm:$0xf] %v2145_v25  ;;  %v4955_v34 = vpop.permute.xlu0 %2042  ;;  %v1801_v27 = vpop.permute.xlu1 %1800 }
 0x434   : > { %1708 = vst [vmem:[#allocation2 + $0x10] sm:$0xf] %v1704_v6  ;;  %1709 = vst [vmem:[#allocation2 + $0x48] sm:$0xf] %v1705_v63  ;;  %2418 = vmatprep.subr.mxu1 %v2314_v61  ;;  %v1802_v32 = vsel %vm519_vm11, %v4837_v43, %v1801_v27  ;;  %v1805_v59 = vsel %vm519_vm11, %v1801_v27, %v4874_v52  ;;  %vm2587_vm11 = vcmask 64512  }
 0x435   : > { %2147 = vst [vmem:[#allocation2 + $0x1e0] sm:$0xf] %v2143_v33  ;;  %2148 = vst [vmem:[#allocation2 + $0x2d8] sm:$0xf] %v2144_v31  ;;  %2419 = vmatpush1.msra.mxu1 %v2313_v14  ;;  %v1806_v15 = vmul.f32 %v1805_v59, %v5494_v54  ;;  %v1809_v17 = vmul.f32 %v1802_v32, %v5495_v35  ;;  %v2200_v46 = vmul.f32 %v1802_v32, %v5496_v30 }
 0x436   : > { %v2201_v55 = vmul.f32 %v1805_v59, %v5497_v50  ;;  %v2303_v4 = vld [vmem:[#allocation2 + $0x1a8] sm:$0xff] }
 0x437   : > { %1810 = vst [vmem:[#allocation2 + $0x80] sm:$0xf] %v1806_v15  ;;  %1813 = vst [vmem:[#allocation2 + $0xf0] sm:$0xf] %v1809_v17  ;;  %v4967_v48 = vpop.permute.xlu0 %2038  ;;  %2352 = vmatpush1.msra.mxu0 %v2303_v4  ;;  %v4969_v43 = vpop.permute.xlu1 %2114  ;;  %v5503_v50 = vld [vmem:[#allocation23_spill] sm:$0xff] }
 0x438   : > { %2204 = vst [vmem:[#allocation2 + $0x298] sm:$0xf] %v2200_v46  ;;  %2205 = vst [vmem:[#allocation2 + $0x310] sm:$0xf] %v2201_v55  ;;  %v2119_v52 = vsel %vm1027_vm2, %v4860_v47, %v4969_v43  ;;  %v5504_v55 = vld [vmem:[#allocation22_spill] sm:$0xff] }
 0x439   : > { %v2123_v49 = vmul.f32 %v2119_v52, %v4444_v26 }
 0x43a   : > { %v2302_v15 = vld [vmem:[#allocation2 + $0xb0] sm:$0xff] }
 0x43b   : > { %v2131_v23 = vrot.slane %v2123_v49, 4  ;;  %v4976_v7 = vpop.permute.xlu0 %1972  ;;  %v4978_v39 = vpop.permute.xlu1 %2110 }
 0x43c   : > { %v2300_v12 = vld [vmem:[#allocation2 + $0x1e0] sm:$0xff]  ;;  %v2120_v16 = vsel %vm1027_vm2, %v4978_v39, %v4860_v47  ;;  %v2301_v35 = vld [vmem:[#allocation2 + $0x2d8] sm:$0xff] }
 0x43d   : > { %2353 = vmatprep.subr.mxu0 %v2300_v12  ;;  %2139 = vst [vmem:[#allocation2 + $0x180] sm:$0xf0] %v2131_v23  ;;  %v2122_v3 = vmul.f32 %v2120_v16, %v4479_v57 }
 0x43e   : > { %2354 = vmatpush1.msra.mxu0 %v2299_v28 }
 0x43f   : > { %v2310_v37 = vld [vmem:[#allocation2 + $0x310] sm:$0xff]  ;;  %v2309_v19 = vld [vmem:[#allocation2 + $0x298] sm:$0xff]  ;;  %v2130_v26 = vrot.slane %v2122_v3, 4  ;;  %v4985_v10 = vpop.permute.xlu0 %2004  ;;  %v1749_v56 = vpop.permute.xlu1 %1748 }
 0x440   : > { %2420 = vmatprep.subr.mxu1 %v2310_v37  ;;  %v1750_v62 = vsel %vm435_vm13, %v4905_v20, %v1749_v56  ;;  %v1753_v47 = vsel %vm435_vm13, %v1749_v56, %v4928_v45 }
 0x441   : > { %2421 = vmatpush1.msra.mxu1 %v2309_v19  ;;  %2138 = vst [vmem:[#allocation2 + $0x158] sm:$0xf0] %v2130_v26  ;;  %v1754_v57 = vmul.f32 %v1753_v47, %v5498_v13  ;;  %v1757_v36 = vmul.f32 %v1750_v62, %v5499_v21  ;;  %v2172_v22 = vmul.f32 %v1750_v62, %v5500_v1 }
 0x442   : > { %v2173_v58 = vmul.f32 %v1753_v47, %v5501_v41  ;;  %v5506_v47 = vld [vmem:[#allocation30_spill] sm:$0xff] }
 0x443   : > { %1758 = vst [vmem:[#allocation2 + $0x320] sm:$0xf] %v1754_v57  ;;  %1761 = vst [vmem:[#allocation2 + $0x100] sm:$0xf] %v1757_v36  ;;  %v2097_v5 = vpop.permute.xlu0 %2096  ;;  %v4997_v20 = vpop.permute.xlu1 %2062 }
 0x444   : > { %2176 = vst [vmem:[#allocation2 + $0x328] sm:$0xf] %v2172_v22  ;;  %2177 = vst [vmem:[#allocation2 + $0x290] sm:$0xf] %v2173_v58  ;;  %v2067_v45 = vsel %vm943_vm0, %v4902_v44, %v4997_v20 }
 0x445   : > { %v2071_v24 = vmul.f32 %v2067_v45, %v5502_v40  ;;  %v5509_v45 = vld [vmem:[#allocation48_spill] sm:$0xff] }
 0x447   : > { %v2079_v60 = vrot.slane %v2071_v24, 4  ;;  %v5004_v25 = vpop.permute.xlu0 %2008  ;;  %v2095_v6 = vpop.permute.xlu1 %2094  ;;  %v5510_v24 = vld [vmem:[#allocation49_spill] sm:$0xff] }
 0x448   : > { %v2098_v63 = vsel %vm985_vm5, %v2095_v6, %v2097_v5  ;;  %v2099_v33 = vsel %vm985_vm5, %v4914_v2, %v2095_v6  ;;  %v5511_v6 = vld [vmem:[#allocation29_spill] sm:$0xff] }
 0x449   : > { %2087 = vst [vmem:[#allocation2 + $0x248] sm:$0xf0] %v2079_v60  ;;  %v2103_v31 = vmul.f32 %v2099_v33, %v4492_v38  ;;  %v2104_v61 = vmul.f32 %v2098_v63, %v4516_v53  ;;  %v5512_v33 = vld [vmem:[#allocation26_spill] sm:$0xff] }
 0x44b   : > { %v2306_v14 = vld [vmem:[#allocation2 + $0x290] sm:$0xff]  ;;  %v2305_v44 = vld [vmem:[#allocation2 + $0x328] sm:$0xff]  ;;  %2107 = vst [vmem:[#allocation2 + $0x180] sm:$0xf] %v2103_v31  ;;  %2108 = vst [vmem:[#allocation2 + $0xc0] sm:$0xf] %v2104_v61  ;;  %v5013_v27 = vpop.permute.xlu0 %1920  ;;  %v2091_v32 = vpop.permute.xlu1 %2090 }
 0x44c   : > { %2422 = vmatprep.subr.mxu1 %v2306_v14  ;;  %v2100_v59 = vsel %vm985_vm5, %v2091_v32, %v4914_v2  ;;  %v2101_v54 = vsel %vm985_vm5, %v2097_v5, %v2091_v32  ;;  %vm5507_vm5 = vcmp.lt.s32.totalorder %v3588_v9, 1 }
 0x44d   : > { %2423 = vmatpush1.msra.mxu1 %v2305_v44  ;;  %v2102_v38 = vmul.f32 %v2100_v59, %v4495_v51  ;;  %v2105_v53 = vmul.f32 %v2101_v54, %v4523_v42  ;;  %vm5508_vm7 = vmmov %vm5507_vm5 }
 0x44e   : > { %2424 = vmatprep.subr.mxu1 %v2302_v15 }
 0x44f   : > { %2425 = vmatpush1.msra.mxu1 %v2301_v35  ;;  %2106 = vst [vmem:[#allocation2 + $0x158] sm:$0xf] %v2102_v38  ;;  %2109 = vst [vmem:[#allocation2 + $0x60] sm:$0xf] %v2105_v53  ;;  %v5022_v17 = vpop.permute.xlu0 %1952  ;;  %v2041_v30 = vpop.permute.xlu1 %2040  ;;  %v5513_v38 = vld [vmem:[#allocation24_spill] sm:$0xff]  ;;  %v5514_v35 = vld [vmem:[#allocation25_spill] sm:$0xff] }
 0x450   : > { %v2047_v2 = vsel %vm901_vm1, %v2041_v30, %v4955_v34  ;;  %v2048_v46 = vsel %vm901_vm1, %v4967_v48, %v2041_v30 }
 0x451   : > { %v2050_v51 = vmul.f32 %v2048_v46, %v5503_v50  ;;  %v2051_v42 = vmul.f32 %v2047_v2, %v5504_v55 }
 0x452   : > { %v2296_v4 = vld [vmem:[#allocation2 + $0x180] sm:$0xff] }
 0x453   : > { %2054 = vst [vmem:[#allocation2 + $0x1d8] sm:$0xf] %v2050_v51  ;;  %2055 = vst [vmem:[#allocation2 + $0x248] sm:$0xf] %v2051_v42  ;;  %v5032_v52 = vpop.permute.xlu0 %1924  ;;  %2355 = vmatprep.subr.mxu0 %v2296_v4  ;;  %v2117_v49 = vpop.permute.xlu1 %2116  ;;  %v5516_v42 = vld [vmem:[#allocation38_spill] sm:$0xff] }
 0x454   : > { %v2118_v23 = vsel %vm1027_vm2, %v4969_v43, %v2117_v49  ;;  %v2121_v12 = vsel %vm1027_vm2, %v2117_v49, %v4978_v39  ;;  %v5505_v39 = vld [vmem:[#allocation37_spill] sm:$0xff] }
 0x455   : > { %v2124_v16 = vmul.f32 %v2118_v23, %v4503_v29  ;;  %v2125_v28 = vmul.f32 %v2121_v12, %v4507_v11 }
 0x456   : > { %v2295_v3 = vld [vmem:[#allocation2 + $0x158] sm:$0xff] }
 0x457   : > { %v2132_v37 = vrot.slane %v2124_v16, 4  ;;  %v2133_v19 = vrot.slane %v2125_v28, 4  ;;  %v1975_v26 = vpop.permute.xlu0 %1974  ;;  %2356 = vmatpush1.msra.mxu0 %v2295_v3  ;;  %v1971_v56 = vpop.permute.xlu1 %1970 }
 0x458   : > { %v1979_v62 = vsel %vm813_vm4, %v4976_v7, %v1975_v26  ;;  %v1980_v43 = vsel %vm813_vm4, %v1971_v56, %v4976_v7 }
 0x459   : > { %2140 = vst [vmem:[#allocation2 + $0xc0] sm:$0xf0] %v2132_v37  ;;  %2141 = vst [vmem:[#allocation2 + $0x60] sm:$0xf0] %v2133_v19  ;;  %v1984_v29 = vmul.f32 %v1979_v62, %v5505_v39  ;;  %v1983_v11 = vmul.f32 %v1980_v43, %v5506_v47  ;;  %v5517_v19 = vld [vmem:[#allocation39_spill] sm:$0xff] }
 0x45a   : > { %v2292_v13 = vld [vmem:[#allocation2 + $0x248] sm:$0xff]  ;;  %v2291_v57 = vld [vmem:[#allocation2 + $0x1d8] sm:$0xff] }
 0x45b   : > { %v1992_v21 = vrot.slane %v1984_v29, 4  ;;  %v1991_v36 = vrot.slane %v1983_v11, 4  ;;  %v1923_v1 = vpop.permute.xlu0 %1922  ;;  %2357 = vmatprep.subr.mxu0 %v2292_v13  ;;  %v2003_v22 = vpop.permute.xlu1 %2002 }
 0x45c   : > { %v1926_v41 = vsel %vm729_vm6, %v1923_v1, %v5032_v52  ;;  %v1927_v7 = vsel %vm729_vm6, %v5013_v27, %v1923_v1  ;;  %v2012_v58 = vsel %vm5507_vm5, %v2003_v22, %v4985_v10  ;;  %v2013_v5 = vsel %vm5508_vm7, %v5004_v25, %v2003_v22  ;;  %2358 = vmatpush1.msra.mxu0 %v2291_v57  ;;  %v5522_v1 = vld [vmem:[#allocation28_spill] sm:$0xff] }
 0x45d   : > { %2000 = vst [vmem:[#allocation2 + $0x340] sm:$0xf0] %v1992_v21  ;;  %1999 = vst [vmem:[#allocation2 + $0x268] sm:$0xf0] %v1991_v36  ;;  %v1932_v40 = vmul.f32 %v1927_v7, %v5509_v45  ;;  %v1933_v60 = vmul.f32 %v1926_v41, %v5510_v24  ;;  %v2014_v63 = vmul.f32 %v2013_v5, %v5511_v6  ;;  %v5521_v21 = vld [vmem:[#allocation27_spill] sm:$0xff]  ;;  %v5527_v24 = vld [vmem:[#allocation33_spill] sm:$0xff] }
 0x45e   : > { %v2015_v31 = vmul.f32 %v2012_v58, %v5512_v33  ;;  %v5524_v58 = vld [vmem:[#allocation35_spill] sm:$0xff]  ;;  %v5528_v6 = vld [vmem:[#allocation34_spill] sm:$0xff] }
 0x45f   : > { %v1940_v61 = vrot.slane %v1932_v40, 4  ;;  %v1941_v14 = vrot.slane %v1933_v60, 4  ;;  %2018 = vst [vmem:[#allocation2 + $0x190] sm:$0xf] %v2014_v63  ;;  %v2065_v44 = vpop.permute.xlu1 %2064 }
 0x460   : > { %2019 = vst [vmem:[#allocation2 + $0x250] sm:$0xf] %v2015_v31  ;;  %v2066_v32 = vsel %vm943_vm0, %v4997_v20, %v2065_v44  ;;  %v2069_v59 = vsel %vm943_vm0, %v2065_v44, %v4926_v8  ;;  %v2298_v54 = vld [vmem:[#allocation2 + $0x60] sm:$0xff]  ;;  %vm5519_vm0 = vcmp.lt.s32.totalorder %v3588_v9, 8  ;;  %v2272_v9 = vld [vmem:[#allocation2 + $0x308] sm:$0xff] }
 0x461   : > { %v2297_v15 = vld [vmem:[#allocation2 + $0xc0] sm:$0xff]  ;;  %1948 = vst [vmem:[#allocation2 + $0x198] sm:$0xf0] %v1940_v61  ;;  %1949 = vst [vmem:[#allocation2 + $0x148] sm:$0xf0] %v1941_v14  ;;  %v2072_v53 = vmul.f32 %v2066_v32, %v5513_v38  ;;  %v2073_v30 = vmul.f32 %v2069_v59, %v5514_v35  ;;  %2426 = vmatprep.subr.mxu1 %v2298_v54  ;;  %v2275_v35 = vld [vmem:[#allocation2 + $0x18] sm:$0xff] }
 0x462   : > { %2427 = vmatpush1.msra.mxu1 %v2297_v15  ;;  %v5515_v8 = vld [vmem:[#allocation31_spill] sm:$0xff]  ;;  %vm5529_vm8 = vmmov %vm5519_vm0  ;;  %v5531_v44 = vld [vmem:[#allocation42_spill] sm:$0xff] }
 0x463   : > { %v2080_v2 = vrot.slane %v2072_v53, 4  ;;  %v2081_v46 = vrot.slane %v2073_v30, 4  ;;  %v1977_v50 = vpop.permute.xlu1 %1976  ;;  %vm5530_vm9 = vmmov %vm5519_vm0  ;;  %v5532_v32 = vld [vmem:[#allocation43_spill] sm:$0xff] }
 0x464   : > { %v1978_v20 = vsel %vm813_vm4, %v1975_v26, %v1977_v50  ;;  %v1981_v51 = vsel %vm813_vm4, %v1977_v50, %v1971_v56  ;;  %v5518_v56 = vld [vmem:[#allocation36_spill] sm:$0xff]  ;;  %vm5523_vm4 = vmmov %vm5519_vm0  ;;  %v2267_v50 = vld [vmem:[#allocation2 + $0x320] sm:$0xff] }
 0x465   : > { %2088 = vst [vmem:[#allocation2 + $0x280] sm:$0xf0] %v2080_v2  ;;  %2089 = vst [vmem:[#allocation2 + $0x260] sm:$0xf0] %v2081_v46  ;;  %v1982_v55 = vmul.f32 %v1981_v51, %v5515_v8  ;;  %v1985_v4 = vmul.f32 %v1978_v20, %v5516_v42  ;;  %v2276_v53 = vld [vmem:[#allocation2 + $0x2c8] sm:$0xff]  ;;  %v2268_v46 = vld [vmem:[#allocation2 + $0x38] sm:$0xff] }
 0x466   : > { %v2287_v23 = vld [vmem:[#allocation2 + $0x190] sm:$0xff] }
 0x467   : > { %v2288_v49 = vld [vmem:[#allocation2 + $0x250] sm:$0xff]  ;;  %v1990_v12 = vrot.slane %v1982_v55, 4  ;;  %v1993_v16 = vrot.slane %v1985_v4, 4  ;;  %v1919_v28 = vpop.permute.xlu1 %1918  ;;  %v2262_v55 = vld [vmem:[%s5198_s3] sm:$0xf] }
 0x468   : > { %2359 = vmatprep.subr.mxu0 %v2288_v49  ;;  %v1928_v3 = vsel %vm729_vm6, %v1919_v28, %v5013_v27  ;;  %v1929_v37 = vsel %vm729_vm6, %v5032_v52, %v1919_v28  ;;  %v5520_v27 = vld [vmem:[#allocation32_spill] sm:$0xff]  ;;  %vm5525_vm6 = vmmov %vm5507_vm5  ;;  %v2281_v49 = vld [vmem:[#allocation2 + $0x198] sm:$0xff] }
 0x469   : > { %2360 = vmatpush1.msra.mxu0 %v2287_v23  ;;  %1998 = vst [vmem:[#allocation2 + $0x2d0] sm:$0xf0] %v1990_v12  ;;  %2001 = vst [vmem:[#allocation2 + $0x110] sm:$0xf0] %v1993_v16  ;;  %v1930_v26 = vmul.f32 %v1929_v37, %v5517_v19  ;;  %v1931_v62 = vmul.f32 %v1928_v3, %v5518_v56  ;;  %v2264_v8 = vld [vmem:[#allocation2 + $0xd0] sm:$0xff]  ;;  %v2282_v4 = vld [vmem:[#allocation2 + $0x148] sm:$0xff] }
 0x46a   : > { %v2263_v42 = vld [vmem:[#allocation2 + $0x2b0] sm:$0xff]  ;;  %v2278_v23 = vld [vmem:[#allocation2 + $0x20] sm:$0xff]  ;;  %v2277_v12 = vld [vmem:[#allocation2 + $0x318] sm:$0xff] }
 0x46b   : > { %v1938_v43 = vrot.slane %v1930_v26, 4  ;;  %v1939_v39 = vrot.slane %v1931_v62, 4  ;;  %v1951_v29 = vpop.permute.xlu1 %1950  ;;  %v5533_v16 = vld [vmem:[#allocation16_spill] sm:$0xff]  ;;  %v5534_v3 = vld [vmem:[#allocation17_spill] sm:$0xff]  ;;  %v2270_v19 = vld [vmem:[#allocation2 + $0x100] sm:$0xff] }
 0x46c   : > { %v1960_v47 = vsel %vm5519_vm0, %v1951_v29, %v5022_v17  ;;  %v2274_v28 = vld [vmem:[#allocation2 + $0xf0] sm:$0xff]  ;;  %v2273_v37 = vld [vmem:[#allocation2 + $0x138] sm:$0xff]  ;;  %v2266_v56 = vld [vmem:[#allocation2 + $0x48] sm:$0xff] }
 0x46d   : > { %1946 = vst [vmem:[#allocation2 + $0x2c0] sm:$0xf0] %v1938_v43  ;;  %1947 = vst [vmem:[#allocation2 + $0x188] sm:$0xf0] %v1939_v39  ;;  %v1963_v11 = vmul.f32 %v1960_v47, %v5520_v27  ;;  %v2269_v26 = vld [vmem:[#allocation2 + $0xf8] sm:$0xff]  ;;  %v2265_v62 = vld [vmem:[#allocation2 + $0x10] sm:$0xff] }
 0x46e   : > { %v5535_v43 = vld [vmem:[#allocation19_spill] sm:$0xff]  ;;  %v5536_v39 = vld [vmem:[#allocation18_spill] sm:$0xff] }
 0x46f   : > { %1967 = vst [vmem:[#allocation2 + $0x268] sm:$0xf] %v1963_v11  ;;  %v2045_v52 = vpop.permute.xlu1 %2044 }
 0x470   : > { %v2046_v13 = vsel %vm901_vm1, %v4955_v34, %v2045_v52  ;;  %v2049_v57 = vsel %vm901_vm1, %v2045_v52, %v4967_v48  ;;  %vm5526_vm1 = vmmov %vm5507_vm5 }
 0x471   : > { %v2052_v36 = vmul.f32 %v2046_v13, %v5521_v21  ;;  %v2053_v22 = vmul.f32 %v2049_v57, %v5522_v1 }
 0x473   : > { %2056 = vst [vmem:[#allocation2 + $0x280] sm:$0xf] %v2052_v36  ;;  %2057 = vst [vmem:[#allocation2 + $0x260] sm:$0xf] %v2053_v22  ;;  %v1957_v41 = vpop.permute.xlu1 %1956 }
 0x474   : > { %v1961_v7 = vsel %vm5523_vm4, %v1957_v41, %v1951_v29  ;;  %v2280_v15 = vld [vmem:[#allocation2 + $0x188] sm:$0xff]  ;;  %v2279_v38 = vld [vmem:[#allocation2 + $0x2c0] sm:$0xff] }
 0x475   : > { %v1962_v5 = vmul.f32 %v1961_v7, %v5524_v58  ;;  %v2586_v29 = vld [vmem:[#allocation9] sm:$0xf] }
 0x476   : > { %v2284_v45 = vld [vmem:[#allocation2 + $0x268] sm:$0xff] }
 0x477   : > { %1966 = vst [vmem:[#allocation2 + $0x2d0] sm:$0xf] %v1962_v5  ;;  %v2007_v40 = vpop.permute.xlu1 %2006  ;;  %2361 = vmatprep.subr.mxu0 %v2284_v45 }
 0x478   : > { %v2010_v34 = vsel %vm5525_vm6, %v2007_v40, %v5004_v25  ;;  %v2011_v48 = vsel %vm5526_vm1, %v4985_v10, %v2007_v40 }
 0x479   : > { %v2016_v60 = vmul.f32 %v2011_v48, %v5527_v24  ;;  %v2017_v63 = vmul.f32 %v2010_v34, %v5528_v6 }
 0x47a   : > { %v2294_v33 = vld [vmem:[#allocation2 + $0x260] sm:$0xff] }
 0x47b   : > { %v2293_v31 = vld [vmem:[#allocation2 + $0x280] sm:$0xff]  ;;  %2020 = vst [vmem:[#allocation2 + $0x8] sm:$0xf] %v2016_v60  ;;  %2021 = vst [vmem:[#allocation2 + $0x120] sm:$0xf] %v2017_v63  ;;  %2428 = vmatprep.subr.mxu1 %v2294_v33  ;;  %v1955_v61 = vpop.permute.xlu1 %1954 }
 0x47c   : > { %v1958_v14 = vsel %vm5529_vm8, %v1955_v61, %v1957_v41  ;;  %v1959_v25 = vsel %vm5530_vm9, %v5022_v17, %v1955_v61  ;;  %2429 = vmatpush1.msra.mxu1 %v2293_v31  ;;  %v2271_v17 = vld [vmem:[#allocation2 + $0x80] sm:$0xff] }
 0x47d   : > { %v1964_v10 = vmul.f32 %v1959_v25, %v5531_v44  ;;  %v1965_v59 = vmul.f32 %v1958_v14, %v5532_v32  ;;  %v3270_v25 = vmov 4   ;;  %v3271_v44 = vmov 5  }
 0x47e   : > { %v2283_v54 = vld [vmem:[#allocation2 + $0x2d0] sm:$0xff]  ;;  %3020 = vset.pattern.permute.xlu1 %v3270_v25  ;;  %3021 = vset.pattern.permute.xlu0 %v3271_v44 }
 0x47f   : > { %1968 = vst [vmem:[#allocation2 + $0x340] sm:$0xf] %v1964_v10  ;;  %1969 = vst [vmem:[#allocation2 + $0x110] sm:$0xf] %v1965_v59  ;;  %2362 = vmatpush1.msra.mxu0 %v2283_v54  ;;  %v3272_v10 = vmov 6  }
 0x480   : > { %2363 = vmatprep.subr.mxu0 %v2280_v15 }
 0x481   : > { %2364 = vmatpush1.msra.mxu0 %v2279_v38 }
 0x482   : > { %2365 = vmatprep.subr.mxu0 %v2276_v53  ;;  %v2290_v30 = vld [vmem:[#allocation2 + $0x120] sm:$0xff]  ;;  %v2289_v2 = vld [vmem:[#allocation2 + $0x8] sm:$0xff] }
 0x483   : > { %2366 = vmatpush1.msra.mxu0 %v2275_v35  ;;  %2430 = vmatprep.subr.mxu1 %v2290_v30 }
 0x484   : > { %2367 = vmatprep.subr.mxu0 %v2272_v9  ;;  %2431 = vmatpush1.msra.mxu1 %v2289_v2 }
 0x485   : > { %2368 = vmatpush1.msra.mxu0 %v2271_v17 }
 0x486   : > { %2369 = vmatprep.subr.mxu0 %v2268_v46  ;;  %v2286_v20 = vld [vmem:[#allocation2 + $0x110] sm:$0xff]  ;;  %v2285_v51 = vld [vmem:[#allocation2 + $0x340] sm:$0xff] }
 0x487   : > { %2370 = vmatpush1.msra.mxu0 %v2267_v50  ;;  %2432 = vmatprep.subr.mxu1 %v2286_v20 }
 0x488   : > { %2371 = vmatprep.subr.mxu0 %v2264_v8  ;;  %2433 = vmatpush1.msra.mxu1 %v2285_v51 }
 0x489   : > { %2372 = vmatpush1.msra.mxu0 %v2263_v42  ;;  %2434 = vmatprep.subr.mxu1 %v2282_v4  ;;  %v2323_v47 = vpop.permute.xlu0 %2322 }
 0x48a   : > { %2435 = vmatpush1.msra.mxu1 %v2281_v49  ;;  %2888 = vmatmul.mubr.msk.f32.vlgmr.msra.gmra.mxu0 %vm2325_vm10, %v2262_v55 }
 0x48b   : > { %2436 = vmatprep.subr.mxu1 %v2278_v23  ;;  %2621 = vmatprep.subr.mxu0 %v5533_v16 }
 0x48c   : > { %2437 = vmatpush1.msra.mxu1 %v2277_v12  ;;  %2622 = vmatpush1.msra.mxu0 %v5534_v3 }
 0x48d   : > { %2438 = vmatprep.subr.mxu1 %v2274_v28  ;;  %2655 = vmatprep.mubr.f32.mxu0 %v3268_v0 }
 0x48e   : > { %2439 = vmatpush1.msra.mxu1 %v2273_v37  ;;  %2892 = vmatmul.mubr.msk.f32.vlgmr.msra.gmra.mxu0 %vm2587_vm11, %v2586_v29 }
 0x48f   : > { %2440 = vmatprep.subr.mxu1 %v2270_v19 }
 0x490   : > { %2441 = vmatpush1.msra.mxu1 %v2269_v26 }
 0x491   : > { %2442 = vmatprep.subr.mxu1 %v2266_v56 }
 0x492   : > { %2443 = vmatpush1.msra.mxu1 %v2265_v62 }
 0x493   : > { %2891 = vmatmul.mubr.msk.f32.vlgmr.msra.gmra.mxu1 %vm2325_vm10, %v2262_v55  ;;  %2692 = vmatprep.subr.mxu1 %v5535_v43 }
 0x494   : > { %2693 = vmatpush1.msra.mxu1 %v5536_v39  ;;  %2726 = vmatprep.mubr.f32.mxu1 %v3268_v0 }
 0x497   : > { %2893 = vmatmul.mubr.msk.f32.vlgmr.msra.gmra.mxu1 %vm2587_vm11, %v2586_v29 }
 0x54a   : > { %v2407_v27 = vpop.f32.mrf.mxu0 }
 0x54b   : > { %v5129_v11 = vadd.f32 %v2407_v27, %v2323_v47 }
 0x54c   : > { %v2409_v52 = vpop.f32.mrf.mxu0 }
 0x54d   : > { %v5131_v13 = vadd.f32 %v2409_v52, %v2323_v47  ;;  %v2499_v57 = vmul.f32 %v5129_v11, %v5129_v11  ;;  %v2483_v0 = vsel %vm1585_vm3, %v5129_v11, 0.0 }
 0x54f   : > { %v2500_v21 = vmul.f32 %v5131_v13, %v5131_v13  ;;  %v2484_v36 = vsel %vm1585_vm3, %v5131_v13, 0.0  ;;  %v2503_v7 = vsel %vm1585_vm3, %v2499_v57, 0.0 }
 0x550   : > { %v2485_v58 = vadd.f32 %v2484_v36, %v2483_v0 }
 0x551   : > { %v2504_v22 = vsel %vm1585_vm3, %v2500_v21, 0.0 }
 0x552   : > { %v2505_v24 = vadd.f32 %v2504_v22, %v2503_v7 }
 0x553   : > { %v2478_v1 = vpop.f32.mrf.mxu1 }
 0x554   : > { %v5142_v41 = vadd.f32 %v2478_v1, %v2323_v47 }
 0x555   : > { %v2480_v5 = vpop.f32.mrf.mxu1 }
 0x556   : > { %v2486_v45 = vsel %vm1585_vm3, %v5142_v41, 0.0  ;;  %v2501_v40 = vmul.f32 %v5142_v41, %v5142_v41  ;;  %v2481_v34 = vadd.f32 %v2480_v5, %v2323_v47 }
 0x557   : > { %v2487_v48 = vadd.f32 %v2486_v45, %v2485_v58 }
 0x558   : > { %v2502_v60 = vmul.f32 %v2481_v34, %v2481_v34  ;;  %v2488_v6 = vsel %vm1585_vm3, %v2481_v34, 0.0  ;;  %v2506_v63 = vsel %vm1585_vm3, %v2501_v40, 0.0 }
 0x559   : > { %v2489_v33 = vadd.f32 %v2488_v6, %v2487_v48  ;;  %v2507_v31 = vadd.f32 %v2506_v63, %v2505_v24  ;;  %v2657_v48 = vpop.f32.mrf.mxu0  ;;  %v2728_v63 = vpop.f32.mrf.mxu1 }
 0x55a   : > { %v2508_v61 = vsel %vm1585_vm3, %v2502_v60, 0.0 }
 0x55b   : > { %2490 = vadd.xlane.f32.xlu1 %v2489_v33  ;;  %v2509_v14 = vadd.f32 %v2508_v61, %v2507_v31 }
 0x55d   : > { %2510 = vadd.xlane.f32.xlu0 %v2509_v14 }
 0x56c   : > { %2543 = vperm.xlu1 %3020, %v4851_v18  }
 0x570   : > { %3022 = vset.pattern.permute.xlu1 %v3272_v10 }
 0x571   : > { %2738 = vperm.xlu1 %3022, %v4851_v18  }
 0x573   : > { %2551 = vperm.xlu0 %3021, %v4851_v18  }
 0x577   : > { %3023 = vset.pattern.permute.xlu0 %v3272_v10  ;;  %v2659_v10 = vpop.f32.mrf.mxu0 }
 0x5e4   : > { %v2491_v32 = vpop.xlane.xlu1 %2490 }
 0x5e5   : > { %v2492_v59 = vrot.slane %v2491_v32, 4 }
 0x5e6   : > { %v2511_v54 = vpop.xlane.xlu0 %2510 }
 0x5e7   : > { %v2493_v15 = vadd.f32 %v2492_v59, %v2491_v32  ;;  %v2512_v38 = vrot.slane %v2511_v54, 4 }
 0x5e8   : > { %v2544_v12 = vpop.permute.xlu1 %2543 }
 0x5e9   : > { %v2494_v53 = vrot.slane %v2493_v15, 2  ;;  %v2513_v35 = vadd.f32 %v2512_v38, %v2511_v54 }
 0x5eb   : > { %v2514_v30 = vrot.slane %v2513_v35, 2  ;;  %v2495_v2 = vadd.f32 %v2494_v53, %v2493_v15  ;;  %v2730_v15 = vpop.f32.mrf.mxu1 }
 0x5ec   : > { %v2739_v61 = vpop.permute.xlu1 %2738 }
 0x5ed   : > { %v2496_v9 = vrot.slane %v2495_v2, 1  ;;  %v2515_v17 = vadd.f32 %v2514_v30, %v2513_v35 }
 0x5ee   : > { %v2552_v19 = vpop.permute.xlu0 %2551 }
 0x5ef   : > { %v2497_v46 = vadd.f32 %v2496_v9, %v2495_v2  ;;  %v2516_v50 = vrot.slane %v2515_v17, 1 }
 0x5f1   : > { %2907 = vpush %v2497_v46  ;;  %v2517_v20 = vadd.f32 %v2516_v50, %v2515_v17 }
 0x5f3   : > { %2909 = vpush %v2517_v20 }
 0x622   : > { %s2908_s18 = spop %2907 }
 0x623   : > { %s2521_s19 = smul.f32 0.00048828125, %s2908_s18  ;;  %s2768_s18 = scalar_lea.hbm %s5201_s6, %s2900_s8 }
 0x624   : > { %s2910_s14 = spop %2909 }
 0x625   : > { %s2525_s15 = smul.f32 %s2521_s19, %s2521_s19  ;;  %v2532_v8 = vstv %s2521_s19  ;;  %s2756_s19 = scalar_lea.sflag [#allocation5], %s3442_s26 }
 0x626   : > { %s2524_s11 = smul.f32 0.00048828125, %s2910_s14  ;;  %v2533_v55 = vsub.f32 %v5129_v11, %v2532_v8  ;;  %v2534_v42 = vsub.f32 %v5131_v13, %v2532_v8  ;;  %v2535_v4 = vsub.f32 %v5142_v41, %v2532_v8  ;;  %v2536_v49 = vsub.f32 %v2481_v34, %v2532_v8 }
 0x628   : > { %s2526_s20 = ssub.f32 %s2524_s11, %s2525_s15  ;;  %s3273_s15 = smov [#allocation11]  }
 0x629   : > { %s3173_s25 = sshll.u32 %s3273_s15, 4  ;;  %s3174_s25 = int_to_ptr.vmem [resolvable:$false] %s3173_s25 }
 0x62a   : > { %s2527_s12 = smax.f32 %s3267_s13, %s2526_s20  ;;  %s2883_s13 = sshll.u32 %s3442_s26, 4 }
 0x62b   : > { %s2528_s17 = sadd.f32 1e-05, %s2527_s12  ;;  %s305_s29 = scalar_lea.vmem [#allocation11], %s2883_s13 }
 0x62c   : > { %s2770_s16 = sshll.u32 %s305_s29, 4  ;;  %s3175_s11 = scalar_lea.vmem %s3174_s25, 512  ;;  %s2771_s16 = int_to_ptr.vmem [resolvable:$true] %s2770_s16 }
 0x62d   : > { %v2529_v18 = vstv %s2528_s17  ;;  %s3169_s14 = scalar_lea.vmem %s2771_s16, 256  ;;  %p3176_p13 = scmp.lt.s32.totalorder %s2771_s16, %s3174_s25 }
 0x62e   : > { %3043 = vrsqrt.f32 %v2529_v18  ;;  %p3170_p12 = scmp.ne.s32.totalorder %s2771_s16, %s3169_s14  ;;  %p3177_p0 = scmp.lt.s32.totalorder %s3175_s11, %s3169_s14 }
 0x630   : > { %p3171_p7 = pnand %p3170_p12, %p5537_p5  ;;  %p3178_p1 = por %p3177_p0, %p3176_p13 }
 0x632   : > { %p3172_p10 = pneg %p3171_p7 }
 0x634   : > { %p3179_p3 = pnand %p3178_p1, %p3172_p10 }
 0x63b   : > { %v3044_v51 = vpop.eup %3043 }
 0x63c   : > { %2911 = vpush %v3044_v51 }
 0x66d   : > { %s2912_s7 = spop %2911 }
 0x66e   : > { %v2537_v23 = vstv %s2912_s7 }
 0x66f   : > { %v2538_v16 = vmul.f32 %v2537_v23, %v2533_v55  ;;  %v2539_v28 = vmul.f32 %v2537_v23, %v2534_v42  ;;  %v2540_v3 = vmul.f32 %v2537_v23, %v2535_v4  ;;  %v2541_v37 = vmul.f32 %v2537_v23, %v2536_v49 }
 0x671   : > { %v2546_v26 = vmul.f32 %v2544_v12, %v2538_v16  ;;  %v2547_v56 = vmul.f32 %v2544_v12, %v2539_v28  ;;  %v2548_v62 = vmul.f32 %v2544_v12, %v2540_v3  ;;  %v2549_v43 = vmul.f32 %v2544_v12, %v2541_v37 }
 0x673   : > { %v2554_v39 = vadd.f32 %v2552_v19, %v2546_v26  ;;  %v2555_v29 = vadd.f32 %v2552_v19, %v2547_v56  ;;  %v2556_v47 = vadd.f32 %v2552_v19, %v2548_v62  ;;  %v2557_v27 = vadd.f32 %v2552_v19, %v2549_v43 }
 0x675   : > { %v2558_v11 = vsub.f32 0.0, %v2554_v39  ;;  %v2559_v52 = vsub.f32 0.0, %v2555_v29  ;;  %v2560_v13 = vsub.f32 0.0, %v2556_v47  ;;  %v2561_v57 = vsub.f32 0.0, %v2557_v27 }
 0x677   : > { %v2562_v21 = vmul.f32 1.442695, %v2558_v11  ;;  %v2564_v0 = vmul.f32 1.442695, %v2559_v52  ;;  %v2566_v36 = vmul.f32 1.442695, %v2560_v13 }
 0x678   : > { %v2568_v1 = vmul.f32 1.442695, %v2561_v57 }
 0x679   : > { %3045 = vpow2.f32 %v2562_v21 }
 0x67a   : > { %3047 = vpow2.f32 %v2564_v0 }
 0x67b   : > { %3049 = vpow2.f32 %v2566_v36 }
 0x67c   : > { %3051 = vpow2.f32 %v2568_v1 }
 0x686   : > { %v3046_v22 = vpop.eup %3045 }
 0x687   : > { %v3048_v41 = vpop.eup %3047  ;;  %v2570_v7 = vadd.f32 1.0, %v3046_v22 }
 0x688   : > { %v3050_v58 = vpop.eup %3049  ;;  %v2571_v5 = vadd.f32 1.0, %v3048_v41 }
 0x689   : > { %v3052_v45 = vpop.eup %3051  ;;  %v2572_v40 = vadd.f32 1.0, %v3050_v58  ;;  %3053 = vrcp.f32 %v2570_v7 }
 0x68a   : > { %v2573_v34 = vadd.f32 1.0, %v3052_v45  ;;  %3055 = vrcp.f32 %v2571_v5 }
 0x68b   : > { %3057 = vrcp.f32 %v2572_v40 }
 0x68c   : > { %3059 = vrcp.f32 %v2573_v34 }
 0x696   : > { %v3054_v24 = vpop.eup %3053 }
 0x697   : > { %v3056_v60 = vpop.eup %3055  ;;  %v2582_v6 = vmul.f32 %v3054_v24, %v2554_v39 }
 0x698   : > { %v3058_v33 = vpop.eup %3057  ;;  %v2583_v31 = vmul.f32 %v3056_v60, %v2555_v29 }
 0x699   : > { %v3060_v14 = vpop.eup %3059  ;;  %v2733_v25 = vadd.f32 %v2657_v48, %v2582_v6  ;;  %v2584_v44 = vmul.f32 %v3058_v33, %v2556_v47 }
 0x69a   : > { %v2734_v32 = vadd.f32 %v2659_v10, %v2583_v31  ;;  %v2585_v59 = vmul.f32 %v3060_v14, %v2557_v27 }
 0x69b   : > { %v2735_v54 = vadd.f32 %v2728_v63, %v2584_v44  ;;  %v2741_v38 = vadd.f32 %v2739_v61, %v2733_v25 }
 0x69c   : > { %v2736_v53 = vadd.f32 %v2730_v15, %v2585_v59  ;;  %v2742_v35 = vadd.f32 %v2739_v61, %v2734_v32 }
 0x69d   : > { %v2743_v30 = vadd.f32 %v2739_v61, %v2735_v54 }
 0x69e   : > { %v2744_v2 = vadd.f32 %v2739_v61, %v2736_v53  ;;  %v2749_v9 = vcombine.low %v2741_v38, %v2742_v35 }
 0x6a0   : > { %v2750_v17 = vcombine.low %v2743_v30, %v2744_v2  ;;  %2753 = vst [vmem:[%s305_s29] sm:$0xff] %v2749_v9 }
 0x6a2   : > { %2754 = vst [vmem:[%s305_s29 + $0x8] sm:$0xff] %v2750_v17 }
 0x6a3   : > { %3182 = shalt.err (!%p3179_p3)
}
 0x6a4   : > { %s3183_s20 = scalar_lea.hbm %s2768_s18, 256  ;;  %s3187_s17 = scalar_lea.hbm %s5201_s6, 512 }
 0x6a5   : > { %p3184_p4 = scmp.ne.s32.totalorder %s2768_s18, %s3183_s20  ;;  %p3188_p11 = scmp.lt.s32.totalorder %s2768_s18, %s5201_s6 }
 0x6a6   : > { %p3189_p6 = scmp.lt.s32.totalorder %s3187_s17, %s3183_s20 }
 0x6a7   : > { %p3185_p2 = pnand %p3184_p4, %p5537_p5 }
 0x6a8   : > { %p3190_p8 = por %p3189_p6, %p3188_p11 }
 0x6a9   : > { %p3186_p9 = pneg %p3185_p2 }
 0x6ab   : > { %p3191_p12 = pnand %p3190_p8, %p3186_p9 }
 0x6ad   : > { %3194 = shalt.err (!%p3191_p12)
}
 0x6ae   : > { %2927 = dma.vmem_to_hbm [thread:$0]  (%p5537_p5), %s2771_s16, 256, %s2768_s18, %s2756_s19  }
 0x6af PF: > { %s2782_s8 = sand.u32 1, %s3229_s21   ;;  %p5538_p7 = scmp.ne.s32.totalorder %s5324_s28, 0 }
 0x6b0   : > { %p5539_p10 = scmp.ge.s32.totalorder %s3241_s24, 2  ;;  %s2783_s29 = scalar_lea.sflag [#allocation5], %s2782_s8 }
 0x6b2   : > { %p2944_p13 = pnand %p5539_p10, %p5538_p7 }
 0x6b4   : > { %p2945_p0 = pneg %p2944_p13 }
 0x6b6   : > { %3224 = dma.done.wait (%p2945_p0), %s2783_s29, 256  }
 0x6b7   : > { %3226 = vsyncadd (%p2945_p0), %s2783_s29, 4294967040  ;;  %p21_p1 = scmp.ge.s32.totalorder %s3396_s30, 4   ;;  %s5540_s21 = smov %s3233_s22 }
 0x6b8   : > { %s5541_s22 = smov %s3237_s23  ;;  %s5542_s23 = smov %s3406_s9 }
 0x6b9   : > { %s5543_s24 = smov %s3396_s30  ;;  %23 = sbr.rel (!%p21_p1) target bundleno = 9 (0x9), region = 106 }
 0x6be   :  { %2788 = vsyncpa [#allocation4], 1 }
 0x6bf   :  { %2790 = vsyncpa [#allocation4 + $0x1], 1 }
 0x6c0   :  { %2791 = vsyncpa [#allocation7], 1 }
 0x6c1   :  { %2792 = vsyncpa [#allocation10], 1 }
 0x6c2   :  { %2793 = vsyncpa [#allocation5], 1 }
 0x6c3   :  { %2795 = vsyncpa [#allocation5 + $0x1], 1 }

</bundles_post_ra>
